<compile_context>
chip_gen: v6e
topology: v6e:2x2x1
jax: 0.10.0
libtpu: 0.0.40
codegen_flags: <defaults>
</compile_context>

<pallas_src>
import functools

import jax
import jax.numpy as jnp
from jax.experimental import pallas as pl
from jax.experimental.pallas import tpu as pltpu

# Logical (PyTorch) dims and lane-aligned padded dims.
D_IN, D_HID, D_OUT = 10, 1000, 10
D_IN_PAD, D_HID_PAD, D_OUT_PAD = 128, 1024, 128

# VMEM budget: ~4.5 MiB bf16 weights (single-buffered) + double-buffered
# bf16 x / f32 out tiles + 2-3 live (tile, 1024) f32 intermediates.  48 MiB is
# comfortable on v7x (64 MiB physical per TC) and a useful raise over the
# 32 MiB default scoped limit on v5e/v6e (128 MiB physical).
_VMEM_LIMIT_BYTES = 48 * 1024 * 1024
_MAX_BATCH_TILE = 1024


def _round_up(n, m):
    return (n + m - 1) // m * m


def _const_spec(shape):
    """Single-buffered constant block (same tile every grid step).

    Targeted construction-time feature check only -- does NOT swallow
    lowering/compile errors the way a blanket try/except around pallas_call
    would.  Falls back to default (double) buffering if pl.Buffered is
    unavailable in this JAX build.
    """
    try:
        return pl.BlockSpec(shape, lambda i: (0, 0), pipeline_mode=pl.Buffered(1))
    except (AttributeError, TypeError):
        return pl.BlockSpec(shape, lambda i: (0, 0))


def _mlp_kernel(x_ref,
                w1_ref, b1_ref,
                w2_ref, b2_ref,
                w3_ref, b3_ref,
                w4_ref, b4_ref,
                o_ref):
    """Fused forward: 3x (bf16 matmul + f32 bias + ReLU) + final matmul + bias.

    x_ref is already bf16; every jnp.dot accumulates in f32 on the MXU, bias
    add + ReLU run in f32 on the VPU, then re-narrow to bf16 for the next
    MXU pass.
    """
    h = jnp.dot(x_ref[...], w1_ref[...],
                preferred_element_type=jnp.float32) + b1_ref[...]
    h = jnp.maximum(h, 0.0).astype(jnp.bfloat16)

    h = jnp.dot(h, w2_ref[...],
                preferred_element_type=jnp.float32) + b2_ref[...]
    h = jnp.maximum(h, 0.0).astype(jnp.bfloat16)

    h = jnp.dot(h, w3_ref[...],
                preferred_element_type=jnp.float32) + b3_ref[...]
    h = jnp.maximum(h, 0.0).astype(jnp.bfloat16)

    out = jnp.dot(h, w4_ref[...],
                  preferred_element_type=jnp.float32) + b4_ref[...]
    o_ref[...] = out.astype(o_ref.dtype)


def _choose_tile(B, batch_tile):
    """Pick the batch tile (all inputs static at trace time)."""
    batch_tile = int(min(max(batch_tile, 8), _MAX_BATCH_TILE))
    if B <= 256:
        # Small-batch clamp: a single sublane-aligned tile covers the batch.
        return _round_up(B, 8)
    # Large batch: 256-aligned M tiles fully fill the 256x256 MXU on v6e/v7x
    # (a multiple of 128 would already suffice on v5e's 128-wide MXU).
    tile = min(_round_up(batch_tile, 256), _round_up(B, 256))
    # Guarantee >= 2 grid steps so the "parallel" grid axis can be sharded
    # across v7x's two TensorCores (harmless on single-TC v5e/v6e).
    while tile > 256 and _round_up(B, tile) // tile < 2:
        tile -= 256
    return tile


@functools.partial(jax.jit, static_argnames=("batch_tile",))
def large_net_forward(x, prepared_params, batch_tile=512):
    """x: (B, 10) float.  prepared_params: output of prepare_params()."""
    B = x.shape[0]
    tile = _choose_tile(B, batch_tile)
    B_pad = _round_up(B, tile)

    # Pad batch/features and stream the input in bf16.  This runs inside the
    # same jit as the pallas_call, so it is one fused pad, not a separate f32
    # round trip to HBM plus an extra dispatch.
    x_pad = jnp.zeros((B_pad, D_IN_PAD), jnp.bfloat16)
    x_pad = x_pad.at[:B, :x.shape[1]].set(x.astype(jnp.bfloat16))

    p = prepared_params
    weights = (p["w1"], p["b1"], p["w2"], p["b2"],
               p["w3"], p["b3"], p["w4"], p["b4"])

    flops = 2 * B_pad * (D_IN_PAD * D_HID_PAD
                         + 2 * D_HID_PAD * D_HID_PAD
                         + D_HID_PAD * D_OUT_PAD)
    bytes_accessed = (
        sum(int(a.size) * a.dtype.itemsize for a in weights)
        + int(x_pad.size) * x_pad.dtype.itemsize
        + B_pad * D_OUT_PAD * 4
    )

    out_pad = pl.pallas_call(
        _mlp_kernel,
        out_shape=jax.ShapeDtypeStruct((B_pad, D_OUT_PAD), jnp.float32),
        grid=(B_pad // tile,),
        in_specs=[pl.BlockSpec((tile, D_IN_PAD), lambda i: (i, 0))]  # x
                 + [_const_spec(a.shape) for a in weights],          # W/b
        out_specs=pl.BlockSpec((tile, D_OUT_PAD), lambda i: (i, 0)),
        compiler_params=pltpu.CompilerParams(
            dimension_semantics=("parallel",),
            vmem_limit_bytes=_VMEM_LIMIT_BYTES,
        ),
        cost_estimate=pl.CostEstimate(
            flops=flops, transcendentals=0, bytes_accessed=bytes_accessed),
    )(x_pad, *weights)

    return out_pad[:B, :D_OUT]


def init_params(key):
    """nn.Linear-style init: U(-1/sqrt(fan_in), 1/sqrt(fan_in)).

    Weights are stored transposed relative to PyTorch, i.e. (in, out). f32.
    """
    dims = [(D_IN, D_HID), (D_HID, D_HID), (D_HID, D_HID), (D_HID, D_OUT)]
    params = {}
    for idx, (fan_in, fan_out) in enumerate(dims, start=1):
        key, kw, kb = jax.random.split(key, 3)
        bound = 1.0 / jnp.sqrt(jnp.float32(fan_in))
        params[f"w{idx}"] = jax.random.uniform(
            kw, (fan_in, fan_out), jnp.float32, minval=-bound, maxval=bound)
        params[f"b{idx}"] = jax.random.uniform(
            kb, (1, fan_out), jnp.float32, minval=-bound, maxval=bound)
    return params


def prepare_params(params):
    """Zero-pad to lane-aligned dims and cast weights to bf16 (biases stay f32)."""
    # TODO(synk): optional v7x-only fp8 path for w2/w3 (~90% of FLOPs) with
    # per-output-channel scales folded into the bias add; needs tolerance
    # re-validation, so it is not enabled here.
    def pad2(a, rows, cols):
        out = jnp.zeros((rows, cols), jnp.float32)
        return out.at[:a.shape[0], :a.shape[1]].set(a)

    return {
        "w1": pad2(params["w1"], D_IN_PAD, D_HID_PAD).astype(jnp.bfloat16),
        "b1": pad2(params["b1"], 1, D_HID_PAD),
        "w2": pad2(params["w2"], D_HID_PAD, D_HID_PAD).astype(jnp.bfloat16),
        "b2": pad2(params["b2"], 1, D_HID_PAD),
        "w3": pad2(params["w3"], D_HID_PAD, D_HID_PAD).astype(jnp.bfloat16),
        "b3": pad2(params["b3"], 1, D_HID_PAD),
        "w4": pad2(params["w4"], D_HID_PAD, D_OUT_PAD).astype(jnp.bfloat16),
        "b4": pad2(params["b4"], 1, D_OUT_PAD),
    }


def reference_forward(x, params):
    """Pure f32 reference with the original (unpadded) parameters."""
    h = jnp.maximum(x @ params["w1"] + params["b1"], 0.0)
    h = jnp.maximum(h @ params["w2"] + params["b2"], 0.0)
    h = jnp.maximum(h @ params["w3"] + params["b3"], 0.0)
    return h @ params["w4"] + params["b4"]


if __name__ == "__main__":
    key = jax.random.PRNGKey(0)
    key, kx = jax.random.split(key)

    # Small batch; deliberately not a multiple of 8 to exercise batch padding.
    batch = 10
    x = jax.random.normal(kx, (batch, D_IN), dtype=jnp.float32)

    params = init_params(key)
    prepared = prepare_params(params)

    out = large_net_forward(x, prepared)
    out = jax.block_until_ready(out)

    ref = reference_forward(x, params)
    assert out.shape == (batch, D_OUT), out.shape
    # bf16 weights/activations with f32 accumulation -> loosened tolerance.
    max_err = float(jnp.max(jnp.abs(out - ref)))
    assert jnp.allclose(out, ref, atol=2e-2, rtol=2e-2), max_err

    print("KERNEL_OK")
</pallas_src>

<mosaic_0001>
module attributes {stable_mosaic.version = 11 : i64} {
  func.func @_mlp_kernel(%arg0: i32, %arg1: memref<16x128xbf16, #tpu.memory_space<vmem>>, %arg2: memref<128x1024xbf16, #tpu.memory_space<vmem>>, %arg3: memref<1x1024xf32, #tpu.memory_space<vmem>>, %arg4: memref<1024x1024xbf16, #tpu.memory_space<vmem>>, %arg5: memref<1x1024xf32, #tpu.memory_space<vmem>>, %arg6: memref<1024x1024xbf16, #tpu.memory_space<vmem>>, %arg7: memref<1x1024xf32, #tpu.memory_space<vmem>>, %arg8: memref<1024x128xbf16, #tpu.memory_space<vmem>>, %arg9: memref<1x128xf32, #tpu.memory_space<vmem>>, %arg10: memref<16x128xf32, #tpu.memory_space<vmem>>) attributes {dimension_semantics = [#tpu.dimension_semantics<parallel>], iteration_bounds = array<i64: 1>, scalar_prefetch = 0 : i64, scratch_operands = 0 : i64, tpu.core_type = #tpu.core_type<tc>, window_params = [{transform_indices = @transform_0, window_bounds = array<i64: 16, 128>}, {pipeline_mode = #tpu.pipeline_mode<synchronous>, transform_indices = @transform_1, window_bounds = array<i64: 128, 1024>}, {pipeline_mode = #tpu.pipeline_mode<synchronous>, transform_indices = @transform_2, window_bounds = array<i64: 1, 1024>}, {pipeline_mode = #tpu.pipeline_mode<synchronous>, transform_indices = @transform_3, window_bounds = array<i64: 1024, 1024>}, {pipeline_mode = #tpu.pipeline_mode<synchronous>, transform_indices = @transform_4, window_bounds = array<i64: 1, 1024>}, {pipeline_mode = #tpu.pipeline_mode<synchronous>, transform_indices = @transform_5, window_bounds = array<i64: 1024, 1024>}, {pipeline_mode = #tpu.pipeline_mode<synchronous>, transform_indices = @transform_6, window_bounds = array<i64: 1, 1024>}, {pipeline_mode = #tpu.pipeline_mode<synchronous>, transform_indices = @transform_7, window_bounds = array<i64: 1024, 128>}, {pipeline_mode = #tpu.pipeline_mode<synchronous>, transform_indices = @transform_8, window_bounds = array<i64: 1, 128>}, {transform_indices = @transform_9, window_bounds = array<i64: 16, 128>}]} {
    %c0 = arith.constant 0 : index
    %c0_0 = arith.constant 0 : index
    %0 = vector.load %arg1[%c0, %c0_0] : memref<16x128xbf16, #tpu.memory_space<vmem>>, vector<16x128xbf16>
    %c0_1 = arith.constant 0 : index
    %c0_2 = arith.constant 0 : index
    %1 = vector.load %arg2[%c0_1, %c0_2] : memref<128x1024xbf16, #tpu.memory_space<vmem>>, vector<128x1024xbf16>
    %cst = arith.constant dense<0.000000e+00> : vector<16x1024xf32>
    %2 = tpu.matmul %0, %1, %cst {dimension_numbers = #tpu.dot_dimension_numbers<[1], [0], [0], [1], [0, 0, 1, 1], [], []>} : vector<16x128xbf16>, vector<128x1024xbf16>, vector<16x1024xf32> -> vector<16x1024xf32>
    %c0_3 = arith.constant 0 : index
    %c0_4 = arith.constant 0 : index
    %3 = vector.load %arg3[%c0_3, %c0_4] : memref<1x1024xf32, #tpu.memory_space<vmem>>, vector<1x1024xf32>
    %4 = vector.broadcast %3 : vector<1x1024xf32> to vector<16x1024xf32>
    %5 = arith.addf %2, %4 : vector<16x1024xf32>
    %cst_5 = arith.constant 0.000000e+00 : f32
    %6 = vector.broadcast %cst_5 : f32 to vector<16x1024xf32>
    %7 = arith.maximumf %5, %6 : vector<16x1024xf32>
    %8 = arith.truncf %7 : vector<16x1024xf32> to vector<16x1024xbf16>
    %c0_6 = arith.constant 0 : index
    %c0_7 = arith.constant 0 : index
    %9 = vector.load %arg4[%c0_6, %c0_7] : memref<1024x1024xbf16, #tpu.memory_space<vmem>>, vector<1024x1024xbf16>
    %cst_8 = arith.constant dense<0.000000e+00> : vector<16x1024xf32>
    %10 = tpu.matmul %8, %9, %cst_8 {dimension_numbers = #tpu.dot_dimension_numbers<[1], [0], [0], [1], [0, 0, 1, 1], [], []>} : vector<16x1024xbf16>, vector<1024x1024xbf16>, vector<16x1024xf32> -> vector<16x1024xf32>
    %c0_9 = arith.constant 0 : index
    %c0_10 = arith.constant 0 : index
    %11 = vector.load %arg5[%c0_9, %c0_10] : memref<1x1024xf32, #tpu.memory_space<vmem>>, vector<1x1024xf32>
    %12 = vector.broadcast %11 : vector<1x1024xf32> to vector<16x1024xf32>
    %13 = arith.addf %10, %12 : vector<16x1024xf32>
    %cst_11 = arith.constant 0.000000e+00 : f32
    %14 = vector.broadcast %cst_11 : f32 to vector<16x1024xf32>
    %15 = arith.maximumf %13, %14 : vector<16x1024xf32>
    %16 = arith.truncf %15 : vector<16x1024xf32> to vector<16x1024xbf16>
    %c0_12 = arith.constant 0 : index
    %c0_13 = arith.constant 0 : index
    %17 = vector.load %arg6[%c0_12, %c0_13] : memref<1024x1024xbf16, #tpu.memory_space<vmem>>, vector<1024x1024xbf16>
    %cst_14 = arith.constant dense<0.000000e+00> : vector<16x1024xf32>
    %18 = tpu.matmul %16, %17, %cst_14 {dimension_numbers = #tpu.dot_dimension_numbers<[1], [0], [0], [1], [0, 0, 1, 1], [], []>} : vector<16x1024xbf16>, vector<1024x1024xbf16>, vector<16x1024xf32> -> vector<16x1024xf32>
    %c0_15 = arith.constant 0 : index
    %c0_16 = arith.constant 0 : index
    %19 = vector.load %arg7[%c0_15, %c0_16] : memref<1x1024xf32, #tpu.memory_space<vmem>>, vector<1x1024xf32>
    %20 = vector.broadcast %19 : vector<1x1024xf32> to vector<16x1024xf32>
    %21 = arith.addf %18, %20 : vector<16x1024xf32>
    %cst_17 = arith.constant 0.000000e+00 : f32
    %22 = vector.broadcast %cst_17 : f32 to vector<16x1024xf32>
    %23 = arith.maximumf %21, %22 : vector<16x1024xf32>
    %24 = arith.truncf %23 : vector<16x1024xf32> to vector<16x1024xbf16>
    %c0_18 = arith.constant 0 : index
    %c0_19 = arith.constant 0 : index
    %25 = vector.load %arg8[%c0_18, %c0_19] : memref<1024x128xbf16, #tpu.memory_space<vmem>>, vector<1024x128xbf16>
    %cst_20 = arith.constant dense<0.000000e+00> : vector<16x128xf32>
    %26 = tpu.matmul %24, %25, %cst_20 {dimension_numbers = #tpu.dot_dimension_numbers<[1], [0], [0], [1], [0, 0, 1, 1], [], []>} : vector<16x1024xbf16>, vector<1024x128xbf16>, vector<16x128xf32> -> vector<16x128xf32>
    %c0_21 = arith.constant 0 : index
    %c0_22 = arith.constant 0 : index
    %27 = vector.load %arg9[%c0_21, %c0_22] : memref<1x128xf32, #tpu.memory_space<vmem>>, vector<1x128xf32>
    %28 = vector.broadcast %27 : vector<1x128xf32> to vector<16x128xf32>
    %29 = arith.addf %26, %28 : vector<16x128xf32>
    %c0_23 = arith.constant 0 : index
    %c0_24 = arith.constant 0 : index
    %30 = vector.load %arg10[%c0_23, %c0_24] : memref<16x128xf32, #tpu.memory_space<vmem>>, vector<16x128xf32>
    tpu.vector_store %arg10[%c0_23, %c0_24], %29 {strides = array<i32>} : memref<16x128xf32, #tpu.memory_space<vmem>>, vector<16x128xf32>,
    return
  }
  func.func @transform_0(%arg0: i32) -> (i32, i32) {
    %c0_i32 = arith.constant 0 : i32
    %c0_i32_0 = arith.constant 0 : i32
    return %arg0, %c0_i32 : i32, i32
  }
  func.func @transform_1(%arg0: i32) -> (i32, i32) {
    %c0_i32 = arith.constant 0 : i32
    %c0_i32_0 = arith.constant 0 : i32
    %c0_i32_1 = arith.constant 0 : i32
    return %c0_i32, %c0_i32_0 : i32, i32
  }
  func.func @transform_2(%arg0: i32) -> (i32, i32) {
    %c0_i32 = arith.constant 0 : i32
    %c0_i32_0 = arith.constant 0 : i32
    %c0_i32_1 = arith.constant 0 : i32
    return %c0_i32, %c0_i32_0 : i32, i32
  }
  func.func @transform_3(%arg0: i32) -> (i32, i32) {
    %c0_i32 = arith.constant 0 : i32
    %c0_i32_0 = arith.constant 0 : i32
    %c0_i32_1 = arith.constant 0 : i32
    return %c0_i32, %c0_i32_0 : i32, i32
  }
  func.func @transform_4(%arg0: i32) -> (i32, i32) {
    %c0_i32 = arith.constant 0 : i32
    %c0_i32_0 = arith.constant 0 : i32
    %c0_i32_1 = arith.constant 0 : i32
    return %c0_i32, %c0_i32_0 : i32, i32
  }
  func.func @transform_5(%arg0: i32) -> (i32, i32) {
    %c0_i32 = arith.constant 0 : i32
    %c0_i32_0 = arith.constant 0 : i32
    %c0_i32_1 = arith.constant 0 : i32
    return %c0_i32, %c0_i32_0 : i32, i32
  }
  func.func @transform_6(%arg0: i32) -> (i32, i32) {
    %c0_i32 = arith.constant 0 : i32
    %c0_i32_0 = arith.constant 0 : i32
    %c0_i32_1 = arith.constant 0 : i32
    return %c0_i32, %c0_i32_0 : i32, i32
  }
  func.func @transform_7(%arg0: i32) -> (i32, i32) {
    %c0_i32 = arith.constant 0 : i32
    %c0_i32_0 = arith.constant 0 : i32
    %c0_i32_1 = arith.constant 0 : i32
    return %c0_i32, %c0_i32_0 : i32, i32
  }
  func.func @transform_8(%arg0: i32) -> (i32, i32) {
    %c0_i32 = arith.constant 0 : i32
    %c0_i32_0 = arith.constant 0 : i32
    %c0_i32_1 = arith.constant 0 : i32
    return %c0_i32, %c0_i32_0 : i32, i32
  }
  func.func @transform_9(%arg0: i32) -> (i32, i32) {
    %c0_i32 = arith.constant 0 : i32
    %c0_i32_0 = arith.constant 0 : i32
    return %arg0, %c0_i32 : i32, i32
  }
}

</mosaic_0001>

<bundles_post_ra>
// kernel: large_net_forward.1
= control target key start
LH: loop header
LB: loop body
LE: loop exit
PB: predicated region body
PF: predicated region fallthrough
CT: control target
= control target key end

     0   :  { %14 = vsyncpa [#allocation3], 0  ;;  %s11096_s0 = inlined_call_operand.vmem [shape: bf16[16,128], index: 0, kind: input, shape index: {}]   ;;  %s11097_s1 = inlined_call_operand.hbm [shape: bf16[128,1024], index: 1, kind: input, shape index: {}]   ;;  %s11098_s2 = inlined_call_operand.hbm [shape: f32[1,1024], index: 2, kind: input, shape index: {}]   ;;  %s11099_s3 = inlined_call_operand.hbm [shape: bf16[1024,1024], index: 3, kind: input, shape index: {}]   ;;  %s11100_s4 = inlined_call_operand.hbm [shape: f32[1,1024], index: 4, kind: input, shape index: {}]   ;;  %s11101_s5 = inlined_call_operand.hbm [shape: bf16[1024,1024], index: 5, kind: input, shape index: {}]   ;;  %s11102_s6 = inlined_call_operand.hbm [shape: f32[1,1024], index: 6, kind: input, shape index: {}]   ;;  %s11103_s7 = inlined_call_operand.hbm [shape: bf16[1024,128], index: 7, kind: input, shape index: {}]   ;;  %s11104_s8 = inlined_call_operand.hbm [shape: f32[1,128], index: 8, kind: input, shape index: {}]   ;;  %s11105_s9 = inlined_call_operand.hbm [shape: f32[16,128], index: 9, kind: output, shape index: {}]  }
   0x1   :  { %15 = vsyncpa [#allocation6], 0 }
   0x2   :  { %16 = vsyncpa [#allocation9], 0 }
   0x3   :  { %17 = vsyncpa [#allocation12], 0 }
   0x4   :  { %18 = vsyncpa [#allocation15], 0 }
   0x5   :  { %19 = vsyncpa [#allocation4], 0  ;;  %s10640_s30 = smov [#allocation5]   ;;  %s10641_s11 = smov [#allocation8]  }
   0x6   :  { %s40_s10 = sshll.u32 %s10640_s30, 4  ;;  %s62_s12 = sshll.u32 %s10641_s11, 4  ;;  %s41_s10 = int_to_ptr.vmem [resolvable:$true] %s40_s10  ;;  %s63_s12 = int_to_ptr.vmem [resolvable:$true] %s62_s12 }
   0x7   :  { %s10456_s13 = scalar_lea.vmem %s41_s10, 128  ;;  %p10461_p1 = scmp.lt.s32.totalorder %s41_s10, %s41_s10 }
   0x8   :  { %p10457_p0 = scmp.ne.s32.totalorder %s41_s10, %s10456_s13  ;;  %p10462_p2 = scmp.lt.s32.totalorder %s10456_s13, %s10456_s13 }
   0xa   :  { %p10463_p3 = por %p10462_p2, %p10461_p1 }
   0xc   :  { %p10464_p4 = pnand %p10463_p3, %p10457_p0 }
   0xe   :  { %10467 = shalt.err (!%p10464_p4)
}
   0xf   :  { %43 = dma.hbm_to_vmem [thread:$0]  %s11098_s2, 128, %s41_s10, [#allocation6]  }
  0x10   :  { %s10476_s16 = scalar_lea.vmem %s63_s12, 128  ;;  %p10481_p6 = scmp.lt.s32.totalorder %s63_s12, %s63_s12 }
  0x11   :  { %p10477_p5 = scmp.ne.s32.totalorder %s63_s12, %s10476_s16  ;;  %p10482_p7 = scmp.lt.s32.totalorder %s10476_s16, %s10476_s16 }
  0x13   :  { %p10483_p8 = por %p10482_p7, %p10481_p6 }
  0x15   :  { %p10484_p9 = pnand %p10483_p8, %p10477_p5 }
  0x17   :  { %10487 = shalt.err (!%p10484_p9)
}
  0x18   :  { %65 = dma.hbm_to_vmem [thread:$0]  %s11100_s4, 128, %s63_s12, [#allocation9]  }
  0x19   :  { %s10642_s19 = smov [#allocation11]   ;;  %s10643_s21 = smov [#allocation2]  }
  0x1a   :  { %s84_s20 = sshll.u32 %s10642_s19, 4  ;;  %s27_s22 = sshll.u32 %s10643_s21, 4  ;;  %s85_s20 = int_to_ptr.vmem [resolvable:$true] %s84_s20  ;;  %s28_s22 = int_to_ptr.vmem [resolvable:$true] %s27_s22 }
  0x1b   :  { %s10496_s23 = scalar_lea.vmem %s85_s20, 128  ;;  %p10501_p11 = scmp.lt.s32.totalorder %s85_s20, %s85_s20 }
  0x1c   :  { %p10497_p10 = scmp.ne.s32.totalorder %s85_s20, %s10496_s23  ;;  %p10502_p12 = scmp.lt.s32.totalorder %s10496_s23, %s10496_s23 }
  0x1e   :  { %p10503_p13 = por %p10502_p12, %p10501_p11 }
  0x20   :  { %p10504_p0 = pnand %p10503_p13, %p10497_p10 }
  0x22   :  { %10507 = shalt.err (!%p10504_p0)
}
  0x23   :  { %87 = dma.hbm_to_vmem [thread:$0]  %s11102_s6, 128, %s85_s20, [#allocation12]  }
  0x24   :  { %s10516_s25 = scalar_lea.vmem %s28_s22, 8192  ;;  %p10521_p2 = scmp.lt.s32.totalorder %s28_s22, %s28_s22 }
  0x25   :  { %p10517_p1 = scmp.ne.s32.totalorder %s28_s22, %s10516_s25  ;;  %p10522_p3 = scmp.lt.s32.totalorder %s10516_s25, %s10516_s25 }
  0x27   :  { %p10523_p4 = por %p10522_p3, %p10521_p2 }
  0x29   :  { %p10524_p5 = pnand %p10523_p4, %p10517_p1 }
  0x2b   :  { %10527 = shalt.err (!%p10524_p5)
}
  0x2c   :  { %s10644_s4 = smov 512   ;;  %s10645_s26 = smov 32  }
  0x2d   :  { %33 = dma.hbm_to_vmem [thread:$0]  %s11097_s1, 8192, %s28_s22, [#allocation3], %s10644_s4, %s10644_s4, %s10645_s26  }
  0x2e   :  { %s10646_s29 = smov [#allocation7]   ;;  %s10647_s10 = smov [#allocation10]  }
  0x2f   :  { %s49_s30 = sshll.u32 %s10646_s29, 4  ;;  %s71_s11 = sshll.u32 %s10647_s10, 4  ;;  %s50_s30 = int_to_ptr.vmem [resolvable:$true] %s49_s30  ;;  %s72_s11 = int_to_ptr.vmem [resolvable:$true] %s71_s11 }
  0x30   :  { %s10536_s6 = scalar_lea.vmem %s50_s30, 65536  ;;  %p10541_p7 = scmp.lt.s32.totalorder %s50_s30, %s50_s30 }
  0x31   :  { %p10537_p6 = scmp.ne.s32.totalorder %s50_s30, %s10536_s6  ;;  %p10542_p8 = scmp.lt.s32.totalorder %s10536_s6, %s10536_s6 }
  0x33   :  { %p10543_p9 = por %p10542_p8, %p10541_p7 }
  0x35   :  { %p10544_p10 = pnand %p10543_p9, %p10537_p6 }
  0x37   :  { %10547 = shalt.err (!%p10544_p10)
}
  0x38   :  { %55 = dma.hbm_to_vmem [thread:$0]  %s11099_s3, 65536, %s50_s30, [#allocation6], %s10644_s4, %s10644_s4, %s10645_s26  }
  0x39   :  { %s10556_s14 = scalar_lea.vmem %s72_s11, 65536  ;;  %p10561_p12 = scmp.lt.s32.totalorder %s72_s11, %s72_s11 }
  0x3a   :  { %p10557_p11 = scmp.ne.s32.totalorder %s72_s11, %s10556_s14  ;;  %p10562_p13 = scmp.lt.s32.totalorder %s10556_s14, %s10556_s14 }
  0x3c   :  { %p10563_p0 = por %p10562_p13, %p10561_p12 }
  0x3e   :  { %p10564_p1 = pnand %p10563_p0, %p10557_p11 }
  0x40   :  { %10567 = shalt.err (!%p10564_p1)
}
  0x41   :  { %77 = dma.hbm_to_vmem [thread:$0]  %s11101_s5, 65536, %s72_s11, [#allocation9], %s10644_s4, %s10644_s4, %s10645_s26  }
  0x42   :  { %s10648_s16 = smov [#allocation13]  }
  0x43   :  { %s93_s17 = sshll.u32 %s10648_s16, 4  ;;  %s94_s17 = int_to_ptr.vmem [resolvable:$true] %s93_s17 }
  0x44   :  { %s10576_s18 = scalar_lea.vmem %s94_s17, 8192  ;;  %p10581_p3 = scmp.lt.s32.totalorder %s94_s17, %s94_s17 }
  0x45   :  { %p10577_p2 = scmp.ne.s32.totalorder %s94_s17, %s10576_s18  ;;  %p10582_p4 = scmp.lt.s32.totalorder %s10576_s18, %s10576_s18 }
  0x47   :  { %p10583_p5 = por %p10582_p4, %p10581_p3 }
  0x49   :  { %p10584_p6 = pnand %p10583_p5, %p10577_p2 }
  0x4b   :  { %10587 = shalt.err (!%p10584_p6)
}
  0x4c   :  { %s10649_s3 = smov 64   ;;  %s10650_s19 = smov 4  }
  0x4d   :  { %99 = dma.hbm_to_vmem [thread:$0]  %s11103_s7, 8192, %s94_s17, [#allocation12], %s10649_s3, %s10649_s3, %s10650_s19  }
  0x4e   :  { %s10651_s22 = smov [#allocation14]  }
  0x4f   :  { %s106_s23 = sshll.u32 %s10651_s22, 4  ;;  %s107_s23 = int_to_ptr.vmem [resolvable:$true] %s106_s23 }
  0x50   :  { %s10596_s5 = scalar_lea.vmem %s107_s23, 16  ;;  %s10600_s2 = scalar_lea.vmem %s107_s23, 32 }
  0x51   :  { %p10597_p7 = scmp.ne.s32.totalorder %s107_s23, %s10596_s5  ;;  %p10601_p8 = scmp.lt.s32.totalorder %s107_s23, %s107_s23 }
  0x52   :  { %p10602_p9 = scmp.lt.s32.totalorder %s10600_s2, %s10596_s5 }
  0x54   :  { %p10603_p10 = por %p10602_p9, %p10601_p8 }
  0x56   :  { %p10604_p11 = pnand %p10603_p10, %p10597_p7 }
  0x58   :  { %10607 = shalt.err (!%p10604_p11)
}
  0x59   :  { %109 = dma.hbm_to_vmem [thread:$0]  %s11104_s8, 16, %s107_s23, [#allocation15]  }
  0x5a   :  { %10628 = dma.done.wait [#allocation3], 8192  }
  0x5b   :  { %10629 = vsyncadd [#allocation3], 4294959104 }
  0x5c   :  { %10630 = dma.done.wait [#allocation6], 65664  }
  0x5d   :  { %10631 = vsyncadd [#allocation6], 4294901632 }
  0x5e   :  { %10632 = dma.done.wait [#allocation9], 65664  }
  0x5f   :  { %10633 = vsyncadd [#allocation9], 4294901632 }
  0x60   :  { %10634 = dma.done.wait [#allocation12], 8320  }
  0x61   :  { %10635 = vsyncadd [#allocation12], 4294958976 }
  0x62   :  { %10636 = dma.done.wait [#allocation15], 16  }
  0x63   :  { %10637 = vsyncadd [#allocation15], 4294967280  ;;  %v10652_v0 = vmov 0   ;;  %v193_v1 = vld [vmem:[#allocation2 + $0x1c0] sm:$0xff]  ;;  %v194_v3 = vld [vmem:[#allocation2 + $0x1c8] sm:$0xff] }
  0x64   :  { %601 = vmatprep.mubr.bf16.mxu0 %v10652_v0  ;;  %644 = vmatprep.mubr.bf16.mxu1 %v10652_v0  ;;  %v197_v2 = vld [vmem:[#allocation2 + $0x1e0] sm:$0xff]  ;;  %v198_v5 = vld [vmem:[#allocation2 + $0x1e8] sm:$0xff]  ;;  %v195_v63 = vld [vmem:[#allocation2 + $0x1d0] sm:$0xff] }
  0x65   :  { %v9181_v4 = vcombine.high %v193_v1, %v197_v2  ;;  %v9180_v6 = vcombine.low %v193_v1, %v197_v2  ;;  %v185_v7 = vld [vmem:[#allocation2 + $0x180] sm:$0xff]  ;;  %v9183_v9 = vcombine.high %v194_v3, %v198_v5  ;;  %v9182_v10 = vcombine.low %v194_v3, %v198_v5  ;;  %v186_v12 = vld [vmem:[#allocation2 + $0x188] sm:$0xff]  ;;  %v199_v1 = vld [vmem:[#allocation2 + $0x1f0] sm:$0xff] }
  0x66   :  { %v189_v8 = vld [vmem:[#allocation2 + $0x1a0] sm:$0xff]  ;;  %v190_v13 = vld [vmem:[#allocation2 + $0x1a8] sm:$0xff]  ;;  %v196_v2 = vld [vmem:[#allocation2 + $0x1d8] sm:$0xff] }
  0x67   :  { %v9173_v11 = vcombine.high %v185_v7, %v189_v8  ;;  %v177_v14 = vld [vmem:[#allocation2 + $0x140] sm:$0xff]  ;;  %569 = vmatprep.subr.bf16.mxu0 %v9181_v4  ;;  %v9175_v15 = vcombine.high %v186_v12, %v190_v13  ;;  %v178_v17 = vld [vmem:[#allocation2 + $0x148] sm:$0xff]  ;;  %612 = vmatprep.subr.bf16.mxu1 %v9183_v9  ;;  %v9172_v19 = vcombine.low %v185_v7, %v189_v8  ;;  %v200_v3 = vld [vmem:[#allocation2 + $0x1f8] sm:$0xff] }
  0x68   :  { %v181_v16 = vld [vmem:[#allocation2 + $0x160] sm:$0xff]  ;;  %v182_v18 = vld [vmem:[#allocation2 + $0x168] sm:$0xff]  ;;  %570 = vmatpush1.bf16.msra.mxu0 %v9180_v6  ;;  %613 = vmatpush1.bf16.msra.mxu1 %v9182_v10  ;;  %v9174_v20 = vcombine.low %v186_v12, %v190_v13  ;;  %v9185_v6 = vcombine.high %v195_v63, %v199_v1  ;;  %v9187_v7 = vcombine.high %v196_v2, %v200_v3  ;;  %v187_v8 = vld [vmem:[#allocation2 + $0x190] sm:$0xff] }
  0x69   :  { %571 = vmatprep.subr.bf16.mxu0 %v9173_v11  ;;  %v9165_v21 = vcombine.high %v177_v14, %v181_v16  ;;  %614 = vmatprep.subr.bf16.mxu1 %v9175_v15  ;;  %v9167_v22 = vcombine.high %v178_v17, %v182_v18  ;;  %v169_v23 = vld [vmem:[#allocation2 + $0x100] sm:$0xff]  ;;  %v170_v25 = vld [vmem:[#allocation2 + $0x108] sm:$0xff]  ;;  %v9164_v27 = vcombine.low %v177_v14, %v181_v16  ;;  %v191_v9 = vld [vmem:[#allocation2 + $0x1b0] sm:$0xff] }
  0x6a   :  { %v173_v24 = vld [vmem:[#allocation2 + $0x120] sm:$0xff]  ;;  %v174_v26 = vld [vmem:[#allocation2 + $0x128] sm:$0xff]  ;;  %v9166_v28 = vcombine.low %v178_v17, %v182_v18  ;;  %v188_v11 = vld [vmem:[#allocation2 + $0x198] sm:$0xff]  ;;  %v9184_v13 = vcombine.low %v195_v63, %v199_v1  ;;  %v9186_v14 = vcombine.low %v196_v2, %v200_v3  ;;  %v9177_v15 = vcombine.high %v187_v8, %v191_v9 }
  0x6b   :  { %v9157_v29 = vcombine.high %v169_v23, %v173_v24  ;;  %v9159_v30 = vcombine.high %v170_v25, %v174_v26  ;;  %v161_v31 = vld [vmem:[#allocation2 + $0xc0] sm:$0xff]  ;;  %v162_v33 = vld [vmem:[#allocation2 + $0xc8] sm:$0xff]  ;;  %v9156_v35 = vcombine.low %v169_v23, %v173_v24  ;;  %v9158_v36 = vcombine.low %v170_v25, %v174_v26  ;;  %v192_v12 = vld [vmem:[#allocation2 + $0x1b8] sm:$0xff] }
  0x6c   :  { %572 = vmatpush1.bf16.msra.mxu0 %v9172_v19  ;;  %615 = vmatpush1.bf16.msra.mxu1 %v9174_v20  ;;  %v165_v32 = vld [vmem:[#allocation2 + $0xe0] sm:$0xff]  ;;  %v166_v34 = vld [vmem:[#allocation2 + $0xe8] sm:$0xff]  ;;  %v9179_v16 = vcombine.high %v188_v11, %v192_v12  ;;  %v179_v17 = vld [vmem:[#allocation2 + $0x150] sm:$0xff] }
  0x6d   :  { %573 = vmatprep.subr.bf16.mxu0 %v9165_v21  ;;  %616 = vmatprep.subr.bf16.mxu1 %v9167_v22  ;;  %v9149_v37 = vcombine.high %v161_v31, %v165_v32  ;;  %v9151_v38 = vcombine.high %v162_v33, %v166_v34  ;;  %v153_v39 = vld [vmem:[#allocation2 + $0x80] sm:$0xff]  ;;  %v154_v41 = vld [vmem:[#allocation2 + $0x88] sm:$0xff]  ;;  %v9148_v43 = vcombine.low %v161_v31, %v165_v32  ;;  %v183_v18 = vld [vmem:[#allocation2 + $0x170] sm:$0xff] }
  0x6e   :  { %v157_v40 = vld [vmem:[#allocation2 + $0xa0] sm:$0xff]  ;;  %v158_v42 = vld [vmem:[#allocation2 + $0xa8] sm:$0xff]  ;;  %v9150_v44 = vcombine.low %v162_v33, %v166_v34  ;;  %v180_v19 = vld [vmem:[#allocation2 + $0x158] sm:$0xff]  ;;  %v9176_v21 = vcombine.low %v187_v8, %v191_v9  ;;  %v9178_v22 = vcombine.low %v188_v11, %v192_v12  ;;  %v9169_v23 = vcombine.high %v179_v17, %v183_v18 }
  0x6f   :  { %v9141_v45 = vcombine.high %v153_v39, %v157_v40  ;;  %v9143_v46 = vcombine.high %v154_v41, %v158_v42  ;;  %v145_v47 = vld [vmem:[#allocation2 + $0x40] sm:$0xff]  ;;  %v146_v49 = vld [vmem:[#allocation2 + $0x48] sm:$0xff]  ;;  %v9140_v51 = vcombine.low %v153_v39, %v157_v40  ;;  %v9142_v52 = vcombine.low %v154_v41, %v158_v42  ;;  %v184_v20 = vld [vmem:[#allocation2 + $0x178] sm:$0xff] }
  0x70   :  { %574 = vmatpush1.bf16.msra.mxu0 %v9164_v27  ;;  %617 = vmatpush1.bf16.msra.mxu1 %v9166_v28  ;;  %v149_v48 = vld [vmem:[#allocation2 + $0x60] sm:$0xff]  ;;  %v150_v50 = vld [vmem:[#allocation2 + $0x68] sm:$0xff]  ;;  %v9171_v24 = vcombine.high %v180_v19, %v184_v20  ;;  %v171_v25 = vld [vmem:[#allocation2 + $0x110] sm:$0xff]  ;;  %v9170_v32 = vcombine.low %v180_v19, %v184_v20 }
  0x71   :  { %575 = vmatprep.subr.bf16.mxu0 %v9157_v29  ;;  %618 = vmatprep.subr.bf16.mxu1 %v9159_v30  ;;  %v9133_v53 = vcombine.high %v145_v47, %v149_v48  ;;  %v9135_v54 = vcombine.high %v146_v49, %v150_v50  ;;  %v137_v55 = vld [vmem:[#allocation2] sm:$0xff]  ;;  %v138_v57 = vld [vmem:[#allocation2 + $0x8] sm:$0xff]  ;;  %v9132_v59 = vcombine.low %v145_v47, %v149_v48  ;;  %v175_v26 = vld [vmem:[#allocation2 + $0x130] sm:$0xff] }
  0x72   :  { %v141_v56 = vld [vmem:[#allocation2 + $0x20] sm:$0xff]  ;;  %v142_v58 = vld [vmem:[#allocation2 + $0x28] sm:$0xff]  ;;  %v9134_v60 = vcombine.low %v146_v49, %v150_v50  ;;  %v172_v27 = vld [vmem:[#allocation2 + $0x118] sm:$0xff]  ;;  %v9168_v29 = vcombine.low %v179_v17, %v183_v18  ;;  %v9161_v33 = vcombine.high %v171_v25, %v175_v26 }
  0x73   :  { %v9125_v61 = vcombine.high %v137_v55, %v141_v56  ;;  %v9127_v62 = vcombine.high %v138_v57, %v142_v58  ;;  %v9124_v4 = vcombine.low %v137_v55, %v141_v56  ;;  %v9126_v5 = vcombine.low %v138_v57, %v142_v58  ;;  %v10735_v10 = vld [vmem:[%s11096_s0] sm:$0xff]   ;;  %v176_v28 = vld [vmem:[#allocation2 + $0x138] sm:$0xff]  ;;  %v163_v30 = vld [vmem:[#allocation2 + $0xd0] sm:$0xff]  ;;  %s10653_s0 = smov [#allocation16]  }
  0x74   :  { %576 = vmatpush1.bf16.msra.mxu0 %v9156_v35  ;;  %619 = vmatpush1.bf16.msra.mxu1 %v9158_v36  ;;  %v167_v31 = vld [vmem:[#allocation2 + $0xf0] sm:$0xff]  ;;  %v164_v34 = vld [vmem:[#allocation2 + $0xd8] sm:$0xff]  ;;  %v9163_v36 = vcombine.high %v172_v27, %v176_v28  ;;  %v9162_v40 = vcombine.low %v172_v27, %v176_v28  ;;  %v949_v2 = vld [vmem:[#allocation7 + $0x5c0] sm:$0xff]  ;;  %s9107_s4 = sshll.u32 %s10653_s0, 4  ;;  %s9108_s4 = int_to_ptr.vmem [resolvable:$true] %s9107_s4 }
  0x75   :  { %577 = vmatprep.subr.bf16.mxu0 %v9149_v37  ;;  %620 = vmatprep.subr.bf16.mxu1 %v9151_v38  ;;  %v168_v35 = vld [vmem:[#allocation2 + $0xf8] sm:$0xff]  ;;  %v9160_v37 = vcombine.low %v171_v25, %v175_v26  ;;  %v155_v38 = vld [vmem:[#allocation2 + $0x90] sm:$0xff]  ;;  %v953_v3 = vld [vmem:[#allocation7 + $0x5e0] sm:$0xff]  ;;  %s10608_s26 = scalar_lea.vmem %s9108_s4, 256  ;;  %p10613_p13 = scmp.lt.s32.totalorder %s9108_s4, %s9108_s4 }
  0x76   :  { %v159_v39 = vld [vmem:[#allocation2 + $0xb0] sm:$0xff]  ;;  %v156_v41 = vld [vmem:[#allocation2 + $0x98] sm:$0xff]  ;;  %v9154_v47 = vcombine.low %v164_v34, %v168_v35  ;;  %v941_v11 = vld [vmem:[#allocation7 + $0x580] sm:$0xff]  ;;  %v9372_v17 = vcombine.low %v949_v2, %v953_v3  ;;  %p10609_p12 = scmp.ne.s32.totalorder %s9108_s4, %s10608_s26  ;;  %p10614_p0 = scmp.lt.s32.totalorder %s10608_s26, %s10608_s26 }
  0x77   :  { %v160_v42 = vld [vmem:[#allocation2 + $0xb8] sm:$0xff]  ;;  %v9145_v48 = vcombine.high %v155_v38, %v159_v39  ;;  %v945_v12 = vld [vmem:[#allocation7 + $0x5a0] sm:$0xff] }
  0x78   :  { %578 = vmatpush1.bf16.msra.mxu0 %v9148_v43  ;;  %621 = vmatpush1.bf16.msra.mxu1 %v9150_v44  ;;  %v9155_v43 = vcombine.high %v164_v34, %v168_v35  ;;  %v9152_v44 = vcombine.low %v163_v30, %v167_v31  ;;  %v148_v49 = vld [vmem:[#allocation2 + $0x58] sm:$0xff]  ;;  %v9146_v55 = vcombine.low %v156_v41, %v160_v42  ;;  %v933_v19 = vld [vmem:[#allocation7 + $0x540] sm:$0xff]  ;;  %p10615_p1 = por %p10614_p0, %p10613_p13 }
  0x79   :  { %579 = vmatprep.subr.bf16.mxu0 %v9141_v45  ;;  %622 = vmatprep.subr.bf16.mxu1 %v9143_v46  ;;  %v147_v45 = vld [vmem:[#allocation2 + $0x50] sm:$0xff]  ;;  %v152_v50 = vld [vmem:[#allocation2 + $0x78] sm:$0xff]  ;;  %v937_v20 = vld [vmem:[#allocation7 + $0x560] sm:$0xff]  ;;  %v9364_v25 = vcombine.low %v941_v11, %v945_v12 }
  0x7a   :  { %v151_v46 = vld [vmem:[#allocation2 + $0x70] sm:$0xff]  ;;  %v140_v57 = vld [vmem:[#allocation2 + $0x18] sm:$0xff]  ;;  %v9138_v63 = vcombine.low %v148_v49, %v152_v50  ;;  %v925_v27 = vld [vmem:[#allocation7 + $0x500] sm:$0xff]  ;;  %p10616_p2 = pnand %p10615_p1, %p10609_p12 }
  0x7b   :  { %v9137_v56 = vcombine.high %v147_v45, %v151_v46  ;;  %v144_v58 = vld [vmem:[#allocation2 + $0x38] sm:$0xff]  ;;  %v929_v28 = vld [vmem:[#allocation7 + $0x520] sm:$0xff] }
  0x7c   :  { %580 = vmatpush1.bf16.msra.mxu0 %v9140_v51  ;;  %623 = vmatpush1.bf16.msra.mxu1 %v9142_v52  ;;  %v9147_v51 = vcombine.high %v156_v41, %v160_v42  ;;  %v9144_v52 = vcombine.low %v155_v38, %v159_v39  ;;  %v9130_v8 = vcombine.low %v140_v57, %v144_v58  ;;  %v917_v34 = vld [vmem:[#allocation7 + $0x4c0] sm:$0xff] }
  0x7d   :  { %581 = vmatprep.subr.bf16.mxu0 %v9133_v53  ;;  %624 = vmatprep.subr.bf16.mxu1 %v9135_v54  ;;  %v139_v53 = vld [vmem:[#allocation2 + $0x10] sm:$0xff]  ;;  %v921_v35 = vld [vmem:[#allocation7 + $0x4e0] sm:$0xff] }
  0x7e   :  { %v143_v54 = vld [vmem:[#allocation2 + $0x30] sm:$0xff]  ;;  %v781_v38 = vld [vmem:[#allocation7 + $0x80] sm:$0xff] }
  0x7f   :  { %v9129_v1 = vcombine.high %v139_v53, %v143_v54  ;;  %v785_v39 = vld [vmem:[#allocation7 + $0xa0] sm:$0xff] }
  0x80   :  { %582 = vmatpush1.bf16.msra.mxu0 %v9132_v59  ;;  %625 = vmatpush1.bf16.msra.mxu1 %v9134_v60  ;;  %v9139_v59 = vcombine.high %v148_v49, %v152_v50  ;;  %v9136_v60 = vcombine.low %v147_v45, %v151_v46  ;;  %v909_v41 = vld [vmem:[#allocation7 + $0x480] sm:$0xff]  ;;  %v9340_v46 = vcombine.low %v917_v34, %v921_v35 }
  0x81   :  { %583 = vmatprep.subr.bf16.mxu0 %v9125_v61  ;;  %626 = vmatprep.subr.bf16.mxu1 %v9127_v62  ;;  %v821_v61 = vld [vmem:[#allocation7 + $0x1c0] sm:$0xff] }
  0x82   :  { %v825_v62 = vld [vmem:[#allocation7 + $0x1e0] sm:$0xff] }
  0x83   :  { %v9245_v9 = vcombine.high %v821_v61, %v825_v62  ;;  %v913_v42 = vld [vmem:[#allocation7 + $0x4a0] sm:$0xff] }
  0x84   :  { %584 = vmatpush1.bf16.msra.mxu0 %v9124_v4  ;;  %627 = vmatpush1.bf16.msra.mxu1 %v9126_v5  ;;  %v9131_v4 = vcombine.high %v140_v57, %v144_v58  ;;  %v9128_v5 = vcombine.low %v139_v53, %v143_v54  ;;  %v773_v45 = vld [vmem:[#allocation7 + $0x40] sm:$0xff]  ;;  %v9332_v53 = vcombine.low %v909_v41, %v913_v42 }
  0x85   :  { %655 = vmatprep.subr.bf16.mxu0 %v9185_v6  ;;  %698 = vmatprep.subr.bf16.mxu1 %v9187_v7  ;;  %v813_v6 = vld [vmem:[#allocation7 + $0x180] sm:$0xff] }
  0x86   :  { %v817_v7 = vld [vmem:[#allocation7 + $0x1a0] sm:$0xff] }
  0x87   :  { %602 = vmatmul.mubr.bf16.vlgmr.msra.gmra.mxu0 %v10735_v10  ;;  %645 = vmatmul.mubr.bf16.vlgmr.msra.gmra.mxu1 %v10735_v10  ;;  %v9237_v18 = vcombine.high %v813_v6, %v817_v7  ;;  %v777_v49 = vld [vmem:[#allocation7 + $0x60] sm:$0xff] }
  0x88   :  { %656 = vmatpush1.bf16.msra.mxu0 %v9184_v13  ;;  %699 = vmatpush1.bf16.msra.mxu1 %v9186_v14  ;;  %v9373_v13 = vcombine.high %v949_v2, %v953_v3  ;;  %v9244_v14 = vcombine.low %v821_v61, %v825_v62  ;;  %v901_v50 = vld [vmem:[#allocation7 + $0x440] sm:$0xff]  ;;  %v9197_v54 = vcombine.high %v773_v45, %v777_v49 }
  0x89   :  { %657 = vmatprep.subr.bf16.mxu0 %v9177_v15  ;;  %700 = vmatprep.subr.bf16.mxu1 %v9179_v16  ;;  %v805_v15 = vld [vmem:[#allocation7 + $0x140] sm:$0xff] }
  0x8a   :  { %687 = vmatprep.mubr.bf16.mxu0 %v10652_v0  ;;  %730 = vmatprep.mubr.bf16.mxu1 %v10652_v0  ;;  %v9153_v0 = vcombine.high %v163_v30, %v167_v31  ;;  %v809_v16 = vld [vmem:[#allocation7 + $0x160] sm:$0xff] }
  0x8b   :  { %v9229_v26 = vcombine.high %v805_v15, %v809_v16  ;;  %v9228_v30 = vcombine.low %v805_v15, %v809_v16  ;;  %v789_v31 = vld [vmem:[#allocation7 + $0xc0] sm:$0xff] }
  0x8c   :  { %658 = vmatpush1.bf16.msra.mxu0 %v9176_v21  ;;  %701 = vmatpush1.bf16.msra.mxu1 %v9178_v22  ;;  %v9365_v21 = vcombine.high %v941_v11, %v945_v12  ;;  %v9236_v22 = vcombine.low %v813_v6, %v817_v7  ;;  %v769_v57 = vld [vmem:[#allocation7 + $0x20] sm:$0xff] }
  0x8d   :  { %659 = vmatprep.subr.bf16.mxu0 %v9169_v23  ;;  %702 = vmatprep.subr.bf16.mxu1 %v9171_v24  ;;  %v797_v23 = vld [vmem:[#allocation7 + $0x100] sm:$0xff] }
  0x8e   :  { %v801_v24 = vld [vmem:[#allocation7 + $0x120] sm:$0xff] }
  0x8f   :  { %v893_v58 = vld [vmem:[#allocation7 + $0x400] sm:$0xff] }
  0x90   :  { %660 = vmatpush1.bf16.msra.mxu0 %v9168_v29  ;;  %703 = vmatpush1.bf16.msra.mxu1 %v9170_v32  ;;  %v9357_v29 = vcombine.high %v933_v19, %v937_v20  ;;  %v793_v32 = vld [vmem:[#allocation7 + $0xe0] sm:$0xff] }
  0x91   :  { %661 = vmatprep.subr.bf16.mxu0 %v9161_v33  ;;  %704 = vmatprep.subr.bf16.mxu1 %v9163_v36  ;;  %v9356_v33 = vcombine.low %v933_v19, %v937_v20  ;;  %v9349_v36 = vcombine.high %v925_v27, %v929_v28  ;;  %v889_v2 = vld [vmem:[#allocation7 + $0x3e0] sm:$0xff] }
  0x92   :  { %v1013_v3 = vld [vmem:[#allocation7 + $0x7c0] sm:$0xff] }
  0x93   :  { %v881_v11 = vld [vmem:[#allocation7 + $0x3a0] sm:$0xff] }
  0x94   :  { %662 = vmatpush1.bf16.msra.mxu0 %v9160_v37  ;;  %705 = vmatpush1.bf16.msra.mxu1 %v9162_v40  ;;  %v9220_v37 = vcombine.low %v797_v23, %v801_v24  ;;  %v9348_v40 = vcombine.low %v925_v27, %v929_v28  ;;  %v1005_v12 = vld [vmem:[#allocation7 + $0x780] sm:$0xff] }
  0x95   :  { %663 = vmatprep.subr.bf16.mxu0 %v9153_v0  ;;  %706 = vmatprep.subr.bf16.mxu1 %v9155_v43  ;;  %v9213_v0 = vcombine.high %v789_v31, %v793_v32  ;;  %v9341_v43 = vcombine.high %v917_v34, %v921_v35  ;;  %v873_v19 = vld [vmem:[#allocation7 + $0x360] sm:$0xff] }
  0x96   :  { %v997_v20 = vld [vmem:[#allocation7 + $0x740] sm:$0xff] }
  0x97   :  { %v865_v27 = vld [vmem:[#allocation7 + $0x320] sm:$0xff] }
  0x98   :  { %664 = vmatpush1.bf16.msra.mxu0 %v9152_v44  ;;  %707 = vmatpush1.bf16.msra.mxu1 %v9154_v47  ;;  %v9212_v44 = vcombine.low %v789_v31, %v793_v32  ;;  %v9205_v47 = vcombine.high %v781_v38, %v785_v39  ;;  %v989_v28 = vld [vmem:[#allocation7 + $0x700] sm:$0xff] }
  0x99   :  { %665 = vmatprep.subr.bf16.mxu0 %v9145_v48  ;;  %708 = vmatprep.subr.bf16.mxu1 %v9147_v51  ;;  %v9333_v48 = vcombine.high %v909_v41, %v913_v42  ;;  %v905_v51 = vld [vmem:[#allocation7 + $0x460] sm:$0xff] }
  0x9a   :  { %v9324_v61 = vcombine.low %v901_v50, %v905_v51  ;;  %v857_v34 = vld [vmem:[#allocation7 + $0x2e0] sm:$0xff] }
  0x9b   :  { %v981_v35 = vld [vmem:[#allocation7 + $0x6c0] sm:$0xff] }
  0x9c   :  { %666 = vmatpush1.bf16.msra.mxu0 %v9144_v52  ;;  %709 = vmatpush1.bf16.msra.mxu1 %v9146_v55  ;;  %v9204_v52 = vcombine.low %v781_v38, %v785_v39  ;;  %v9325_v55 = vcombine.high %v901_v50, %v905_v51  ;;  %v10743_v42 = vld [vmem:[#allocation7 + $0x9c0] sm:$0xff] }
  0x9d   :  { %667 = vmatprep.subr.bf16.mxu0 %v9137_v56  ;;  %710 = vmatprep.subr.bf16.mxu1 %v9139_v59  ;;  %v765_v56 = vld [vmem:[#allocation7] sm:$0xff] }
  0x9e   :  { %v897_v59 = vld [vmem:[#allocation7 + $0x420] sm:$0xff]  ;;  %v9189_v62 = vcombine.high %v765_v56, %v769_v57 }
  0x9f   :  { %v9316_v6 = vcombine.low %v893_v58, %v897_v59 }
  0xa0   :  { %668 = vmatpush1.bf16.msra.mxu0 %v9136_v60  ;;  %711 = vmatpush1.bf16.msra.mxu1 %v9138_v63  ;;  %v9196_v60 = vcombine.low %v773_v45, %v777_v49  ;;  %v9317_v63 = vcombine.high %v893_v58, %v897_v59  ;;  %v973_v45 = vld [vmem:[#allocation7 + $0x680] sm:$0xff] }
  0xa1   :  { %669 = vmatprep.subr.bf16.mxu0 %v9129_v1  ;;  %712 = vmatprep.subr.bf16.mxu1 %v9131_v4  ;;  %v885_v1 = vld [vmem:[#allocation7 + $0x3c0] sm:$0xff] }
  0xa2   :  { %v1017_v4 = vld [vmem:[#allocation7 + $0x7e0] sm:$0xff]  ;;  %v9309_v7 = vcombine.high %v885_v1, %v889_v2 }
  0xa3   :  { %v9436_v15 = vcombine.low %v1013_v3, %v1017_v4 }
  0xa4   :  { %670 = vmatpush1.bf16.msra.mxu0 %v9128_v5  ;;  %713 = vmatpush1.bf16.msra.mxu1 %v9130_v8  ;;  %v9188_v5 = vcombine.low %v765_v56, %v769_v57  ;;  %v9437_v8 = vcombine.high %v1013_v3, %v1017_v4  ;;  %v965_v56 = vld [vmem:[#allocation7 + $0x640] sm:$0xff] }
  0xa5   :  { %3879 = vmatprep.subr.bf16.mxu0 %v9245_v9  ;;  %3922 = vmatprep.subr.bf16.mxu1 %v9373_v13  ;;  %v877_v9 = vld [vmem:[#allocation7 + $0x380] sm:$0xff] }
  0xa6   :  { %v1009_v13 = vld [vmem:[#allocation7 + $0x7a0] sm:$0xff]  ;;  %v9301_v16 = vcombine.high %v877_v9, %v881_v11 }
  0xa7   :  { %688 = vmatmul.mubr.bf16.vlgmr.msra.gmra.mxu0 %v10735_v10  ;;  %731 = vmatmul.mubr.bf16.vlgmr.msra.gmra.mxu1 %v10735_v10  ;;  %v9221_v10 = vcombine.high %v797_v23, %v801_v24  ;;  %v9428_v23 = vcombine.low %v1005_v12, %v1009_v13  ;;  %v969_v57 = vld [vmem:[#allocation7 + $0x660] sm:$0xff] }
  0xa8   :  { %3880 = vmatpush1.bf16.msra.mxu0 %v9244_v14  ;;  %3923 = vmatpush1.bf16.msra.mxu1 %v9372_v17  ;;  %v9308_v14 = vcombine.low %v885_v1, %v889_v2  ;;  %v9429_v17 = vcombine.high %v1005_v12, %v1009_v13  ;;  %v957_v1 = vld [vmem:[#allocation7 + $0x600] sm:$0xff]  ;;  %v9388_v4 = vcombine.low %v965_v56, %v969_v57  ;;  %v203_v12 = vlaneseq }
  0xa9   :  { %3881 = vmatprep.subr.bf16.mxu0 %v9237_v18  ;;  %3924 = vmatprep.subr.bf16.mxu1 %v9365_v21  ;;  %v869_v18 = vld [vmem:[#allocation7 + $0x340] sm:$0xff] }
  0xaa   :  { %v1001_v21 = vld [vmem:[#allocation7 + $0x760] sm:$0xff]  ;;  %v9293_v24 = vcombine.high %v869_v18, %v873_v19  ;;  %v10759_v13 = vshrl.u32 %v203_v12, 7 }
  0xab   :  { %v9420_v31 = vcombine.low %v997_v20, %v1001_v21  ;;  %v961_v2 = vld [vmem:[#allocation7 + $0x620] sm:$0xff] }
  0xac   :  { %3882 = vmatpush1.bf16.msra.mxu0 %v9236_v22  ;;  %3925 = vmatpush1.bf16.msra.mxu1 %v9364_v25  ;;  %v9300_v22 = vcombine.low %v877_v9, %v881_v11  ;;  %v9421_v25 = vcombine.high %v997_v20, %v1001_v21  ;;  %v1045_v12 = vld [vmem:[#allocation7 + $0x8c0] sm:$0xff] }
  0xad   :  { %3883 = vmatprep.subr.bf16.mxu0 %v9229_v26  ;;  %3926 = vmatprep.subr.bf16.mxu1 %v9357_v29  ;;  %v861_v26 = vld [vmem:[#allocation7 + $0x300] sm:$0xff] }
  0xae   :  { %v993_v29 = vld [vmem:[#allocation7 + $0x720] sm:$0xff]  ;;  %v9285_v32 = vcombine.high %v861_v26, %v865_v27 }
  0xaf   :  { %v9412_v38 = vcombine.low %v989_v28, %v993_v29 }
  0xb0   :  { %3884 = vmatpush1.bf16.msra.mxu0 %v9228_v30  ;;  %3927 = vmatpush1.bf16.msra.mxu1 %v9356_v33  ;;  %v9292_v30 = vcombine.low %v869_v18, %v873_v19  ;;  %v9413_v33 = vcombine.high %v989_v28, %v993_v29  ;;  %v10773_v18 = vsub.s32 2, %v10759_v13 }
  0xb1   :  { %3885 = vmatprep.subr.bf16.mxu0 %v9221_v10  ;;  %3928 = vmatprep.subr.bf16.mxu1 %v9349_v36  ;;  %v853_v10 = vld [vmem:[#allocation7 + $0x2c0] sm:$0xff] }
  0xb2   :  { %v985_v36 = vld [vmem:[#allocation7 + $0x6e0] sm:$0xff]  ;;  %v9277_v39 = vcombine.high %v853_v10, %v857_v34 }
  0xb3   :  { %v9405_v41 = vcombine.high %v981_v35, %v985_v36  ;;  %v9404_v51 = vcombine.low %v981_v35, %v985_v36 }
  0xb4   :  { %3886 = vmatpush1.bf16.msra.mxu0 %v9220_v37  ;;  %3929 = vmatpush1.bf16.msra.mxu1 %v9348_v40  ;;  %v9284_v37 = vcombine.low %v861_v26, %v865_v27  ;;  %v845_v40 = vld [vmem:[#allocation7 + $0x280] sm:$0xff] }
  0xb5   :  { %3887 = vmatprep.subr.bf16.mxu0 %v9213_v0  ;;  %3930 = vmatprep.subr.bf16.mxu1 %v9341_v43  ;;  %v849_v0 = vld [vmem:[#allocation7 + $0x2a0] sm:$0xff] }
  0xb6   :  { %v10745_v43 = vld [vmem:[#allocation7 + $0x9e0] sm:$0xff]  ;;  %v9268_v58 = vcombine.low %v845_v40, %v849_v0 }
  0xb7   :  { %v9500_v49 = vcombine.low %v10743_v42, %v10745_v43  ;;  %v9501_v9 = vcombine.high %v10743_v42, %v10745_v43 }
  0xb8   :  { %3888 = vmatpush1.bf16.msra.mxu0 %v9212_v44  ;;  %3931 = vmatpush1.bf16.msra.mxu1 %v9340_v46  ;;  %v10747_v44 = vld [vmem:[#allocation7 + $0xdc0] sm:$0xff] }
  0xb9   :  { %3889 = vmatprep.subr.bf16.mxu0 %v9205_v47  ;;  %3932 = vmatprep.subr.bf16.mxu1 %v9333_v48  ;;  %v977_v46 = vld [vmem:[#allocation7 + $0x6a0] sm:$0xff]  ;;  %v9276_v48 = vcombine.low %v853_v10, %v857_v34 }
  0xba   :  { %v10749_v47 = vld [vmem:[#allocation7 + $0xde0] sm:$0xff]  ;;  %v9396_v59 = vcombine.low %v973_v45, %v977_v46 }
  0xbb   :  { %v9628_v50 = vcombine.low %v10747_v44, %v10749_v47  ;;  %v9629_v11 = vcombine.high %v10747_v44, %v10749_v47  ;;  %v1049_v44 = vld [vmem:[#allocation7 + $0x8e0] sm:$0xff] }
  0xbc   :  { %3890 = vmatpush1.bf16.msra.mxu0 %v9204_v52  ;;  %3933 = vmatpush1.bf16.msra.mxu1 %v9332_v53  ;;  %v9269_v52 = vcombine.high %v845_v40, %v849_v0  ;;  %v9397_v53 = vcombine.high %v973_v45, %v977_v46  ;;  %v1073_v45 = vld [vmem:[#allocation7 + $0x9a0] sm:$0xff] }
  0xbd   :  { %3891 = vmatprep.subr.bf16.mxu0 %v9197_v54  ;;  %3934 = vmatprep.subr.bf16.mxu1 %v9325_v55  ;;  %v837_v54 = vld [vmem:[#allocation7 + $0x240] sm:$0xff] }
  0xbe   :  { %v841_v55 = vld [vmem:[#allocation7 + $0x260] sm:$0xff] }
  0xbf   :  { %v9260_v3 = vcombine.low %v837_v54, %v841_v55  ;;  %v1173_v47 = vld [vmem:[#allocation7 + $0xcc0] sm:$0xff] }
  0xc0   :  { %3892 = vmatpush1.bf16.msra.mxu0 %v9196_v60  ;;  %3935 = vmatpush1.bf16.msra.mxu1 %v9324_v61  ;;  %v9261_v60 = vcombine.high %v837_v54, %v841_v55  ;;  %v9389_v61 = vcombine.high %v965_v56, %v969_v57 }
  0xc1   :  { %3893 = vmatprep.subr.bf16.mxu0 %v9189_v62  ;;  %3936 = vmatprep.subr.bf16.mxu1 %v9317_v63  ;;  %v829_v62 = vld [vmem:[#allocation7 + $0x200] sm:$0xff] }
  0xc2   :  { %v833_v63 = vld [vmem:[#allocation7 + $0x220] sm:$0xff] }
  0xc4   :  { %3894 = vmatpush1.bf16.msra.mxu0 %v9188_v5  ;;  %3937 = vmatpush1.bf16.msra.mxu1 %v9316_v6  ;;  %v9253_v5 = vcombine.high %v829_v62, %v833_v63  ;;  %v9381_v6 = vcombine.high %v957_v1, %v961_v2 }
  0xc5   :  { %3895 = vmatprep.subr.bf16.mxu0 %v9309_v7  ;;  %3938 = vmatprep.subr.bf16.mxu1 %v9437_v8  ;;  %v9252_v7 = vcombine.low %v829_v62, %v833_v63  ;;  %v9380_v8 = vcombine.low %v957_v1, %v961_v2  ;;  %v1065_v62 = vld [vmem:[#allocation7 + $0x960] sm:$0xff] }
  0xc6   :  { %v1189_v63 = vld [vmem:[#allocation7 + $0xd40] sm:$0xff] }
  0xc7   :  { %v1193_v1 = vld [vmem:[#allocation7 + $0xd60] sm:$0xff] }
  0xc8   :  { %3896 = vmatpush2.bf16.msra.mxu0 %v9308_v14  ;;  %3939 = vmatpush2.bf16.msra.mxu1 %v9436_v15  ;;  %v10762_v14 = vsub.s32 1, %v10759_v13  ;;  %v10765_v15 = vsub.s32 0, %v10759_v13  ;;  %v9612_v42 = vcombine.low %v1189_v63, %v1193_v1 }
  0xc9   :  { %3897 = vmatprep.subr.bf16.mxu0 %v9301_v16  ;;  %3940 = vmatprep.subr.bf16.mxu1 %v9429_v17  ;;  %v10768_v16 = vsub.s32 3, %v10759_v13  ;;  %v10770_v17 = vld [vmem:[#allocation5] sm:$0xff] }
  0xca   :  { %v210_v21 = vrot.slane %v10770_v17, %v10762_v14 }
  0xcc   :  { %3898 = vmatpush2.bf16.msra.mxu0 %v9300_v22  ;;  %3941 = vmatpush2.bf16.msra.mxu1 %v9428_v23  ;;  %v206_v22 = vrot.slane %v10770_v17, %v10765_v15 }
  0xcd   :  { %3899 = vmatprep.subr.bf16.mxu0 %v9293_v24  ;;  %3942 = vmatprep.subr.bf16.mxu1 %v9421_v25  ;;  %v218_v24 = vrot.slane %v10770_v17, %v10768_v16  ;;  %v214_v25 = vrot.slane %v10770_v17, %v10773_v18 }
  0xd0   :  { %3900 = vmatpush2.bf16.msra.mxu0 %v9292_v30  ;;  %3943 = vmatpush2.bf16.msra.mxu1 %v9420_v31 }
  0xd1   :  { %3901 = vmatprep.subr.bf16.mxu0 %v9285_v32  ;;  %3944 = vmatprep.subr.bf16.mxu1 %v9413_v33 }
  0xd4   :  { %3902 = vmatpush2.bf16.msra.mxu0 %v9284_v37  ;;  %3945 = vmatpush2.bf16.msra.mxu1 %v9412_v38 }
  0xd5   :  { %3903 = vmatprep.subr.bf16.mxu0 %v9277_v39  ;;  %3946 = vmatprep.subr.bf16.mxu1 %v9405_v41  ;;  %v1069_v41 = vld [vmem:[#allocation7 + $0x980] sm:$0xff] }
  0xd6   :  { %v9492_v2 = vcombine.low %v1069_v41, %v1073_v45 }
  0xd8   :  { %3904 = vmatpush2.bf16.msra.mxu0 %v9276_v48  ;;  %3947 = vmatpush2.bf16.msra.mxu1 %v9404_v51 }
  0xd9   :  { %3905 = vmatprep.subr.bf16.mxu0 %v9269_v52  ;;  %3948 = vmatprep.subr.bf16.mxu1 %v9397_v53  ;;  %v1197_v52 = vld [vmem:[#allocation7 + $0xd80] sm:$0xff] }
  0xda   :  { %v1201_v53 = vld [vmem:[#allocation7 + $0xda0] sm:$0xff] }
  0xdc   :  { %3906 = vmatpush2.bf16.msra.mxu0 %v9268_v58  ;;  %3949 = vmatpush2.bf16.msra.mxu1 %v9396_v59  ;;  %v9493_v58 = vcombine.high %v1069_v41, %v1073_v45  ;;  %v1021_v45 = vld [vmem:[#allocation7 + $0x800] sm:$0xff] }
  0xdd   :  { %3907 = vmatprep.subr.bf16.mxu0 %v9261_v60  ;;  %3950 = vmatprep.subr.bf16.mxu1 %v9389_v61  ;;  %v9621_v60 = vcombine.high %v1197_v52, %v1201_v53  ;;  %v1061_v61 = vld [vmem:[#allocation7 + $0x940] sm:$0xff] }
  0xe0   :  { %3908 = vmatpush2.bf16.msra.mxu0 %v9260_v3  ;;  %3951 = vmatpush2.bf16.msra.mxu1 %v9388_v4  ;;  %v9620_v3 = vcombine.low %v1197_v52, %v1201_v53  ;;  %v9485_v4 = vcombine.high %v1061_v61, %v1065_v62  ;;  %v1153_v52 = vld [vmem:[#allocation7 + $0xc20] sm:$0xff] }
  0xe1   :  { %3909 = vmatprep.subr.bf16.mxu0 %v9253_v5  ;;  %3952 = vmatprep.subr.bf16.mxu1 %v9381_v6  ;;  %v9613_v5 = vcombine.high %v1189_v63, %v1193_v1  ;;  %v1053_v6 = vld [vmem:[#allocation7 + $0x900] sm:$0xff] }
  0xe4   :  { %3910 = vmatpush2.bf16.msra.mxu0 %v9252_v7  ;;  %3953 = vmatpush2.bf16.msra.mxu1 %v9380_v8  ;;  %v1057_v7 = vld [vmem:[#allocation7 + $0x920] sm:$0xff] }
  0xe5   :  { %3965 = vmatprep.subr.bf16.mxu0 %v9501_v9  ;;  %4008 = vmatprep.subr.bf16.mxu1 %v9629_v11  ;;  %v1181_v8 = vld [vmem:[#allocation7 + $0xd00] sm:$0xff]  ;;  %v9484_v11 = vcombine.low %v1061_v61, %v1065_v62  ;;  %v9477_v43 = vcombine.high %v1053_v6, %v1057_v7 }
  0xe6   :  { %v1185_v9 = vld [vmem:[#allocation7 + $0xd20] sm:$0xff] }
 0x147   :  { %v603_v19 = vpop.f32.mrf.mxu0  ;;  %v646_v20 = vpop.f32.mrf.mxu1 }
 0x148   :  { %v604_v31 = vadd.f32 %v603_v19, %v206_v22  ;;  %v647_v34 = vadd.f32 %v646_v20, %v214_v25  ;;  %v9476_v19 = vcombine.low %v1053_v6, %v1057_v7  ;;  %v9604_v20 = vcombine.low %v1181_v8, %v1185_v9  ;;  %v1269_v6 = vld [vmem:[#allocation7 + $0xfc0] sm:$0xff] }
 0x149   :  { %v605_v23 = vpop.f32.mrf.mxu0  ;;  %v648_v26 = vpop.f32.mrf.mxu1  ;;  %v1273_v7 = vld [vmem:[#allocation7 + $0xfe0] sm:$0xff] }
 0x14a   :  { %v606_v28 = vadd.f32 %v605_v23, %v210_v21  ;;  %v649_v32 = vadd.f32 %v648_v26, %v218_v24  ;;  %v741_v46 = vmax.f32 %v604_v31, 0.0  ;;  %v743_v54 = vmax.f32 %v647_v34, 0.0  ;;  %v1037_v23 = vld [vmem:[#allocation7 + $0x880] sm:$0xff] }
 0x14b   :  { %v607_v27 = vpop.f32.mrf.mxu0  ;;  %v650_v30 = vpop.f32.mrf.mxu1  ;;  %v1169_v26 = vld [vmem:[#allocation7 + $0xca0] sm:$0xff]  ;;  %v10805_v31 = vsub.s32 7, %v10759_v13 }
 0x14c   :  { %v608_v29 = vadd.f32 %v607_v27, %v206_v22  ;;  %v651_v33 = vadd.f32 %v650_v30, %v214_v25  ;;  %v742_v39 = vmax.f32 %v606_v28, 0.0  ;;  %v744_v48 = vmax.f32 %v649_v32, 0.0  ;;  %v1165_v25 = vld [vmem:[#allocation7 + $0xc80] sm:$0xff] }
 0x14d   :  { %v609_v10 = vpop.f32.mrf.mxu0  ;;  %v652_v36 = vpop.f32.mrf.mxu1  ;;  %v9468_v27 = vcombine.low %v1045_v12, %v1049_v44  ;;  %v10802_v28 = vsub.s32 5, %v10759_v13  ;;  %v9589_v32 = vcombine.high %v1165_v25, %v1169_v26  ;;  %v1157_v34 = vld [vmem:[#allocation7 + $0xc40] sm:$0xff] }
 0x14e   :  { %v610_v35 = vadd.f32 %v609_v10, %v210_v21  ;;  %v749_v37 = vmax.f32 %v608_v29, 0.0  ;;  %v653_v38 = vadd.f32 %v652_v36, %v218_v24  ;;  %v751_v40 = vmax.f32 %v651_v33, 0.0  ;;  %v1041_v24 = vld [vmem:[#allocation7 + $0x8a0] sm:$0xff] }
 0x14f   :  { %v9469_v21 = vcombine.high %v1045_v12, %v1049_v44  ;;  %v9461_v30 = vcombine.high %v1037_v23, %v1041_v24  ;;  %v1029_v33 = vld [vmem:[#allocation7 + $0x840] sm:$0xff]  ;;  %v9460_v36 = vcombine.low %v1037_v23, %v1041_v24 }
 0x150   :  { %v750_v0 = vmax.f32 %v610_v35, 0.0  ;;  %v752_v51 = vmax.f32 %v653_v38, 0.0  ;;  %v10785_v56 = vpack.c.bf16 %v749_v37, %v741_v46  ;;  %v10789_v59 = vpack.c.bf16 %v751_v40, %v743_v54  ;;  %v1033_v10 = vld [vmem:[#allocation7 + $0x860] sm:$0xff] }
 0x151   :  { %v1161_v35 = vld [vmem:[#allocation7 + $0xc60] sm:$0xff]  ;;  %v226_v37 = vrot.slane %v10770_v17, %v10802_v28  ;;  %v9588_v38 = vcombine.low %v1165_v25, %v1169_v26  ;;  %v9452_v54 = vcombine.low %v1029_v33, %v1033_v10 }
 0x152   :  { %v10783_v55 = vpack.c.bf16 %v750_v0, %v742_v39  ;;  %v10787_v57 = vpack.c.bf16 %v752_v51, %v744_v48  ;;  %v9453_v39 = vcombine.high %v1029_v33, %v1033_v10  ;;  %v234_v0 = vrot.slane %v10770_v17, %v10805_v31  ;;  %v1025_v46 = vld [vmem:[#allocation7 + $0x820] sm:$0xff] }
 0x153   :  { %v9581_v41 = vcombine.high %v1157_v34, %v1161_v35  ;;  %v1149_v51 = vld [vmem:[#allocation7 + $0xc00] sm:$0xff]  ;;  %v9580_v61 = vcombine.low %v1157_v34, %v1161_v35  ;;  %v9445_v62 = vcombine.high %v1021_v45, %v1025_v46 }
 0x154   :  { %3911 = vmatprep.mubr.bf16.mxu0 %v10783_v55  ;;  %3954 = vmatprep.mubr.bf16.mxu1 %v10787_v57  ;;  %v1265_v23 = vld [vmem:[#allocation7 + $0xfa0] sm:$0xff] }
 0x155   :  { %3912 = vmatmul.mubr.bf16.vlgmr.msra.gmra.mxu0 %v10785_v56  ;;  %3955 = vmatmul.mubr.bf16.vlgmr.msra.gmra.mxu1 %v10789_v59  ;;  %v1125_v33 = vld [vmem:[#allocation7 + $0xb40] sm:$0xff] }
 0x156   :  { %3966 = vmatpush1.bf16.msra.mxu0 %v9500_v49  ;;  %4009 = vmatpush1.bf16.msra.mxu1 %v9628_v50  ;;  %v9605_v49 = vcombine.high %v1181_v8, %v1185_v9  ;;  %v1177_v50 = vld [vmem:[#allocation7 + $0xce0] sm:$0xff]  ;;  %v9444_v9 = vcombine.low %v1021_v45, %v1025_v46 }
 0x157   :  { %3967 = vmatprep.subr.bf16.mxu0 %v9493_v58  ;;  %4010 = vmatprep.subr.bf16.mxu1 %v9621_v60  ;;  %v9597_v22 = vcombine.high %v1173_v47, %v1177_v50  ;;  %v9596_v29 = vcombine.low %v1173_v47, %v1177_v50  ;;  %v9693_v50 = vcombine.high %v1269_v6, %v1273_v7  ;;  %v1129_v10 = vld [vmem:[#allocation7 + $0xb60] sm:$0xff] }
 0x158   :  { %v1253_v34 = vld [vmem:[#allocation7 + $0xf40] sm:$0xff] }
 0x159   :  { %v1257_v35 = vld [vmem:[#allocation7 + $0xf60] sm:$0xff] }
 0x15a   :  { %3968 = vmatpush1.bf16.msra.mxu0 %v9492_v2  ;;  %4011 = vmatpush1.bf16.msra.mxu1 %v9620_v3  ;;  %v9573_v2 = vcombine.high %v1149_v51, %v1153_v52  ;;  %v1141_v3 = vld [vmem:[#allocation7 + $0xbc0] sm:$0xff] }
 0x15b   :  { %3969 = vmatprep.subr.bf16.mxu0 %v9485_v4  ;;  %4012 = vmatprep.subr.bf16.mxu1 %v9613_v5  ;;  %v1145_v4 = vld [vmem:[#allocation7 + $0xbe0] sm:$0xff] }
 0x15c   :  { %v9565_v12 = vcombine.high %v1141_v3, %v1145_v4  ;;  %v9564_v25 = vcombine.low %v1141_v3, %v1145_v4  ;;  %v1245_v45 = vld [vmem:[#allocation7 + $0xf00] sm:$0xff] }
 0x15d   :  { %v1249_v46 = vld [vmem:[#allocation7 + $0xf20] sm:$0xff] }
 0x15e   :  { %3970 = vmatpush1.bf16.msra.mxu0 %v9484_v11  ;;  %4013 = vmatpush1.bf16.msra.mxu1 %v9612_v42 }
 0x15f   :  { %3971 = vmatprep.subr.bf16.mxu0 %v9477_v43  ;;  %4014 = vmatprep.subr.bf16.mxu1 %v9605_v49  ;;  %v9572_v49 = vcombine.low %v1149_v51, %v1153_v52  ;;  %v9548_v51 = vcombine.low %v1125_v33, %v1129_v10  ;;  %v9676_v52 = vcombine.low %v1253_v34, %v1257_v35 }
 0x162   :  { %3972 = vmatpush1.bf16.msra.mxu0 %v9476_v19  ;;  %4015 = vmatpush1.bf16.msra.mxu1 %v9604_v20  ;;  %v1133_v19 = vld [vmem:[#allocation7 + $0xb80] sm:$0xff] }
 0x163   :  { %3973 = vmatprep.subr.bf16.mxu0 %v9469_v21  ;;  %4016 = vmatprep.subr.bf16.mxu1 %v9597_v22  ;;  %v1137_v20 = vld [vmem:[#allocation7 + $0xba0] sm:$0xff] }
 0x164   :  { %v1261_v22 = vld [vmem:[#allocation7 + $0xf80] sm:$0xff] }
 0x166   :  { %3974 = vmatpush1.bf16.msra.mxu0 %v9468_v27  ;;  %4017 = vmatpush1.bf16.msra.mxu1 %v9596_v29  ;;  %v9692_v27 = vcombine.low %v1269_v6, %v1273_v7  ;;  %v9557_v29 = vcombine.high %v1133_v19, %v1137_v20  ;;  %v1101_v6 = vld [vmem:[#allocation7 + $0xa80] sm:$0xff] }
 0x167   :  { %3975 = vmatprep.subr.bf16.mxu0 %v9461_v30  ;;  %v10809_v40 = vpop.f32.mrf.mxu0  ;;  %4018 = vmatprep.subr.bf16.mxu1 %v9589_v32  ;;  %v10813_v48 = vpop.f32.mrf.mxu1  ;;  %v9685_v32 = vcombine.high %v1261_v22, %v1265_v23  ;;  %v1105_v7 = vld [vmem:[#allocation7 + $0xaa0] sm:$0xff] }
 0x169   :  { %v691_v53 = vpop.f32.mrf.mxu0  ;;  %v734_v60 = vpop.f32.mrf.mxu1 }
 0x16a   :  { %3976 = vmatpush1.bf16.msra.mxu0 %v9460_v36  ;;  %v692_v58 = vadd.f32 %v691_v53, %v226_v37  ;;  %4019 = vmatpush1.bf16.msra.mxu1 %v9588_v38  ;;  %v735_v1 = vadd.f32 %v734_v60, %v234_v0  ;;  %v9556_v36 = vcombine.low %v1133_v19, %v1137_v20  ;;  %v1113_v60 = vld [vmem:[#allocation7 + $0xae0] sm:$0xff] }
 0x16b   :  { %3977 = vmatprep.subr.bf16.mxu0 %v9453_v39  ;;  %v10815_v63 = vpop.f32.mrf.mxu0  ;;  %4020 = vmatprep.subr.bf16.mxu1 %v9581_v41  ;;  %v10817_v5 = vpop.f32.mrf.mxu1  ;;  %v9549_v38 = vcombine.high %v1125_v33, %v1129_v10  ;;  %v9677_v39 = vcombine.high %v1253_v34, %v1257_v35  ;;  %v1121_v41 = vld [vmem:[#allocation7 + $0xb20] sm:$0xff] }
 0x16c   :  { %v746_v11 = vmax.f32 %v692_v58, 0.0  ;;  %v748_v44 = vmax.f32 %v735_v1, 0.0  ;;  %v1109_v58 = vld [vmem:[#allocation7 + $0xac0] sm:$0xff] }
 0x16d   :  { %v695_v8 = vpop.f32.mrf.mxu0  ;;  %v738_v43 = vpop.f32.mrf.mxu1  ;;  %v9533_v3 = vcombine.high %v1109_v58, %v1113_v60  ;;  %v1221_v19 = vld [vmem:[#allocation7 + $0xe40] sm:$0xff] }
 0x16e   :  { %3978 = vmatpush1.bf16.msra.mxu0 %v9452_v54  ;;  %v696_v42 = vadd.f32 %v695_v8, %v226_v37  ;;  %4021 = vmatpush1.bf16.msra.mxu1 %v9580_v61  ;;  %v739_v47 = vadd.f32 %v738_v43, %v234_v0  ;;  %v9684_v37 = vcombine.low %v1261_v22, %v1265_v23  ;;  %v1117_v0 = vld [vmem:[#allocation7 + $0xb00] sm:$0xff] }
 0x16f   :  { %3979 = vmatprep.subr.bf16.mxu0 %v9445_v62  ;;  %4022 = vmatprep.subr.bf16.mxu1 %v9573_v2  ;;  %v9541_v53 = vcombine.high %v1117_v0, %v1121_v41  ;;  %v9669_v54 = vcombine.high %v1245_v45, %v1249_v46  ;;  %v1237_v61 = vld [vmem:[#allocation7 + $0xec0] sm:$0xff]  ;;  %v9540_v1 = vcombine.low %v1117_v0, %v1121_v41  ;;  %v822_v0 = vld [vmem:[#allocation7 + $0x1c8] sm:$0xff] }
 0x170   :  { %v754_v21 = vmax.f32 %v696_v42, 0.0  ;;  %v756_v24 = vmax.f32 %v739_v47, 0.0  ;;  %v1241_v62 = vld [vmem:[#allocation7 + $0xee0] sm:$0xff]  ;;  %v9668_v2 = vcombine.low %v1245_v45, %v1249_v46  ;;  %v10826_v42 = vsub.s32 4, %v10759_v13  ;;  %v826_v41 = vld [vmem:[#allocation7 + $0x1e8] sm:$0xff] }
 0x171   :  { %v9661_v4 = vcombine.high %v1237_v61, %v1241_v62  ;;  %v1229_v8 = vld [vmem:[#allocation7 + $0xe80] sm:$0xff]  ;;  %v9660_v43 = vcombine.low %v1237_v61, %v1241_v62  ;;  %v950_v45 = vld [vmem:[#allocation7 + $0x5c8] sm:$0xff]  ;;  %v9246_v61 = vcombine.low %v822_v0, %v826_v41 }
 0x172   :  { %3980 = vmatpush1.bf16.msra.mxu0 %v9444_v9  ;;  %v10819_v26 = vpack.c.bf16 %v754_v21, %v746_v11  ;;  %4023 = vmatpush1.bf16.msra.mxu1 %v9572_v49  ;;  %v10821_v30 = vpack.c.bf16 %v756_v24, %v748_v44  ;;  %v1233_v9 = vld [vmem:[#allocation7 + $0xea0] sm:$0xff]  ;;  %v9532_v11 = vcombine.low %v1109_v58, %v1113_v60  ;;  %v954_v46 = vld [vmem:[#allocation7 + $0x5e8] sm:$0xff] }
 0x173   :  { %3981 = vmatprep.subr.bf16.mxu0 %v9565_v12  ;;  %4024 = vmatprep.subr.bf16.mxu1 %v9693_v50  ;;  %v9525_v49 = vcombine.high %v1101_v6, %v1105_v7  ;;  %v10829_v12 = vsub.s32 6, %v10759_v13  ;;  %v9653_v44 = vcombine.high %v1229_v8, %v1233_v9  ;;  %v1093_v47 = vld [vmem:[#allocation7 + $0xa40] sm:$0xff]  ;;  %v9524_v21 = vcombine.low %v1101_v6, %v1105_v7  ;;  %v814_v60 = vld [vmem:[#allocation7 + $0x188] sm:$0xff] }
 0x174   :  { %3997 = vmatprep.mubr.bf16.mxu0 %v10819_v26  ;;  %4040 = vmatprep.mubr.bf16.mxu1 %v10821_v30  ;;  %v1097_v50 = vld [vmem:[#allocation7 + $0xa60] sm:$0xff]  ;;  %v222_v22 = vrot.slane %v10770_v17, %v10826_v42  ;;  %v9652_v23 = vcombine.low %v1229_v8, %v1233_v9  ;;  %v942_v62 = vld [vmem:[#allocation7 + $0x588] sm:$0xff] }
 0x175   :  { %v1225_v20 = vld [vmem:[#allocation7 + $0xe60] sm:$0xff]  ;;  %v9517_v24 = vcombine.high %v1093_v47, %v1097_v50  ;;  %v9516_v10 = vcombine.low %v1093_v47, %v1097_v50  ;;  %v806_v7 = vld [vmem:[#allocation7 + $0x148] sm:$0xff] }
 0x176   :  { %3982 = vmatpush2.bf16.msra.mxu0 %v9564_v25  ;;  %4025 = vmatpush2.bf16.msra.mxu1 %v9692_v27  ;;  %v230_v25 = vrot.slane %v10770_v17, %v10829_v12  ;;  %v9645_v13 = vcombine.high %v1221_v19, %v1225_v20  ;;  %v1085_v27 = vld [vmem:[#allocation7 + $0xa00] sm:$0xff]  ;;  %v9644_v34 = vcombine.low %v1221_v19, %v1225_v20  ;;  %v810_v8 = vld [vmem:[#allocation7 + $0x168] sm:$0xff] }
 0x177   :  { %3983 = vmatprep.subr.bf16.mxu0 %v9557_v29  ;;  %4026 = vmatprep.subr.bf16.mxu1 %v9685_v32  ;;  %v1089_v29 = vld [vmem:[#allocation7 + $0xa20] sm:$0xff]  ;;  %v690_v35 = vadd.f32 %v10809_v40, %v222_v22  ;;  %v9231_v47 = vcombine.high %v806_v7, %v810_v8  ;;  %v798_v19 = vld [vmem:[#allocation7 + $0x108] sm:$0xff] }
 0x178   :  { %v1213_v32 = vld [vmem:[#allocation7 + $0xe00] sm:$0xff]  ;;  %v737_v17 = vadd.f32 %v10817_v5, %v230_v25  ;;  %v818_v5 = vld [vmem:[#allocation7 + $0x1a8] sm:$0xff] }
 0x179   :  { %v1217_v33 = vld [vmem:[#allocation7 + $0xe20] sm:$0xff]  ;;  %v9239_v6 = vcombine.high %v814_v60, %v818_v5  ;;  %v802_v20 = vld [vmem:[#allocation7 + $0x128] sm:$0xff] }
 0x17a   :  { %3984 = vmatpush2.bf16.msra.mxu0 %v9556_v36  ;;  %4027 = vmatpush2.bf16.msra.mxu1 %v9684_v37  ;;  %v694_v36 = vadd.f32 %v10815_v63, %v222_v22  ;;  %v9509_v37 = vcombine.high %v1085_v27, %v1089_v29  ;;  %v9636_v40 = vcombine.low %v1213_v32, %v1217_v33  ;;  %v755_v58 = vmax.f32 %v737_v17, 0.0  ;;  %v930_v22 = vld [vmem:[#allocation7 + $0x528] sm:$0xff] }
 0x17b   :  { %3985 = vmatprep.subr.bf16.mxu0 %v9549_v38  ;;  %4028 = vmatprep.subr.bf16.mxu1 %v9677_v39  ;;  %v733_v38 = vadd.f32 %v10813_v48, %v230_v25  ;;  %v9637_v39 = vcombine.high %v1213_v32, %v1217_v33  ;;  %v9247_v63 = vcombine.high %v822_v0, %v826_v41  ;;  %v918_v32 = vld [vmem:[#allocation7 + $0x4c8] sm:$0xff] }
 0x17c   :  { %v9375_v48 = vcombine.high %v950_v45, %v954_v46  ;;  %v9223_v25 = vcombine.high %v798_v19, %v802_v20  ;;  %v922_v33 = vld [vmem:[#allocation7 + $0x4e8] sm:$0xff] }
 0x17d   :  { %v910_v17 = vld [vmem:[#allocation7 + $0x488] sm:$0xff]  ;;  %v9342_v41 = vcombine.low %v918_v32, %v922_v33 }
 0x17e   :  { %3986 = vmatpush2.bf16.msra.mxu0 %v9548_v51  ;;  %4029 = vmatpush2.bf16.msra.mxu1 %v9676_v52  ;;  %v9508_v51 = vcombine.low %v1085_v27, %v1089_v29  ;;  %v745_v52 = vmax.f32 %v690_v35, 0.0  ;;  %v790_v27 = vld [vmem:[#allocation7 + $0xc8] sm:$0xff] }
 0x17f   :  { %3987 = vmatprep.subr.bf16.mxu0 %v9541_v53  ;;  %4030 = vmatprep.subr.bf16.mxu1 %v9669_v54  ;;  %v753_v53 = vmax.f32 %v694_v36, 0.0  ;;  %v747_v54 = vmax.f32 %v733_v38, 0.0  ;;  %v794_v29 = vld [vmem:[#allocation7 + $0xe8] sm:$0xff]  ;;  %v9343_v36 = vcombine.high %v918_v32, %v922_v33 }
 0x180   :  { %v9215_v35 = vcombine.high %v790_v27, %v794_v29  ;;  %v786_v38 = vld [vmem:[#allocation7 + $0xa8] sm:$0xff]  ;;  %v9214_v0 = vcombine.low %v790_v27, %v794_v29 }
 0x181   :  { %v870_v27 = vld [vmem:[#allocation7 + $0x348] sm:$0xff] }
 0x182   :  { %3988 = vmatpush2.bf16.msra.mxu0 %v9540_v1  ;;  %4031 = vmatpush2.bf16.msra.mxu1 %v9668_v2  ;;  %v946_v1 = vld [vmem:[#allocation7 + $0x5a8] sm:$0xff]  ;;  %v10839_v2 = vpack.c.bf16 %v753_v53, %v745_v52 }
 0x183   :  { %3989 = vmatprep.subr.bf16.mxu0 %v9533_v3  ;;  %4032 = vmatprep.subr.bf16.mxu1 %v9661_v4  ;;  %v9374_v3 = vcombine.low %v950_v45, %v954_v46  ;;  %v10841_v4 = vpack.c.bf16 %v755_v58, %v747_v54  ;;  %v9367_v9 = vcombine.high %v942_v62, %v946_v1  ;;  %v778_v52 = vld [vmem:[#allocation7 + $0x68] sm:$0xff] }
 0x184   :  { %v902_v53 = vld [vmem:[#allocation7 + $0x448] sm:$0xff] }
 0x185   :  { %v874_v29 = vld [vmem:[#allocation7 + $0x368] sm:$0xff] }
 0x186   :  { %3990 = vmatpush2.bf16.msra.mxu0 %v9532_v11  ;;  %4033 = vmatpush2.bf16.msra.mxu1 %v9660_v43  ;;  %v934_v11 = vld [vmem:[#allocation7 + $0x548] sm:$0xff] }
 0x187   :  { %3991 = vmatprep.subr.bf16.mxu0 %v9525_v49  ;;  %4034 = vmatprep.subr.bf16.mxu1 %v9653_v44  ;;  %v938_v43 = vld [vmem:[#allocation7 + $0x568] sm:$0xff]  ;;  %v9238_v49 = vcombine.low %v814_v60, %v818_v5  ;;  %v9366_v44 = vcombine.low %v942_v62, %v946_v1 }
 0x188   :  { %v9359_v50 = vcombine.high %v934_v11, %v938_v43  ;;  %v766_v60 = vld [vmem:[#allocation7 + $0x8] sm:$0xff] }
 0x189   :  { %v770_v5 = vld [vmem:[#allocation7 + $0x28] sm:$0xff] }
 0x18a   :  { %3992 = vmatpush2.bf16.msra.mxu0 %v9524_v21  ;;  %4035 = vmatpush2.bf16.msra.mxu1 %v9652_v23  ;;  %v926_v21 = vld [vmem:[#allocation7 + $0x508] sm:$0xff]  ;;  %v9230_v23 = vcombine.low %v806_v7, %v810_v8 }
 0x18b   :  { %3993 = vmatprep.subr.bf16.mxu0 %v9517_v24  ;;  %4036 = vmatprep.subr.bf16.mxu1 %v9645_v13  ;;  %v9358_v24 = vcombine.low %v934_v11, %v938_v43  ;;  %v9351_v13 = vcombine.high %v926_v21, %v930_v22  ;;  %v898_v62 = vld [vmem:[#allocation7 + $0x428] sm:$0xff] }
 0x18c   :  { %v886_v8 = vld [vmem:[#allocation7 + $0x3c8] sm:$0xff] }
 0x18d   :  { %v1014_v11 = vld [vmem:[#allocation7 + $0x7c8] sm:$0xff] }
 0x18e   :  { %3994 = vmatpush2.bf16.msra.mxu0 %v9516_v10  ;;  %4037 = vmatpush2.bf16.msra.mxu1 %v9644_v34  ;;  %v9222_v10 = vcombine.low %v798_v19, %v802_v20  ;;  %v9350_v34 = vcombine.low %v926_v21, %v930_v22  ;;  %v1018_v43 = vld [vmem:[#allocation7 + $0x7e8] sm:$0xff] }
 0x18f   :  { %3995 = vmatprep.subr.bf16.mxu0 %v9509_v37  ;;  %4038 = vmatprep.subr.bf16.mxu1 %v9637_v39  ;;  %v782_v37 = vld [vmem:[#allocation7 + $0x88] sm:$0xff] }
 0x190   :  { %v914_v39 = vld [vmem:[#allocation7 + $0x4a8] sm:$0xff]  ;;  %v9207_v45 = vcombine.high %v782_v37, %v786_v38 }
 0x191   :  { %v9335_v46 = vcombine.high %v910_v17, %v914_v39  ;;  %v9334_v54 = vcombine.low %v910_v17, %v914_v39  ;;  %v878_v19 = vld [vmem:[#allocation7 + $0x388] sm:$0xff] }
 0x192   :  { %3996 = vmatpush2.bf16.msra.mxu0 %v9508_v51  ;;  %4039 = vmatpush2.bf16.msra.mxu1 %v9636_v40  ;;  %v774_v51 = vld [vmem:[#allocation7 + $0x48] sm:$0xff] }
 0x193   :  { %4051 = vmatprep.subr.bf16.mxu0 %v9247_v63  ;;  %4094 = vmatprep.subr.bf16.mxu1 %v9375_v48  ;;  %v906_v40 = vld [vmem:[#allocation7 + $0x468] sm:$0xff]  ;;  %v9206_v63 = vcombine.low %v782_v37, %v786_v38  ;;  %v9199_v58 = vcombine.high %v774_v51, %v778_v52  ;;  %v9198_v1 = vcombine.low %v774_v51, %v778_v52 }
 0x194   :  { %v9327_v48 = vcombine.high %v902_v53, %v906_v40  ;;  %v882_v20 = vld [vmem:[#allocation7 + $0x3a8] sm:$0xff] }
 0x195   :  { %3998 = vmatmul.mubr.bf16.vlgmr.msra.gmra.mxu0 %v10839_v2  ;;  %4041 = vmatmul.mubr.bf16.vlgmr.msra.gmra.mxu1 %v10841_v4  ;;  %v1006_v21 = vld [vmem:[#allocation7 + $0x788] sm:$0xff] }
 0x196   :  { %4052 = vmatpush1.bf16.msra.mxu0 %v9246_v61  ;;  %4083 = vmatprep.mubr.bf16.mxu0 %v10783_v55  ;;  %v894_v61 = vld [vmem:[#allocation7 + $0x408] sm:$0xff] }
 0x197   :  { %4095 = vmatpush1.bf16.msra.mxu1 %v9374_v3  ;;  %4126 = vmatprep.mubr.bf16.mxu1 %v10787_v57  ;;  %v9326_v3 = vcombine.low %v902_v53, %v906_v40  ;;  %v9319_v7 = vcombine.high %v894_v61, %v898_v62  ;;  %v1010_v22 = vld [vmem:[#allocation7 + $0x7a8] sm:$0xff] }
 0x198   :  { %4053 = vmatprep.subr.bf16.mxu0 %v9239_v6  ;;  %4096 = vmatprep.subr.bf16.mxu1 %v9367_v9  ;;  %v9191_v6 = vcombine.high %v766_v60, %v770_v5  ;;  %v890_v9 = vld [vmem:[#allocation7 + $0x3e8] sm:$0xff] }
 0x199   :  { %v998_v32 = vld [vmem:[#allocation7 + $0x748] sm:$0xff] }
 0x19a   :  { %4054 = vmatpush1.bf16.msra.mxu0 %v9238_v49  ;;  %v9190_v49 = vcombine.low %v766_v60, %v770_v5  ;;  %v1002_v33 = vld [vmem:[#allocation7 + $0x768] sm:$0xff] }
 0x19b   :  { %4097 = vmatpush1.bf16.msra.mxu1 %v9366_v44  ;;  %4055 = vmatprep.subr.bf16.mxu0 %v9231_v47  ;;  %v9318_v44 = vcombine.low %v894_v61, %v898_v62  ;;  %v9311_v47 = vcombine.high %v886_v8, %v890_v9  ;;  %v862_v37 = vld [vmem:[#allocation7 + $0x308] sm:$0xff] }
 0x19c   :  { %4098 = vmatprep.subr.bf16.mxu1 %v9359_v50  ;;  %v9439_v50 = vcombine.high %v1014_v11, %v1018_v43  ;;  %v866_v38 = vld [vmem:[#allocation7 + $0x328] sm:$0xff] }
 0x19d   :  { %v990_v17 = vld [vmem:[#allocation7 + $0x708] sm:$0xff] }
 0x19e   :  { %4056 = vmatpush1.bf16.msra.mxu0 %v9230_v23  ;;  %v9310_v23 = vcombine.low %v886_v8, %v890_v9  ;;  %v994_v39 = vld [vmem:[#allocation7 + $0x728] sm:$0xff] }
 0x19f   :  { %4099 = vmatpush1.bf16.msra.mxu1 %v9358_v24  ;;  %4057 = vmatprep.subr.bf16.mxu0 %v9223_v25  ;;  %v9438_v24 = vcombine.low %v1014_v11, %v1018_v43  ;;  %v9303_v25 = vcombine.high %v878_v19, %v882_v20  ;;  %v854_v51 = vld [vmem:[#allocation7 + $0x2c8] sm:$0xff] }
 0x1a0   :  { %4100 = vmatprep.subr.bf16.mxu1 %v9351_v13  ;;  %v9431_v13 = vcombine.high %v1006_v21, %v1010_v22  ;;  %v858_v52 = vld [vmem:[#allocation7 + $0x2e8] sm:$0xff] }
 0x1a1   :  { %v982_v53 = vld [vmem:[#allocation7 + $0x6c8] sm:$0xff] }
 0x1a2   :  { %4058 = vmatpush1.bf16.msra.mxu0 %v9222_v10  ;;  %v9302_v10 = vcombine.low %v878_v19, %v882_v20  ;;  %v986_v40 = vld [vmem:[#allocation7 + $0x6e8] sm:$0xff] }
 0x1a3   :  { %4101 = vmatpush1.bf16.msra.mxu1 %v9350_v34  ;;  %4059 = vmatprep.subr.bf16.mxu0 %v9215_v35  ;;  %v9430_v34 = vcombine.low %v1006_v21, %v1010_v22  ;;  %v9295_v35 = vcombine.high %v870_v27, %v874_v29  ;;  %v846_v60 = vld [vmem:[#allocation7 + $0x288] sm:$0xff] }
 0x1a4   :  { %4102 = vmatprep.subr.bf16.mxu1 %v9343_v36  ;;  %v9423_v36 = vcombine.high %v998_v32, %v1002_v33  ;;  %v850_v5 = vld [vmem:[#allocation7 + $0x2a8] sm:$0xff] }
 0x1a5   :  { %v974_v61 = vld [vmem:[#allocation7 + $0x688] sm:$0xff] }
 0x1a6   :  { %4060 = vmatpush1.bf16.msra.mxu0 %v9214_v0  ;;  %v9294_v0 = vcombine.low %v870_v27, %v874_v29  ;;  %v978_v62 = vld [vmem:[#allocation7 + $0x6a8] sm:$0xff] }
 0x1a7   :  { %4103 = vmatpush1.bf16.msra.mxu1 %v9342_v41  ;;  %4061 = vmatprep.subr.bf16.mxu0 %v9207_v45  ;;  %v9422_v41 = vcombine.low %v998_v32, %v1002_v33  ;;  %v9287_v45 = vcombine.high %v862_v37, %v866_v38  ;;  %v838_v8 = vld [vmem:[#allocation7 + $0x248] sm:$0xff] }
 0x1a8   :  { %4104 = vmatprep.subr.bf16.mxu1 %v9335_v46  ;;  %v9415_v46 = vcombine.high %v990_v17, %v994_v39  ;;  %v842_v9 = vld [vmem:[#allocation7 + $0x268] sm:$0xff] }
 0x1a9   :  { %v966_v11 = vld [vmem:[#allocation7 + $0x648] sm:$0xff] }
 0x1aa   :  { %4062 = vmatpush1.bf16.msra.mxu0 %v9206_v63  ;;  %v9286_v63 = vcombine.low %v862_v37, %v866_v38  ;;  %v970_v43 = vld [vmem:[#allocation7 + $0x668] sm:$0xff] }
 0x1ab   :  { %4105 = vmatpush1.bf16.msra.mxu1 %v9334_v54  ;;  %4063 = vmatprep.subr.bf16.mxu0 %v9199_v58  ;;  %v9414_v54 = vcombine.low %v990_v17, %v994_v39  ;;  %v9279_v58 = vcombine.high %v854_v51, %v858_v52  ;;  %v830_v19 = vld [vmem:[#allocation7 + $0x208] sm:$0xff] }
 0x1ac   :  { %4106 = vmatprep.subr.bf16.mxu1 %v9327_v48  ;;  %v9407_v48 = vcombine.high %v982_v53, %v986_v40  ;;  %v834_v20 = vld [vmem:[#allocation7 + $0x228] sm:$0xff] }
 0x1ad   :  { %v958_v21 = vld [vmem:[#allocation7 + $0x608] sm:$0xff] }
 0x1ae   :  { %4064 = vmatpush1.bf16.msra.mxu0 %v9198_v1  ;;  %v9278_v1 = vcombine.low %v854_v51, %v858_v52  ;;  %v962_v22 = vld [vmem:[#allocation7 + $0x628] sm:$0xff] }
 0x1af   :  { %4107 = vmatpush1.bf16.msra.mxu1 %v9326_v3  ;;  %4065 = vmatprep.subr.bf16.mxu0 %v9191_v6  ;;  %v9406_v3 = vcombine.low %v982_v53, %v986_v40  ;;  %v9271_v6 = vcombine.high %v846_v60, %v850_v5  ;;  %v1078_v27 = vld [vmem:[#allocation7 + $0x9c8] sm:$0xff] }
 0x1b0   :  { %4108 = vmatprep.subr.bf16.mxu1 %v9319_v7  ;;  %v9399_v7 = vcombine.high %v974_v61, %v978_v62  ;;  %v1082_v29 = vld [vmem:[#allocation7 + $0x9e8] sm:$0xff] }
 0x1b1   :  { %v1206_v32 = vld [vmem:[#allocation7 + $0xdc8] sm:$0xff]  ;;  %v9502_v17 = vcombine.low %v1078_v27, %v1082_v29 }
 0x1b2   :  { %4066 = vmatpush1.bf16.msra.mxu0 %v9190_v49  ;;  %v9270_v49 = vcombine.low %v846_v60, %v850_v5  ;;  %v1210_v33 = vld [vmem:[#allocation7 + $0xde8] sm:$0xff] }
 0x1b3   :  { %4109 = vmatpush1.bf16.msra.mxu1 %v9318_v44  ;;  %4067 = vmatprep.subr.bf16.mxu0 %v9311_v47  ;;  %v9398_v44 = vcombine.low %v974_v61, %v978_v62  ;;  %v9263_v47 = vcombine.high %v838_v8, %v842_v9  ;;  %v1070_v37 = vld [vmem:[#allocation7 + $0x988] sm:$0xff] }
 0x1b4   :  { %4110 = vmatprep.subr.bf16.mxu1 %v9439_v50  ;;  %v9391_v50 = vcombine.high %v966_v11, %v970_v43  ;;  %v1074_v38 = vld [vmem:[#allocation7 + $0x9a8] sm:$0xff] }
 0x1b5   :  { %v1198_v39 = vld [vmem:[#allocation7 + $0xd88] sm:$0xff] }
 0x1b6   :  { %4068 = vmatpush2.bf16.msra.mxu0 %v9310_v23  ;;  %v9262_v23 = vcombine.low %v838_v8, %v842_v9  ;;  %v1066_v51 = vld [vmem:[#allocation7 + $0x968] sm:$0xff] }
 0x1b7   :  { %4111 = vmatpush2.bf16.msra.mxu1 %v9438_v24  ;;  %4069 = vmatprep.subr.bf16.mxu0 %v9303_v25  ;;  %v9390_v24 = vcombine.low %v966_v11, %v970_v43  ;;  %v9255_v25 = vcombine.high %v830_v19, %v834_v20  ;;  %v1190_v53 = vld [vmem:[#allocation7 + $0xd48] sm:$0xff] }
 0x1b8   :  { %4112 = vmatprep.subr.bf16.mxu1 %v9431_v13  ;;  %v9383_v13 = vcombine.high %v958_v21, %v962_v22  ;;  %v1194_v40 = vld [vmem:[#allocation7 + $0xd68] sm:$0xff] }
 0x1b9   :  { %v1054_v60 = vld [vmem:[#allocation7 + $0x908] sm:$0xff] }
 0x1ba   :  { %4070 = vmatpush2.bf16.msra.mxu0 %v9302_v10  ;;  %v9254_v10 = vcombine.low %v830_v19, %v834_v20  ;;  %v1058_v5 = vld [vmem:[#allocation7 + $0x928] sm:$0xff] }
 0x1bb   :  { %4113 = vmatpush2.bf16.msra.mxu1 %v9430_v34  ;;  %4071 = vmatprep.subr.bf16.mxu0 %v9295_v35  ;;  %v9382_v34 = vcombine.low %v958_v21, %v962_v22  ;;  %v9503_v35 = vcombine.high %v1078_v27, %v1082_v29  ;;  %v1182_v61 = vld [vmem:[#allocation7 + $0xd08] sm:$0xff] }
 0x1bc   :  { %4114 = vmatprep.subr.bf16.mxu1 %v9423_v36  ;;  %v9631_v36 = vcombine.high %v1206_v32, %v1210_v33  ;;  %v1186_v62 = vld [vmem:[#allocation7 + $0xd28] sm:$0xff] }
 0x1bd   :  { %v1046_v8 = vld [vmem:[#allocation7 + $0x8c8] sm:$0xff] }
 0x1be   :  { %4072 = vmatpush2.bf16.msra.mxu0 %v9294_v0  ;;  %v1202_v0 = vld [vmem:[#allocation7 + $0xda8] sm:$0xff] }
 0x1bf   :  { %4115 = vmatpush2.bf16.msra.mxu1 %v9422_v41  ;;  %4073 = vmatprep.subr.bf16.mxu0 %v9287_v45  ;;  %v9630_v41 = vcombine.low %v1206_v32, %v1210_v33  ;;  %v9495_v45 = vcombine.high %v1070_v37, %v1074_v38  ;;  %v9623_v52 = vcombine.high %v1198_v39, %v1202_v0  ;;  %v1050_v9 = vld [vmem:[#allocation7 + $0x8e8] sm:$0xff] }
 0x1c0   :  { %4116 = vmatprep.subr.bf16.mxu1 %v9415_v46  ;;  %v1062_v46 = vld [vmem:[#allocation7 + $0x948] sm:$0xff] }
 0x1c1   :  { %v1174_v11 = vld [vmem:[#allocation7 + $0xcc8] sm:$0xff] }
 0x1c2   :  { %4074 = vmatpush2.bf16.msra.mxu0 %v9286_v63  ;;  %v9494_v63 = vcombine.low %v1070_v37, %v1074_v38  ;;  %v1178_v43 = vld [vmem:[#allocation7 + $0xce8] sm:$0xff] }
 0x1c3   :  { %4117 = vmatpush2.bf16.msra.mxu1 %v9414_v54  ;;  %4075 = vmatprep.subr.bf16.mxu0 %v9279_v58  ;;  %v9622_v54 = vcombine.low %v1198_v39, %v1202_v0  ;;  %v9487_v58 = vcombine.high %v1062_v46, %v1066_v51  ;;  %v1038_v19 = vld [vmem:[#allocation7 + $0x888] sm:$0xff] }
 0x1c4   :  { %4118 = vmatprep.subr.bf16.mxu1 %v9407_v48  ;;  %v9615_v48 = vcombine.high %v1190_v53, %v1194_v40  ;;  %v1042_v20 = vld [vmem:[#allocation7 + $0x8a8] sm:$0xff] }
 0x1c5   :  { %v1166_v21 = vld [vmem:[#allocation7 + $0xc88] sm:$0xff] }
 0x1c6   :  { %4076 = vmatpush2.bf16.msra.mxu0 %v9278_v1  ;;  %v9486_v1 = vcombine.low %v1062_v46, %v1066_v51  ;;  %v1170_v22 = vld [vmem:[#allocation7 + $0xca8] sm:$0xff] }
 0x1c7   :  { %4119 = vmatpush2.bf16.msra.mxu1 %v9406_v3  ;;  %4077 = vmatprep.subr.bf16.mxu0 %v9271_v6  ;;  %v9614_v3 = vcombine.low %v1190_v53, %v1194_v40  ;;  %v9479_v6 = vcombine.high %v1054_v60, %v1058_v5  ;;  %v1030_v27 = vld [vmem:[#allocation7 + $0x848] sm:$0xff] }
 0x1c8   :  { %4120 = vmatprep.subr.bf16.mxu1 %v9399_v7  ;;  %v9607_v7 = vcombine.high %v1182_v61, %v1186_v62  ;;  %v1034_v29 = vld [vmem:[#allocation7 + $0x868] sm:$0xff] }
 0x1c9   :  { %v1158_v32 = vld [vmem:[#allocation7 + $0xc48] sm:$0xff]  ;;  %v9454_v0 = vcombine.low %v1030_v27, %v1034_v29 }
 0x1ca   :  { %4078 = vmatpush2.bf16.msra.mxu0 %v9270_v49  ;;  %v9478_v49 = vcombine.low %v1054_v60, %v1058_v5  ;;  %v1162_v33 = vld [vmem:[#allocation7 + $0xc68] sm:$0xff] }
 0x1cb   :  { %4121 = vmatpush2.bf16.msra.mxu1 %v9398_v44  ;;  %4079 = vmatprep.subr.bf16.mxu0 %v9263_v47  ;;  %v9606_v44 = vcombine.low %v1182_v61, %v1186_v62  ;;  %v9471_v47 = vcombine.high %v1046_v8, %v1050_v9  ;;  %v1022_v37 = vld [vmem:[#allocation7 + $0x808] sm:$0xff] }
 0x1cc   :  { %4122 = vmatprep.subr.bf16.mxu1 %v9391_v50  ;;  %v9599_v50 = vcombine.high %v1174_v11, %v1178_v43  ;;  %v1026_v38 = vld [vmem:[#allocation7 + $0x828] sm:$0xff] }
 0x1cd   :  { %v1154_v39 = vld [vmem:[#allocation7 + $0xc28] sm:$0xff] }
 0x1ce   :  { %4080 = vmatpush2.bf16.msra.mxu0 %v9262_v23  ;;  %v9470_v23 = vcombine.low %v1046_v8, %v1050_v9  ;;  %v1142_v51 = vld [vmem:[#allocation7 + $0xbc8] sm:$0xff] }
 0x1cf   :  { %4123 = vmatpush2.bf16.msra.mxu1 %v9390_v24  ;;  %4081 = vmatprep.subr.bf16.mxu0 %v9255_v25  ;;  %v9598_v24 = vcombine.low %v1174_v11, %v1178_v43  ;;  %v9463_v25 = vcombine.high %v1038_v19, %v1042_v20  ;;  %v1270_v53 = vld [vmem:[#allocation7 + $0xfc8] sm:$0xff] }
 0x1d0   :  { %4124 = vmatprep.subr.bf16.mxu1 %v9383_v13  ;;  %v9591_v13 = vcombine.high %v1166_v21, %v1170_v22  ;;  %v1274_v40 = vld [vmem:[#allocation7 + $0xfe8] sm:$0xff] }
 0x1d1   :  { %v1134_v60 = vld [vmem:[#allocation7 + $0xb88] sm:$0xff] }
 0x1d2   :  { %4082 = vmatpush2.bf16.msra.mxu0 %v9254_v10  ;;  %v9462_v10 = vcombine.low %v1038_v19, %v1042_v20  ;;  %v1138_v5 = vld [vmem:[#allocation7 + $0xba8] sm:$0xff] }
 0x1d3   :  { %4125 = vmatpush2.bf16.msra.mxu1 %v9382_v34  ;;  %4137 = vmatprep.subr.bf16.mxu0 %v9503_v35  ;;  %v9590_v34 = vcombine.low %v1166_v21, %v1170_v22  ;;  %v9455_v35 = vcombine.high %v1030_v27, %v1034_v29  ;;  %v1262_v61 = vld [vmem:[#allocation7 + $0xf88] sm:$0xff] }
 0x1d4   :  { %4180 = vmatprep.subr.bf16.mxu1 %v9631_v36  ;;  %v9583_v36 = vcombine.high %v1158_v32, %v1162_v33  ;;  %v1266_v62 = vld [vmem:[#allocation7 + $0xfa8] sm:$0xff] }
 0x1d5   :  { %4084 = vmatmul.mubr.bf16.vlgmr.msra.gmra.mxu0 %v10785_v56  ;;  %v1126_v8 = vld [vmem:[#allocation7 + $0xb48] sm:$0xff] }
 0x1d6   :  { %4127 = vmatmul.mubr.bf16.vlgmr.msra.gmra.mxu1 %v10789_v59  ;;  %4138 = vmatpush1.bf16.msra.mxu0 %v9502_v17  ;;  %v1150_v17 = vld [vmem:[#allocation7 + $0xc08] sm:$0xff] }
 0x1d7   :  { %4169 = vmatprep.mubr.bf16.mxu0 %v10819_v26  ;;  %4181 = vmatpush1.bf16.msra.mxu1 %v9630_v41  ;;  %v9582_v41 = vcombine.low %v1158_v32, %v1162_v33  ;;  %v9575_v46 = vcombine.high %v1150_v17, %v1154_v39  ;;  %v1130_v9 = vld [vmem:[#allocation7 + $0xb68] sm:$0xff] }
 0x1d8   :  { %4212 = vmatprep.mubr.bf16.mxu1 %v10821_v30  ;;  %4139 = vmatprep.subr.bf16.mxu0 %v9495_v45  ;;  %v9447_v45 = vcombine.high %v1022_v37, %v1026_v38  ;;  %v1254_v11 = vld [vmem:[#allocation7 + $0xf48] sm:$0xff] }
 0x1d9   :  { %4182 = vmatprep.subr.bf16.mxu1 %v9623_v52  ;;  %v1146_v52 = vld [vmem:[#allocation7 + $0xbe8] sm:$0xff] }
 0x1da   :  { %4140 = vmatpush1.bf16.msra.mxu0 %v9494_v63  ;;  %v9446_v63 = vcombine.low %v1022_v37, %v1026_v38  ;;  %v1258_v43 = vld [vmem:[#allocation7 + $0xf68] sm:$0xff] }
 0x1db   :  { %4183 = vmatpush1.bf16.msra.mxu1 %v9622_v54  ;;  %4141 = vmatprep.subr.bf16.mxu0 %v9487_v58  ;;  %v9574_v54 = vcombine.low %v1150_v17, %v1154_v39  ;;  %v9567_v58 = vcombine.high %v1142_v51, %v1146_v52  ;;  %v1118_v19 = vld [vmem:[#allocation7 + $0xb08] sm:$0xff] }
 0x1dc   :  { %4184 = vmatprep.subr.bf16.mxu1 %v9615_v48  ;;  %v9695_v48 = vcombine.high %v1270_v53, %v1274_v40  ;;  %v1122_v20 = vld [vmem:[#allocation7 + $0xb28] sm:$0xff] }
 0x1dd   :  { %v1246_v21 = vld [vmem:[#allocation7 + $0xf08] sm:$0xff] }
 0x1de   :  { %4142 = vmatpush1.bf16.msra.mxu0 %v9486_v1  ;;  %v9566_v1 = vcombine.low %v1142_v51, %v1146_v52  ;;  %v1250_v22 = vld [vmem:[#allocation7 + $0xf28] sm:$0xff] }
 0x1df   :  { %4185 = vmatpush1.bf16.msra.mxu1 %v9614_v3  ;;  %4143 = vmatprep.subr.bf16.mxu0 %v9479_v6  ;;  %v9694_v3 = vcombine.low %v1270_v53, %v1274_v40  ;;  %v9559_v6 = vcombine.high %v1134_v60, %v1138_v5  ;;  %v1110_v27 = vld [vmem:[#allocation7 + $0xac8] sm:$0xff] }
 0x1e0   :  { %4186 = vmatprep.subr.bf16.mxu1 %v9607_v7  ;;  %v9687_v7 = vcombine.high %v1262_v61, %v1266_v62  ;;  %v1114_v29 = vld [vmem:[#allocation7 + $0xae8] sm:$0xff] }
 0x1e1   :  { %v1238_v32 = vld [vmem:[#allocation7 + $0xec8] sm:$0xff] }
 0x1e2   :  { %4144 = vmatpush1.bf16.msra.mxu0 %v9478_v49  ;;  %v9558_v49 = vcombine.low %v1134_v60, %v1138_v5  ;;  %v1242_v33 = vld [vmem:[#allocation7 + $0xee8] sm:$0xff] }
 0x1e3   :  { %4187 = vmatpush1.bf16.msra.mxu1 %v9606_v44  ;;  %4145 = vmatprep.subr.bf16.mxu0 %v9471_v47  ;;  %v9686_v44 = vcombine.low %v1262_v61, %v1266_v62  ;;  %v9551_v47 = vcombine.high %v1126_v8, %v1130_v9  ;;  %v1102_v37 = vld [vmem:[#allocation7 + $0xa88] sm:$0xff] }
 0x1e4   :  { %4188 = vmatprep.subr.bf16.mxu1 %v9599_v50  ;;  %v9679_v50 = vcombine.high %v1254_v11, %v1258_v43  ;;  %v1106_v38 = vld [vmem:[#allocation7 + $0xaa8] sm:$0xff] }
 0x1e5   :  { %v1230_v17 = vld [vmem:[#allocation7 + $0xe88] sm:$0xff] }
 0x1e6   :  { %4146 = vmatpush1.bf16.msra.mxu0 %v9470_v23  ;;  %v9550_v23 = vcombine.low %v1126_v8, %v1130_v9  ;;  %v1234_v39 = vld [vmem:[#allocation7 + $0xea8] sm:$0xff]  ;;  %v823_v8 = vld [vmem:[#allocation7 + $0x1d0] sm:$0xff] }
 0x1e7   :  { %4189 = vmatpush1.bf16.msra.mxu1 %v9598_v24  ;;  %4147 = vmatprep.subr.bf16.mxu0 %v9463_v25  ;;  %v9678_v24 = vcombine.low %v1254_v11, %v1258_v43  ;;  %v9543_v25 = vcombine.high %v1118_v19, %v1122_v20  ;;  %v1094_v51 = vld [vmem:[#allocation7 + $0xa48] sm:$0xff]  ;;  %v827_v9 = vld [vmem:[#allocation7 + $0x1f0] sm:$0xff] }
 0x1e8   :  { %4190 = vmatprep.subr.bf16.mxu1 %v9591_v13  ;;  %v9671_v13 = vcombine.high %v1246_v21, %v1250_v22  ;;  %v1098_v52 = vld [vmem:[#allocation7 + $0xa68] sm:$0xff]  ;;  %v951_v11 = vld [vmem:[#allocation7 + $0x5d0] sm:$0xff] }
 0x1e9   :  { %v1222_v53 = vld [vmem:[#allocation7 + $0xe48] sm:$0xff]  ;;  %v955_v43 = vld [vmem:[#allocation7 + $0x5f0] sm:$0xff] }
 0x1ea   :  { %4148 = vmatpush1.bf16.msra.mxu0 %v9462_v10  ;;  %v9542_v10 = vcombine.low %v1118_v19, %v1122_v20  ;;  %v1226_v40 = vld [vmem:[#allocation7 + $0xe68] sm:$0xff]  ;;  %v9377_v19 = vcombine.high %v951_v11, %v955_v43  ;;  %v815_v20 = vld [vmem:[#allocation7 + $0x190] sm:$0xff] }
 0x1eb   :  { %4191 = vmatpush1.bf16.msra.mxu1 %v9590_v34  ;;  %4149 = vmatprep.subr.bf16.mxu0 %v9455_v35  ;;  %v9670_v34 = vcombine.low %v1246_v21, %v1250_v22  ;;  %v9535_v35 = vcombine.high %v1110_v27, %v1114_v29  ;;  %v1086_v60 = vld [vmem:[#allocation7 + $0xa08] sm:$0xff]  ;;  %v819_v21 = vld [vmem:[#allocation7 + $0x1b0] sm:$0xff]  ;;  %v9248_v22 = vcombine.low %v823_v8, %v827_v9 }
 0x1ec   :  { %4192 = vmatprep.subr.bf16.mxu1 %v9583_v36  ;;  %v9663_v36 = vcombine.high %v1238_v32, %v1242_v33  ;;  %v1090_v5 = vld [vmem:[#allocation7 + $0xa28] sm:$0xff] }
 0x1ed   :  { %v1214_v61 = vld [vmem:[#allocation7 + $0xe08] sm:$0xff] }
 0x1ee   :  { %4150 = vmatpush1.bf16.msra.mxu0 %v9454_v0  ;;  %v9534_v0 = vcombine.low %v1110_v27, %v1114_v29  ;;  %v1218_v62 = vld [vmem:[#allocation7 + $0xe28] sm:$0xff]  ;;  %v9241_v27 = vcombine.high %v815_v20, %v819_v21  ;;  %v807_v29 = vld [vmem:[#allocation7 + $0x150] sm:$0xff] }
 0x1ef   :  { %4193 = vmatpush1.bf16.msra.mxu1 %v9582_v41  ;;  %4151 = vmatprep.subr.bf16.mxu0 %v9447_v45  ;;  %v9662_v41 = vcombine.low %v1238_v32, %v1242_v33  ;;  %v9527_v45 = vcombine.high %v1102_v37, %v1106_v38  ;;  %v811_v32 = vld [vmem:[#allocation7 + $0x170] sm:$0xff] }
 0x1f0   :  { %4194 = vmatprep.subr.bf16.mxu1 %v9575_v46  ;;  %v9655_v46 = vcombine.high %v1230_v17, %v1234_v39 }
 0x1f2   :  { %4152 = vmatpush1.bf16.msra.mxu0 %v9446_v63  ;;  %v9526_v63 = vcombine.low %v1102_v37, %v1106_v38  ;;  %v9240_v38 = vcombine.low %v815_v20, %v819_v21 }
 0x1f3   :  { %4195 = vmatpush1.bf16.msra.mxu1 %v9574_v54  ;;  %4153 = vmatprep.subr.bf16.mxu0 %v9567_v58  ;;  %v9654_v54 = vcombine.low %v1230_v17, %v1234_v39  ;;  %v9519_v58 = vcombine.high %v1094_v51, %v1098_v52 }
 0x1f4   :  { %4196 = vmatprep.subr.bf16.mxu1 %v9695_v48  ;;  %v9647_v48 = vcombine.high %v1222_v53, %v1226_v40 }
 0x1f6   :  { %4154 = vmatpush2.bf16.msra.mxu0 %v9566_v1  ;;  %v9518_v1 = vcombine.low %v1094_v51, %v1098_v52  ;;  %v799_v51 = vld [vmem:[#allocation7 + $0x110] sm:$0xff] }
 0x1f7   :  { %4197 = vmatpush2.bf16.msra.mxu1 %v9694_v3  ;;  %4155 = vmatprep.subr.bf16.mxu0 %v9559_v6  ;;  %v9646_v3 = vcombine.low %v1222_v53, %v1226_v40  ;;  %v9511_v6 = vcombine.high %v1086_v60, %v1090_v5  ;;  %v803_v52 = vld [vmem:[#allocation7 + $0x130] sm:$0xff] }
 0x1f8   :  { %4198 = vmatprep.subr.bf16.mxu1 %v9687_v7  ;;  %v9639_v7 = vcombine.high %v1214_v61, %v1218_v62  ;;  %v927_v40 = vld [vmem:[#allocation7 + $0x510] sm:$0xff] }
 0x1fa   :  { %4156 = vmatpush2.bf16.msra.mxu0 %v9558_v49  ;;  %v9510_v49 = vcombine.low %v1086_v60, %v1090_v5  ;;  %v9225_v5 = vcombine.high %v799_v51, %v803_v52 }
 0x1fb   :  { %4199 = vmatpush2.bf16.msra.mxu1 %v9686_v44  ;;  %4157 = vmatprep.subr.bf16.mxu0 %v9551_v47  ;;  %v9638_v44 = vcombine.low %v1214_v61, %v1218_v62  ;;  %v9249_v47 = vcombine.high %v823_v8, %v827_v9  ;;  %v9224_v8 = vcombine.low %v799_v51, %v803_v52  ;;  %v887_v51 = vld [vmem:[#allocation7 + $0x3d0] sm:$0xff] }
 0x1fc   :  { %4200 = vmatprep.subr.bf16.mxu1 %v9679_v50  ;;  %v10851_v50 = vld [vmem:[#allocation8] sm:$0xff]  ;;  %v891_v52 = vld [vmem:[#allocation7 + $0x3f0] sm:$0xff] }
 0x1fe   :  { %4158 = vmatpush2.bf16.msra.mxu0 %v9550_v23  ;;  %v1282_v23 = vrot.slane %v10851_v50, %v10765_v15 }
 0x1ff   :  { %4201 = vmatpush2.bf16.msra.mxu1 %v9678_v24  ;;  %4159 = vmatprep.subr.bf16.mxu0 %v9543_v25  ;;  %v943_v24 = vld [vmem:[#allocation7 + $0x590] sm:$0xff] }
 0x200   :  { %4202 = vmatprep.subr.bf16.mxu1 %v9671_v13  ;;  %v947_v25 = vld [vmem:[#allocation7 + $0x5b0] sm:$0xff]  ;;  %v9376_v13 = vcombine.low %v951_v11, %v955_v43 }
 0x201   :  { %v9368_v39 = vcombine.low %v943_v24, %v947_v25 }
 0x202   :  { %4160 = vmatpush2.bf16.msra.mxu0 %v9542_v10  ;;  %v9369_v10 = vcombine.high %v943_v24, %v947_v25  ;;  %v775_v24 = vld [vmem:[#allocation7 + $0x50] sm:$0xff] }
 0x203   :  { %4203 = vmatpush2.bf16.msra.mxu1 %v9670_v34  ;;  %4161 = vmatprep.subr.bf16.mxu0 %v9535_v35  ;;  %v935_v34 = vld [vmem:[#allocation7 + $0x550] sm:$0xff] }
 0x204   :  { %4204 = vmatprep.subr.bf16.mxu1 %v9663_v36  ;;  %v939_v35 = vld [vmem:[#allocation7 + $0x570] sm:$0xff] }
 0x205   :  { %v9360_v60 = vcombine.low %v935_v34, %v939_v35  ;;  %v779_v25 = vld [vmem:[#allocation7 + $0x70] sm:$0xff] }
 0x206   :  { %4162 = vmatpush2.bf16.msra.mxu0 %v9534_v0  ;;  %v9233_v0 = vcombine.high %v807_v29, %v811_v32 }
 0x207   :  { %4205 = vmatpush2.bf16.msra.mxu1 %v9662_v41  ;;  %4163 = vmatprep.subr.bf16.mxu0 %v9527_v45 }
 0x208   :  { %4206 = vmatprep.subr.bf16.mxu1 %v9655_v46  ;;  %v9361_v46 = vcombine.high %v935_v34, %v939_v35  ;;  %v767_v34 = vld [vmem:[#allocation7 + $0x10] sm:$0xff] }
 0x209   :  { %v771_v35 = vld [vmem:[#allocation7 + $0x30] sm:$0xff] }
 0x20a   :  { %4164 = vmatpush2.bf16.msra.mxu0 %v9526_v63  ;;  %v931_v63 = vld [vmem:[#allocation7 + $0x530] sm:$0xff] }
 0x20b   :  { %4207 = vmatpush2.bf16.msra.mxu1 %v9654_v54  ;;  %4165 = vmatprep.subr.bf16.mxu0 %v9519_v58  ;;  %v9232_v58 = vcombine.low %v807_v29, %v811_v32  ;;  %v9353_v62 = vcombine.high %v927_v40, %v931_v63  ;;  %v9352_v9 = vcombine.low %v927_v40, %v931_v63  ;;  %v1019_v40 = vld [vmem:[#allocation7 + $0x7f0] sm:$0xff] }
 0x20c   :  { %4208 = vmatprep.subr.bf16.mxu1 %v9647_v48  ;;  %v9192_v63 = vcombine.low %v767_v34, %v771_v35 }
 0x20e   :  { %4166 = vmatpush2.bf16.msra.mxu0 %v9518_v1  ;;  %v791_v1 = vld [vmem:[#allocation7 + $0xd0] sm:$0xff] }
 0x20f   :  { %4209 = vmatpush2.bf16.msra.mxu1 %v9646_v3  ;;  %4167 = vmatprep.subr.bf16.mxu0 %v9511_v6  ;;  %v795_v3 = vld [vmem:[#allocation7 + $0xf0] sm:$0xff] }
 0x210   :  { %4210 = vmatprep.subr.bf16.mxu1 %v9639_v7  ;;  %v919_v6 = vld [vmem:[#allocation7 + $0x4d0] sm:$0xff]  ;;  %v9217_v11 = vcombine.high %v791_v1, %v795_v3  ;;  %v9216_v20 = vcombine.low %v791_v1, %v795_v3  ;;  %v9312_v3 = vcombine.low %v887_v51, %v891_v52 }
 0x211   :  { %v923_v7 = vld [vmem:[#allocation7 + $0x4f0] sm:$0xff] }
 0x212   :  { %4168 = vmatpush2.bf16.msra.mxu0 %v9510_v49  ;;  %v9345_v43 = vcombine.high %v919_v6, %v923_v7  ;;  %v783_v49 = vld [vmem:[#allocation7 + $0x90] sm:$0xff]  ;;  %v9344_v21 = vcombine.low %v919_v6, %v923_v7 }
 0x213   :  { %4211 = vmatpush2.bf16.msra.mxu1 %v9638_v44  ;;  %4223 = vmatprep.subr.bf16.mxu0 %v9249_v47  ;;  %v787_v44 = vld [vmem:[#allocation7 + $0xb0] sm:$0xff] }
 0x214   :  { %4266 = vmatprep.subr.bf16.mxu1 %v9377_v19  ;;  %v911_v47 = vld [vmem:[#allocation7 + $0x490] sm:$0xff]  ;;  %v9208_v29 = vcombine.low %v783_v49, %v787_v44 }
 0x215   :  { %4170 = vmatmul.mubr.bf16.vlgmr.msra.gmra.mxu0 %v10839_v2  ;;  %v3913_v33 = vpop.f32.mrf.mxu0  ;;  %v3956_v37 = vpop.f32.mrf.mxu1  ;;  %v915_v19 = vld [vmem:[#allocation7 + $0x4b0] sm:$0xff] }
 0x216   :  { %4213 = vmatmul.mubr.bf16.vlgmr.msra.gmra.mxu1 %v10841_v4  ;;  %v3914_v36 = vadd.f32 %v3913_v33, %v1282_v23  ;;  %4224 = vmatpush1.bf16.msra.mxu0 %v9248_v22  ;;  %v9209_v22 = vcombine.high %v783_v49, %v787_v44  ;;  %v9336_v32 = vcombine.low %v911_v47, %v915_v19  ;;  %v1011_v1 = vld [vmem:[#allocation7 + $0x7b0] sm:$0xff] }
 0x217   :  { %4255 = vmatprep.mubr.bf16.mxu0 %v10783_v55  ;;  %4267 = vmatpush1.bf16.msra.mxu1 %v9376_v13  ;;  %v10858_v17 = vpop.f32.mrf.mxu0  ;;  %v10863_v45 = vpop.f32.mrf.mxu1  ;;  %v903_v13 = vld [vmem:[#allocation7 + $0x450] sm:$0xff]  ;;  %v9201_v33 = vcombine.high %v775_v24, %v779_v25 }
 0x218   :  { %v10860_v41 = vadd.f32 %v3956_v37, %v3914_v36  ;;  %4298 = vmatprep.mubr.bf16.mxu1 %v10787_v57  ;;  %4225 = vmatprep.subr.bf16.mxu0 %v9241_v27  ;;  %v907_v27 = vld [vmem:[#allocation7 + $0x470] sm:$0xff] }
 0x219   :  { %4268 = vmatprep.subr.bf16.mxu1 %v9369_v10  ;;  %v3917_v53 = vpop.f32.mrf.mxu0  ;;  %v3960_v48 = vpop.f32.mrf.mxu1  ;;  %v9329_v10 = vcombine.high %v903_v13, %v907_v27  ;;  %v895_v36 = vld [vmem:[#allocation7 + $0x410] sm:$0xff] }
 0x21a   :  { %v3918_v54 = vadd.f32 %v3917_v53, %v1282_v23  ;;  %4226 = vmatpush1.bf16.msra.mxu0 %v9240_v38  ;;  %v9337_v23 = vcombine.high %v911_v47, %v915_v19  ;;  %v899_v37 = vld [vmem:[#allocation7 + $0x430] sm:$0xff]  ;;  %v9200_v38 = vcombine.low %v775_v24, %v779_v25 }
 0x21b   :  { %4269 = vmatpush1.bf16.msra.mxu1 %v9368_v39  ;;  %4227 = vmatprep.subr.bf16.mxu0 %v9233_v0  ;;  %v9328_v39 = vcombine.low %v903_v13, %v907_v27  ;;  %v9193_v0 = vcombine.high %v767_v34, %v771_v35  ;;  %v1015_v53 = vld [vmem:[#allocation7 + $0x7d0] sm:$0xff] }
 0x21c   :  { %v10865_v61 = vadd.f32 %v3960_v48, %v3918_v54  ;;  %4270 = vmatprep.subr.bf16.mxu1 %v9361_v46  ;;  %v9321_v46 = vcombine.high %v895_v36, %v899_v37  ;;  %v9320_v54 = vcombine.low %v895_v36, %v899_v37  ;;  %v9441_v48 = vcombine.high %v1015_v53, %v1019_v40  ;;  %v1003_v49 = vld [vmem:[#allocation7 + $0x770] sm:$0xff] }
 0x21d   :  { %v9440_v6 = vcombine.low %v1015_v53, %v1019_v40  ;;  %v995_v24 = vld [vmem:[#allocation7 + $0x730] sm:$0xff] }
 0x21e   :  { %4228 = vmatpush1.bf16.msra.mxu0 %v9232_v58  ;;  %v9313_v58 = vcombine.high %v887_v51, %v891_v52  ;;  %v987_v34 = vld [vmem:[#allocation7 + $0x6f0] sm:$0xff] }
 0x21f   :  { %4271 = vmatpush1.bf16.msra.mxu1 %v9360_v60  ;;  %4229 = vmatprep.subr.bf16.mxu0 %v9225_v5  ;;  %v879_v60 = vld [vmem:[#allocation7 + $0x390] sm:$0xff] }
 0x220   :  { %4272 = vmatprep.subr.bf16.mxu1 %v9353_v62  ;;  %v883_v5 = vld [vmem:[#allocation7 + $0x3b0] sm:$0xff] }
 0x221   :  { %v1007_v62 = vld [vmem:[#allocation7 + $0x790] sm:$0xff]  ;;  %v9305_v7 = vcombine.high %v879_v60, %v883_v5  ;;  %v9304_v44 = vcombine.low %v879_v60, %v883_v5 }
 0x222   :  { %4230 = vmatpush1.bf16.msra.mxu0 %v9224_v8  ;;  %v9433_v8 = vcombine.high %v1007_v62, %v1011_v1  ;;  %v9432_v47 = vcombine.low %v1007_v62, %v1011_v1  ;;  %v979_v51 = vld [vmem:[#allocation7 + $0x6b0] sm:$0xff] }
 0x223   :  { %4273 = vmatpush1.bf16.msra.mxu1 %v9352_v9  ;;  %4231 = vmatprep.subr.bf16.mxu0 %v9217_v11  ;;  %v871_v9 = vld [vmem:[#allocation7 + $0x350] sm:$0xff] }
 0x224   :  { %4274 = vmatprep.subr.bf16.mxu1 %v9345_v43  ;;  %v875_v11 = vld [vmem:[#allocation7 + $0x370] sm:$0xff] }
 0x225   :  { %v999_v43 = vld [vmem:[#allocation7 + $0x750] sm:$0xff]  ;;  %v9297_v19 = vcombine.high %v871_v9, %v875_v11  ;;  %v9296_v25 = vcombine.low %v871_v9, %v875_v11 }
 0x226   :  { %4232 = vmatpush1.bf16.msra.mxu0 %v9216_v20  ;;  %v9425_v20 = vcombine.high %v999_v43, %v1003_v49  ;;  %v9424_v13 = vcombine.low %v999_v43, %v1003_v49  ;;  %v971_v60 = vld [vmem:[#allocation7 + $0x670] sm:$0xff] }
 0x227   :  { %4275 = vmatpush1.bf16.msra.mxu1 %v9344_v21  ;;  %4233 = vmatprep.subr.bf16.mxu0 %v9209_v22  ;;  %v863_v21 = vld [vmem:[#allocation7 + $0x310] sm:$0xff] }
 0x228   :  { %4276 = vmatprep.subr.bf16.mxu1 %v9337_v23  ;;  %v867_v22 = vld [vmem:[#allocation7 + $0x330] sm:$0xff] }
 0x229   :  { %v991_v23 = vld [vmem:[#allocation7 + $0x710] sm:$0xff]  ;;  %v9289_v27 = vcombine.high %v863_v21, %v867_v22  ;;  %v9288_v35 = vcombine.low %v863_v21, %v867_v22 }
 0x22a   :  { %4234 = vmatpush1.bf16.msra.mxu0 %v9208_v29  ;;  %v9417_v29 = vcombine.high %v991_v23, %v995_v24  ;;  %v9416_v36 = vcombine.low %v991_v23, %v995_v24  ;;  %v963_v9 = vld [vmem:[#allocation7 + $0x630] sm:$0xff] }
 0x22b   :  { %4277 = vmatpush1.bf16.msra.mxu1 %v9336_v32  ;;  %4235 = vmatprep.subr.bf16.mxu0 %v9201_v33  ;;  %v855_v32 = vld [vmem:[#allocation7 + $0x2d0] sm:$0xff] }
 0x22c   :  { %4278 = vmatprep.subr.bf16.mxu1 %v9329_v10  ;;  %v859_v33 = vld [vmem:[#allocation7 + $0x2f0] sm:$0xff] }
 0x22d   :  { %v983_v10 = vld [vmem:[#allocation7 + $0x6d0] sm:$0xff]  ;;  %v9281_v37 = vcombine.high %v855_v32, %v859_v33  ;;  %v9280_v52 = vcombine.low %v855_v32, %v859_v33 }
 0x22e   :  { %4236 = vmatpush1.bf16.msra.mxu0 %v9200_v38  ;;  %v9409_v38 = vcombine.high %v983_v10, %v987_v34  ;;  %v9408_v53 = vcombine.low %v983_v10, %v987_v34  ;;  %v1211_v21 = vld [vmem:[#allocation7 + $0xdf0] sm:$0xff]  ;;  %v10867_v10 = vpop.f32.mrf.mxu0 }
 0x22f   :  { %4279 = vmatpush1.bf16.msra.mxu1 %v9328_v39  ;;  %4237 = vmatprep.subr.bf16.mxu0 %v9193_v0  ;;  %v847_v39 = vld [vmem:[#allocation7 + $0x290] sm:$0xff] }
 0x230   :  { %4280 = vmatprep.subr.bf16.mxu1 %v9321_v46  ;;  %v851_v0 = vld [vmem:[#allocation7 + $0x2b0] sm:$0xff] }
 0x231   :  { %v975_v46 = vld [vmem:[#allocation7 + $0x690] sm:$0xff]  ;;  %v9273_v40 = vcombine.high %v847_v39, %v851_v0  ;;  %v9272_v5 = vcombine.low %v847_v39, %v851_v0 }
 0x232   :  { %4238 = vmatpush1.bf16.msra.mxu0 %v9192_v63  ;;  %v9401_v63 = vcombine.high %v975_v46, %v979_v51  ;;  %v9400_v62 = vcombine.low %v975_v46, %v979_v51  ;;  %v1199_v32 = vld [vmem:[#allocation7 + $0xd90] sm:$0xff] }
 0x233   :  { %4281 = vmatpush1.bf16.msra.mxu1 %v9320_v54  ;;  %4239 = vmatprep.subr.bf16.mxu0 %v9313_v58  ;;  %v839_v54 = vld [vmem:[#allocation7 + $0x250] sm:$0xff] }
 0x234   :  { %4282 = vmatprep.subr.bf16.mxu1 %v9441_v48  ;;  %v843_v58 = vld [vmem:[#allocation7 + $0x270] sm:$0xff] }
 0x235   :  { %v967_v48 = vld [vmem:[#allocation7 + $0x650] sm:$0xff]  ;;  %v9265_v1 = vcombine.high %v839_v54, %v843_v58  ;;  %v9264_v11 = vcombine.low %v839_v54, %v843_v58 }
 0x236   :  { %4240 = vmatpush2.bf16.msra.mxu0 %v9312_v3  ;;  %v9393_v3 = vcombine.high %v967_v48, %v971_v60  ;;  %v9392_v43 = vcombine.low %v967_v48, %v971_v60  ;;  %v1203_v33 = vld [vmem:[#allocation7 + $0xdb0] sm:$0xff] }
 0x237   :  { %4283 = vmatpush2.bf16.msra.mxu1 %v9440_v6  ;;  %4241 = vmatprep.subr.bf16.mxu0 %v9305_v7  ;;  %v831_v6 = vld [vmem:[#allocation7 + $0x210] sm:$0xff]  ;;  %v9625_v0 = vcombine.high %v1199_v32, %v1203_v33  ;;  %v9624_v54 = vcombine.low %v1199_v32, %v1203_v33 }
 0x238   :  { %4284 = vmatprep.subr.bf16.mxu1 %v9433_v8  ;;  %v835_v7 = vld [vmem:[#allocation7 + $0x230] sm:$0xff] }
 0x239   :  { %v959_v8 = vld [vmem:[#allocation7 + $0x610] sm:$0xff]  ;;  %v9257_v49 = vcombine.high %v831_v6, %v835_v7  ;;  %v9256_v22 = vcombine.low %v831_v6, %v835_v7 }
 0x23a   :  { %4242 = vmatpush2.bf16.msra.mxu0 %v9304_v44  ;;  %v9385_v44 = vcombine.high %v959_v8, %v963_v9  ;;  %v9384_v23 = vcombine.low %v959_v8, %v963_v9  ;;  %v1191_v46 = vld [vmem:[#allocation7 + $0xd50] sm:$0xff] }
 0x23b   :  { %4285 = vmatpush2.bf16.msra.mxu1 %v9432_v47  ;;  %4243 = vmatprep.subr.bf16.mxu0 %v9297_v19  ;;  %v1079_v47 = vld [vmem:[#allocation7 + $0x9d0] sm:$0xff] }
 0x23c   :  { %4286 = vmatprep.subr.bf16.mxu1 %v9425_v20  ;;  %v1083_v19 = vld [vmem:[#allocation7 + $0x9f0] sm:$0xff] }
 0x23d   :  { %v1207_v20 = vld [vmem:[#allocation7 + $0xdd0] sm:$0xff]  ;;  %v9505_v24 = vcombine.high %v1079_v47, %v1083_v19 }
 0x23e   :  { %4244 = vmatpush2.bf16.msra.mxu0 %v9296_v25  ;;  %v9633_v25 = vcombine.high %v1207_v20, %v1211_v21  ;;  %v9632_v34 = vcombine.low %v1207_v20, %v1211_v21  ;;  %v1195_v51 = vld [vmem:[#allocation7 + $0xd70] sm:$0xff] }
 0x23f   :  { %4287 = vmatpush2.bf16.msra.mxu1 %v9424_v13  ;;  %4245 = vmatprep.subr.bf16.mxu0 %v9289_v27  ;;  %v1071_v13 = vld [vmem:[#allocation7 + $0x990] sm:$0xff] }
 0x240   :  { %4288 = vmatprep.subr.bf16.mxu1 %v9417_v29  ;;  %v1075_v27 = vld [vmem:[#allocation7 + $0x9b0] sm:$0xff]  ;;  %v9504_v29 = vcombine.low %v1079_v47, %v1083_v19 }
 0x241   :  { %v1187_v6 = vld [vmem:[#allocation7 + $0xd30] sm:$0xff] }
 0x242   :  { %4246 = vmatpush2.bf16.msra.mxu0 %v9288_v35  ;;  %v10869_v35 = vpop.f32.mrf.mxu1  ;;  %v1047_v47 = vld [vmem:[#allocation7 + $0x8d0] sm:$0xff] }
 0x243   :  { %4289 = vmatpush2.bf16.msra.mxu1 %v9416_v36  ;;  %4247 = vmatprep.subr.bf16.mxu0 %v9281_v37  ;;  %v9497_v36 = vcombine.high %v1071_v13, %v1075_v27  ;;  %v1063_v37 = vld [vmem:[#allocation7 + $0x950] sm:$0xff] }
 0x244   :  { %4290 = vmatprep.subr.bf16.mxu1 %v9409_v38  ;;  %v1067_v38 = vld [vmem:[#allocation7 + $0x970] sm:$0xff] }
 0x245   :  { %v9489_v58 = vcombine.high %v1063_v37, %v1067_v38  ;;  %v9488_v8 = vcombine.low %v1063_v37, %v1067_v38  ;;  %v1051_v19 = vld [vmem:[#allocation7 + $0x8f0] sm:$0xff] }
 0x246   :  { %4248 = vmatpush2.bf16.msra.mxu0 %v9280_v52  ;;  %v1175_v20 = vld [vmem:[#allocation7 + $0xcd0] sm:$0xff] }
 0x247   :  { %4291 = vmatpush2.bf16.msra.mxu1 %v9408_v53  ;;  %4249 = vmatprep.subr.bf16.mxu0 %v9273_v40  ;;  %v9496_v40 = vcombine.low %v1071_v13, %v1075_v27  ;;  %v1179_v21 = vld [vmem:[#allocation7 + $0xcf0] sm:$0xff] }
 0x248   :  { %4292 = vmatprep.subr.bf16.mxu1 %v9401_v63  ;;  %v9601_v27 = vcombine.high %v1175_v20, %v1179_v21  ;;  %v1043_v32 = vld [vmem:[#allocation7 + $0x8b0] sm:$0xff]  ;;  %v9600_v37 = vcombine.low %v1175_v20, %v1179_v21 }
 0x249   :  { %v1167_v33 = vld [vmem:[#allocation7 + $0xc90] sm:$0xff] }
 0x24a   :  { %4250 = vmatpush2.bf16.msra.mxu0 %v9272_v5  ;;  %v9617_v5 = vcombine.high %v1191_v46, %v1195_v51  ;;  %v1135_v20 = vld [vmem:[#allocation7 + $0xb90] sm:$0xff] }
 0x24b   :  { %4293 = vmatpush2.bf16.msra.mxu1 %v9400_v62  ;;  %4251 = vmatprep.subr.bf16.mxu0 %v9265_v1  ;;  %v1059_v62 = vld [vmem:[#allocation7 + $0x930] sm:$0xff] }
 0x24c   :  { %4294 = vmatprep.subr.bf16.mxu1 %v9393_v3  ;;  %v1183_v3 = vld [vmem:[#allocation7 + $0xd10] sm:$0xff] }
 0x24d   :  { %v1139_v21 = vld [vmem:[#allocation7 + $0xbb0] sm:$0xff] }
 0x24e   :  { %4252 = vmatpush2.bf16.msra.mxu0 %v9264_v11  ;;  %v9616_v11 = vcombine.low %v1191_v46, %v1195_v51  ;;  %v1035_v46 = vld [vmem:[#allocation7 + $0x870] sm:$0xff] }
 0x24f   :  { %4295 = vmatpush2.bf16.msra.mxu1 %v9392_v43  ;;  %4253 = vmatprep.subr.bf16.mxu0 %v9257_v49  ;;  %v1159_v51 = vld [vmem:[#allocation7 + $0xc50] sm:$0xff] }
 0x250   :  { %4296 = vmatprep.subr.bf16.mxu1 %v9385_v44  ;;  %v9609_v44 = vcombine.high %v1183_v3, %v1187_v6 }
 0x252   :  { %4254 = vmatpush2.bf16.msra.mxu0 %v9256_v22 }
 0x253   :  { %4297 = vmatpush2.bf16.msra.mxu1 %v9384_v23  ;;  %4309 = vmatprep.subr.bf16.mxu0 %v9505_v24 }
 0x254   :  { %4352 = vmatprep.subr.bf16.mxu1 %v9633_v25  ;;  %v9473_v25 = vcombine.high %v1047_v47, %v1051_v19 }
 0x255   :  { %v3999_v39 = vpop.f32.mrf.mxu0  ;;  %4256 = vmatmul.mubr.bf16.vlgmr.msra.gmra.mxu0 %v10785_v56  ;;  %v4042_v53 = vpop.f32.mrf.mxu1 }
 0x256   :  { %v4000_v52 = vadd.f32 %v3999_v39, %v10860_v41  ;;  %4299 = vmatmul.mubr.bf16.vlgmr.msra.gmra.mxu1 %v10789_v59  ;;  %4310 = vmatpush1.bf16.msra.mxu0 %v9504_v29  ;;  %v1055_v41 = vld [vmem:[#allocation7 + $0x910] sm:$0xff] }
 0x257   :  { %4341 = vmatprep.mubr.bf16.mxu0 %v10819_v26  ;;  %4353 = vmatpush1.bf16.msra.mxu1 %v9632_v34  ;;  %v10875_v63 = vpop.f32.mrf.mxu0  ;;  %v10878_v60 = vpop.f32.mrf.mxu1  ;;  %v9481_v43 = vcombine.high %v1055_v41, %v1059_v62  ;;  %v9480_v24 = vcombine.low %v1055_v41, %v1059_v62  ;;  %v1039_v29 = vld [vmem:[#allocation7 + $0x890] sm:$0xff] }
 0x258   :  { %v4043_v48 = vadd.f32 %v4042_v53, %v4000_v52  ;;  %4384 = vmatprep.mubr.bf16.mxu1 %v10821_v30  ;;  %4311 = vmatprep.subr.bf16.mxu0 %v9497_v36  ;;  %v1171_v34 = vld [vmem:[#allocation7 + $0xcb0] sm:$0xff]  ;;  %v9472_v36 = vcombine.low %v1047_v47, %v1051_v19  ;;  %v9465_v38 = vcombine.high %v1039_v29, %v1043_v32 }
 0x259   :  { %v4003_v1 = vpop.f32.mrf.mxu0  ;;  %4354 = vmatprep.subr.bf16.mxu1 %v9625_v0  ;;  %v4046_v9 = vpop.f32.mrf.mxu1  ;;  %v9593_v39 = vcombine.high %v1167_v33, %v1171_v34  ;;  %v1031_v0 = vld [vmem:[#allocation7 + $0x850] sm:$0xff]  ;;  %v9464_v53 = vcombine.low %v1039_v29, %v1043_v32 }
 0x25a   :  { %v4004_v7 = vadd.f32 %v4003_v1, %v10865_v61  ;;  %4312 = vmatpush1.bf16.msra.mxu0 %v9496_v40  ;;  %v4567_v22 = vmax.f32 %v4043_v48, 0.0  ;;  %v9608_v61 = vcombine.low %v1183_v3, %v1187_v6  ;;  %v1163_v52 = vld [vmem:[#allocation7 + $0xc70] sm:$0xff]  ;;  %v9592_v40 = vcombine.low %v1167_v33, %v1171_v34 }
 0x25b   :  { %4355 = vmatpush1.bf16.msra.mxu1 %v9624_v54  ;;  %4313 = vmatprep.subr.bf16.mxu0 %v9489_v58  ;;  %v9457_v54 = vcombine.high %v1031_v0, %v1035_v46  ;;  %v9585_v58 = vcombine.high %v1159_v51, %v1163_v52  ;;  %v1023_v48 = vld [vmem:[#allocation7 + $0x810] sm:$0xff]  ;;  %v9456_v1 = vcombine.low %v1031_v0, %v1035_v46 }
 0x25c   :  { %v4047_v49 = vadd.f32 %v4046_v9, %v4004_v7  ;;  %4356 = vmatprep.subr.bf16.mxu1 %v9617_v5  ;;  %v1027_v5 = vld [vmem:[#allocation7 + $0x830] sm:$0xff]  ;;  %v9584_v3 = vcombine.low %v1159_v51, %v1163_v52 }
 0x25d   :  { %v1151_v41 = vld [vmem:[#allocation7 + $0xc10] sm:$0xff]  ;;  %v9449_v6 = vcombine.high %v1023_v48, %v1027_v5 }
 0x25e   :  { %v4575_v23 = vmax.f32 %v4047_v49, 0.0  ;;  %4314 = vmatpush1.bf16.msra.mxu0 %v9488_v8  ;;  %v1155_v62 = vld [vmem:[#allocation7 + $0xc30] sm:$0xff]  ;;  %v9448_v49 = vcombine.low %v1023_v48, %v1027_v5 }
 0x25f   :  { %4357 = vmatpush1.bf16.msra.mxu1 %v9616_v11  ;;  %4315 = vmatprep.subr.bf16.mxu0 %v9481_v43  ;;  %v9577_v7 = vcombine.high %v1151_v41, %v1155_v62  ;;  %v1143_v8 = vld [vmem:[#allocation7 + $0xbd0] sm:$0xff] }
 0x260   :  { %v10881_v13 = vpack.c.bf16 %v4575_v23, %v4567_v22  ;;  %4358 = vmatprep.subr.bf16.mxu1 %v9609_v44  ;;  %v1147_v9 = vld [vmem:[#allocation7 + $0xbf0] sm:$0xff]  ;;  %v9576_v44 = vcombine.low %v1151_v41, %v1155_v62 }
 0x261   :  { %v1271_v11 = vld [vmem:[#allocation7 + $0xfd0] sm:$0xff]  ;;  %v9569_v47 = vcombine.high %v1143_v8, %v1147_v9 }
 0x262   :  { %4316 = vmatpush1.bf16.msra.mxu0 %v9480_v24  ;;  %v1275_v43 = vld [vmem:[#allocation7 + $0xff0] sm:$0xff]  ;;  %v9568_v24 = vcombine.low %v1143_v8, %v1147_v9 }
 0x263   :  { %4359 = vmatpush1.bf16.msra.mxu1 %v9608_v61  ;;  %4317 = vmatprep.subr.bf16.mxu0 %v9473_v25  ;;  %v9697_v19 = vcombine.high %v1271_v11, %v1275_v43  ;;  %v1263_v22 = vld [vmem:[#allocation7 + $0xf90] sm:$0xff]  ;;  %v9696_v61 = vcombine.low %v1271_v11, %v1275_v43  ;;  %v9561_v25 = vcombine.high %v1135_v20, %v1139_v21 }
 0x264   :  { %4360 = vmatprep.subr.bf16.mxu1 %v9601_v27  ;;  %v1267_v23 = vld [vmem:[#allocation7 + $0xfb0] sm:$0xff] }
 0x265   :  { %v9689_v27 = vcombine.high %v1263_v22, %v1267_v23  ;;  %v1127_v29 = vld [vmem:[#allocation7 + $0xb50] sm:$0xff] }
 0x266   :  { %4318 = vmatpush1.bf16.msra.mxu0 %v9472_v36  ;;  %v1131_v32 = vld [vmem:[#allocation7 + $0xb70] sm:$0xff]  ;;  %v9560_v36 = vcombine.low %v1135_v20, %v1139_v21 }
 0x267   :  { %4361 = vmatpush1.bf16.msra.mxu1 %v9600_v37  ;;  %4319 = vmatprep.subr.bf16.mxu0 %v9465_v38  ;;  %v1255_v33 = vld [vmem:[#allocation7 + $0xf50] sm:$0xff]  ;;  %v9688_v37 = vcombine.low %v1263_v22, %v1267_v23  ;;  %v9553_v38 = vcombine.high %v1127_v29, %v1131_v32 }
 0x268   :  { %4362 = vmatprep.subr.bf16.mxu1 %v9593_v39  ;;  %v1259_v34 = vld [vmem:[#allocation7 + $0xf70] sm:$0xff] }
 0x269   :  { %v9681_v39 = vcombine.high %v1255_v33, %v1259_v34  ;;  %v1119_v0 = vld [vmem:[#allocation7 + $0xb10] sm:$0xff] }
 0x26a   :  { %4320 = vmatpush1.bf16.msra.mxu0 %v9464_v53  ;;  %v1123_v46 = vld [vmem:[#allocation7 + $0xb30] sm:$0xff]  ;;  %v9552_v53 = vcombine.low %v1127_v29, %v1131_v32 }
 0x26b   :  { %4363 = vmatpush1.bf16.msra.mxu1 %v9592_v40  ;;  %4321 = vmatprep.subr.bf16.mxu0 %v9457_v54  ;;  %v1247_v51 = vld [vmem:[#allocation7 + $0xf10] sm:$0xff]  ;;  %v9680_v40 = vcombine.low %v1255_v33, %v1259_v34  ;;  %v9545_v54 = vcombine.high %v1119_v0, %v1123_v46 }
 0x26c   :  { %4364 = vmatprep.subr.bf16.mxu1 %v9585_v58  ;;  %v1251_v52 = vld [vmem:[#allocation7 + $0xf30] sm:$0xff] }
 0x26d   :  { %v9673_v58 = vcombine.high %v1247_v51, %v1251_v52  ;;  %v1111_v48 = vld [vmem:[#allocation7 + $0xad0] sm:$0xff] }
 0x26e   :  { %4322 = vmatpush1.bf16.msra.mxu0 %v9456_v1  ;;  %v1115_v5 = vld [vmem:[#allocation7 + $0xaf0] sm:$0xff]  ;;  %v9544_v1 = vcombine.low %v1119_v0, %v1123_v46  ;;  %v824_v0 = vld [vmem:[#allocation7 + $0x1d8] sm:$0xff] }
 0x26f   :  { %4365 = vmatpush1.bf16.msra.mxu1 %v9584_v3  ;;  %4323 = vmatprep.subr.bf16.mxu0 %v9449_v6  ;;  %v1239_v41 = vld [vmem:[#allocation7 + $0xed0] sm:$0xff]  ;;  %v9672_v3 = vcombine.low %v1247_v51, %v1251_v52  ;;  %v9537_v6 = vcombine.high %v1111_v48, %v1115_v5  ;;  %v828_v46 = vld [vmem:[#allocation7 + $0x1f8] sm:$0xff] }
 0x270   :  { %4366 = vmatprep.subr.bf16.mxu1 %v9577_v7  ;;  %v1243_v62 = vld [vmem:[#allocation7 + $0xef0] sm:$0xff]  ;;  %v952_v51 = vld [vmem:[#allocation7 + $0x5d8] sm:$0xff] }
 0x271   :  { %v9665_v7 = vcombine.high %v1239_v41, %v1243_v62  ;;  %v1103_v8 = vld [vmem:[#allocation7 + $0xa90] sm:$0xff]  ;;  %v956_v52 = vld [vmem:[#allocation7 + $0x5f8] sm:$0xff] }
 0x272   :  { %4324 = vmatpush1.bf16.msra.mxu0 %v9448_v49  ;;  %v1107_v9 = vld [vmem:[#allocation7 + $0xab0] sm:$0xff]  ;;  %v9536_v49 = vcombine.low %v1111_v48, %v1115_v5  ;;  %v816_v48 = vld [vmem:[#allocation7 + $0x198] sm:$0xff] }
 0x273   :  { %4367 = vmatpush1.bf16.msra.mxu1 %v9576_v44  ;;  %4325 = vmatprep.subr.bf16.mxu0 %v9569_v47  ;;  %v1231_v11 = vld [vmem:[#allocation7 + $0xe90] sm:$0xff]  ;;  %v9664_v44 = vcombine.low %v1239_v41, %v1243_v62  ;;  %v9529_v47 = vcombine.high %v1103_v8, %v1107_v9  ;;  %v820_v5 = vld [vmem:[#allocation7 + $0x1b8] sm:$0xff]  ;;  %v1290_v41 = vrot.slane %v10851_v50, %v10773_v18 }
 0x274   :  { %4368 = vmatprep.subr.bf16.mxu1 %v9697_v19  ;;  %v1235_v43 = vld [vmem:[#allocation7 + $0xeb0] sm:$0xff]  ;;  %v9250_v62 = vcombine.low %v824_v0, %v828_v46  ;;  %v940_v50 = vld [vmem:[#allocation7 + $0x578] sm:$0xff] }
 0x275   :  { %v9657_v19 = vcombine.high %v1231_v11, %v1235_v43  ;;  %v1095_v20 = vld [vmem:[#allocation7 + $0xa50] sm:$0xff] }
 0x276   :  { %4326 = vmatpush2.bf16.msra.mxu0 %v9568_v24  ;;  %v1099_v21 = vld [vmem:[#allocation7 + $0xa70] sm:$0xff]  ;;  %v9528_v24 = vcombine.low %v1103_v8, %v1107_v9  ;;  %v10887_v8 = vpop.f32.mrf.mxu1  ;;  %v9243_v9 = vcombine.high %v816_v48, %v820_v5 }
 0x277   :  { %4369 = vmatpush2.bf16.msra.mxu1 %v9696_v61  ;;  %4327 = vmatprep.subr.bf16.mxu0 %v9561_v25  ;;  %v1223_v22 = vld [vmem:[#allocation7 + $0xe50] sm:$0xff]  ;;  %v9656_v61 = vcombine.low %v1231_v11, %v1235_v43  ;;  %v9521_v25 = vcombine.high %v1095_v20, %v1099_v21  ;;  %v808_v11 = vld [vmem:[#allocation7 + $0x158] sm:$0xff] }
 0x278   :  { %4370 = vmatprep.subr.bf16.mxu1 %v9689_v27  ;;  %v1227_v23 = vld [vmem:[#allocation7 + $0xe70] sm:$0xff]  ;;  %v812_v43 = vld [vmem:[#allocation7 + $0x178] sm:$0xff] }
 0x279   :  { %v9649_v27 = vcombine.high %v1223_v22, %v1227_v23  ;;  %v1087_v29 = vld [vmem:[#allocation7 + $0xa10] sm:$0xff] }
 0x27a   :  { %4328 = vmatpush2.bf16.msra.mxu0 %v9560_v36  ;;  %v1091_v32 = vld [vmem:[#allocation7 + $0xa30] sm:$0xff]  ;;  %v9520_v36 = vcombine.low %v1095_v20, %v1099_v21  ;;  %v9242_v21 = vcombine.low %v816_v48, %v820_v5 }
 0x27b   :  { %4371 = vmatpush2.bf16.msra.mxu1 %v9688_v37  ;;  %4329 = vmatprep.subr.bf16.mxu0 %v9553_v38  ;;  %v1215_v33 = vld [vmem:[#allocation7 + $0xe10] sm:$0xff]  ;;  %v9648_v37 = vcombine.low %v1223_v22, %v1227_v23  ;;  %v9513_v38 = vcombine.high %v1087_v29, %v1091_v32 }
 0x27c   :  { %4372 = vmatprep.subr.bf16.mxu1 %v9681_v39  ;;  %v1219_v34 = vld [vmem:[#allocation7 + $0xe30] sm:$0xff] }
 0x27d   :  { %v9641_v39 = vcombine.high %v1215_v33, %v1219_v34 }
 0x27e   :  { %4330 = vmatpush2.bf16.msra.mxu0 %v9552_v53  ;;  %v9512_v53 = vcombine.low %v1087_v29, %v1091_v32  ;;  %v800_v29 = vld [vmem:[#allocation7 + $0x118] sm:$0xff] }
 0x27f   :  { %4373 = vmatpush2.bf16.msra.mxu1 %v9680_v40  ;;  %4331 = vmatprep.subr.bf16.mxu0 %v9545_v54  ;;  %v9640_v40 = vcombine.low %v1215_v33, %v1219_v34  ;;  %v9251_v54 = vcombine.high %v824_v0, %v828_v46  ;;  %v804_v32 = vld [vmem:[#allocation7 + $0x138] sm:$0xff] }
 0x280   :  { %4374 = vmatprep.subr.bf16.mxu1 %v9673_v58  ;;  %v9379_v58 = vcombine.high %v952_v51, %v956_v52  ;;  %v928_v34 = vld [vmem:[#allocation7 + $0x518] sm:$0xff]  ;;  %v9227_v0 = vcombine.high %v800_v29, %v804_v32 }
 0x282   :  { %4332 = vmatpush2.bf16.msra.mxu0 %v9544_v1  ;;  %v944_v1 = vld [vmem:[#allocation7 + $0x598] sm:$0xff] }
 0x283   :  { %4375 = vmatpush2.bf16.msra.mxu1 %v9672_v3  ;;  %4333 = vmatprep.subr.bf16.mxu0 %v9537_v6  ;;  %v948_v3 = vld [vmem:[#allocation7 + $0x5b8] sm:$0xff]  ;;  %v10885_v6 = vpop.f32.mrf.mxu0 }
 0x284   :  { %4376 = vmatprep.subr.bf16.mxu1 %v9665_v7  ;;  %v9378_v7 = vcombine.low %v952_v51, %v956_v52  ;;  %v9370_v23 = vcombine.low %v944_v1, %v948_v3  ;;  %v792_v51 = vld [vmem:[#allocation7 + $0xd8] sm:$0xff] }
 0x285   :  { %v796_v52 = vld [vmem:[#allocation7 + $0xf8] sm:$0xff] }
 0x286   :  { %4334 = vmatpush2.bf16.msra.mxu0 %v9536_v49  ;;  %v9219_v48 = vcombine.high %v792_v51, %v796_v52 }
 0x287   :  { %4377 = vmatpush2.bf16.msra.mxu1 %v9664_v44  ;;  %4335 = vmatprep.subr.bf16.mxu0 %v9529_v47  ;;  %v9371_v44 = vcombine.high %v944_v1, %v948_v3  ;;  %v936_v47 = vld [vmem:[#allocation7 + $0x558] sm:$0xff] }
 0x288   :  { %4378 = vmatprep.subr.bf16.mxu1 %v9657_v19  ;;  %v912_v1 = vld [vmem:[#allocation7 + $0x498] sm:$0xff] }
 0x289   :  { %v916_v3 = vld [vmem:[#allocation7 + $0x4b8] sm:$0xff] }
 0x28a   :  { %4336 = vmatpush2.bf16.msra.mxu0 %v9528_v24  ;;  %v9235_v24 = vcombine.high %v808_v11, %v812_v43 }
 0x28b   :  { %4379 = vmatpush2.bf16.msra.mxu1 %v9656_v61  ;;  %4337 = vmatprep.subr.bf16.mxu0 %v9521_v25 }
 0x28c   :  { %4380 = vmatprep.subr.bf16.mxu1 %v9649_v27  ;;  %v9363_v27 = vcombine.high %v936_v47, %v940_v50 }
 0x28e   :  { %4338 = vmatpush2.bf16.msra.mxu0 %v9520_v36  ;;  %v932_v36 = vld [vmem:[#allocation7 + $0x538] sm:$0xff] }
 0x28f   :  { %4381 = vmatpush2.bf16.msra.mxu1 %v9648_v37  ;;  %4339 = vmatprep.subr.bf16.mxu0 %v9513_v38  ;;  %v9234_v37 = vcombine.low %v808_v11, %v812_v43  ;;  %v9339_v43 = vcombine.high %v912_v1, %v916_v3 }
 0x290   :  { %4382 = vmatprep.subr.bf16.mxu1 %v9641_v39  ;;  %v9362_v39 = vcombine.low %v936_v47, %v940_v50  ;;  %v904_v47 = vld [vmem:[#allocation7 + $0x458] sm:$0xff] }
 0x291   :  { %v908_v50 = vld [vmem:[#allocation7 + $0x478] sm:$0xff] }
 0x292   :  { %4340 = vmatpush2.bf16.msra.mxu0 %v9512_v53  ;;  %v920_v53 = vld [vmem:[#allocation7 + $0x4d8] sm:$0xff] }
 0x293   :  { %4383 = vmatpush2.bf16.msra.mxu1 %v9640_v40  ;;  %4395 = vmatprep.subr.bf16.mxu0 %v9251_v54  ;;  %v924_v40 = vld [vmem:[#allocation7 + $0x4f8] sm:$0xff]  ;;  %v9226_v54 = vcombine.low %v800_v29, %v804_v32 }
 0x294   :  { %4438 = vmatprep.subr.bf16.mxu1 %v9379_v58  ;;  %v9354_v58 = vcombine.low %v928_v34, %v932_v36  ;;  %v9347_v5 = vcombine.high %v920_v53, %v924_v40  ;;  %v896_v29 = vld [vmem:[#allocation7 + $0x418] sm:$0xff] }
 0x295   :  { %v4085_v49 = vpop.f32.mrf.mxu0  ;;  %4342 = vmatmul.mubr.bf16.vlgmr.msra.gmra.mxu0 %v10839_v2  ;;  %v900_v32 = vld [vmem:[#allocation7 + $0x438] sm:$0xff] }
 0x296   :  { %v4086_v19 = vadd.f32 %v4085_v49, %v1290_v41  ;;  %v4128_v20 = vpop.f32.mrf.mxu1  ;;  %4385 = vmatmul.mubr.bf16.vlgmr.msra.gmra.mxu1 %v10841_v4  ;;  %4396 = vmatpush1.bf16.msra.mxu0 %v9250_v62  ;;  %v788_v62 = vld [vmem:[#allocation7 + $0xb8] sm:$0xff] }
 0x297   :  { %4427 = vmatprep.mubr.bf16.mxu0 %v10783_v55  ;;  %4439 = vmatpush1.bf16.msra.mxu1 %v9378_v7  ;;  %v10892_v22 = vpop.f32.mrf.mxu0  ;;  %v9218_v7 = vcombine.low %v792_v51, %v796_v52  ;;  %v776_v49 = vld [vmem:[#allocation7 + $0x58] sm:$0xff]  ;;  %v9322_v51 = vcombine.low %v896_v29, %v900_v32 }
 0x298   :  { %v10894_v61 = vadd.f32 %v4128_v20, %v4086_v19  ;;  %4470 = vmatprep.mubr.bf16.mxu1 %v10787_v57  ;;  %v10897_v25 = vpop.f32.mrf.mxu1  ;;  %4397 = vmatprep.subr.bf16.mxu0 %v9243_v9  ;;  %v9355_v57 = vcombine.high %v928_v34, %v932_v36  ;;  %v9346_v9 = vcombine.low %v920_v53, %v924_v40  ;;  %v880_v40 = vld [vmem:[#allocation7 + $0x398] sm:$0xff] }
 0x299   :  { %v4089_v33 = vpop.f32.mrf.mxu0  ;;  %4440 = vmatprep.subr.bf16.mxu1 %v9371_v44  ;;  %v780_v44 = vld [vmem:[#allocation7 + $0x78] sm:$0xff]  ;;  %v9338_v20 = vcombine.low %v912_v1, %v916_v3  ;;  %v9330_v34 = vcombine.low %v904_v47, %v908_v50 }
 0x29a   :  { %v4090_v55 = vadd.f32 %v4089_v33, %v1290_v41  ;;  %4398 = vmatpush1.bf16.msra.mxu0 %v9242_v21  ;;  %v4132_v38 = vpop.f32.mrf.mxu1  ;;  %v784_v41 = vld [vmem:[#allocation7 + $0x98] sm:$0xff]  ;;  %v9203_v21 = vcombine.high %v776_v49, %v780_v44  ;;  %v9202_v33 = vcombine.low %v776_v49, %v780_v44 }
 0x29b   :  { %4441 = vmatpush1.bf16.msra.mxu1 %v9370_v23  ;;  %4399 = vmatprep.subr.bf16.mxu0 %v9235_v24  ;;  %v9211_v11 = vcombine.high %v784_v41, %v788_v62  ;;  %v9210_v19 = vcombine.low %v784_v41, %v788_v62  ;;  %v9331_v23 = vcombine.high %v904_v47, %v908_v50  ;;  %v768_v24 = vld [vmem:[#allocation7 + $0x18] sm:$0xff] }
 0x29c   :  { %v10899_v46 = vadd.f32 %v4132_v38, %v4090_v55  ;;  %4442 = vmatprep.subr.bf16.mxu1 %v9363_v27  ;;  %v772_v27 = vld [vmem:[#allocation7 + $0x38] sm:$0xff]  ;;  %v9323_v55 = vcombine.high %v896_v29, %v900_v32 }
 0x29d   :  { %v9195_v36 = vcombine.high %v768_v24, %v772_v27  ;;  %v892_v38 = vld [vmem:[#allocation7 + $0x3f8] sm:$0xff] }
 0x29e   :  { %4400 = vmatpush1.bf16.msra.mxu0 %v9234_v37  ;;  %v888_v37 = vld [vmem:[#allocation7 + $0x3d8] sm:$0xff] }
 0x29f   :  { %4443 = vmatpush1.bf16.msra.mxu1 %v9362_v39  ;;  %4401 = vmatprep.subr.bf16.mxu0 %v9227_v0  ;;  %v1016_v39 = vld [vmem:[#allocation7 + $0x7d8] sm:$0xff]  ;;  %v9315_v52 = vcombine.high %v888_v37, %v892_v38 }
 0x2a0   :  { %4444 = vmatprep.subr.bf16.mxu1 %v9355_v57  ;;  %v1020_v0 = vld [vmem:[#allocation7 + $0x7f8] sm:$0xff]  ;;  %v9194_v57 = vcombine.low %v768_v24, %v772_v27 }
 0x2a1   :  { %v9443_v53 = vcombine.high %v1016_v39, %v1020_v0  ;;  %v9442_v41 = vcombine.low %v1016_v39, %v1020_v0  ;;  %v872_v3 = vld [vmem:[#allocation7 + $0x358] sm:$0xff] }
 0x2a2   :  { %4402 = vmatpush1.bf16.msra.mxu0 %v9226_v54  ;;  %v884_v54 = vld [vmem:[#allocation7 + $0x3b8] sm:$0xff] }
 0x2a3   :  { %4445 = vmatpush1.bf16.msra.mxu1 %v9354_v58  ;;  %4403 = vmatprep.subr.bf16.mxu0 %v9219_v48  ;;  %v1008_v58 = vld [vmem:[#allocation7 + $0x798] sm:$0xff]  ;;  %v9307_v62 = vcombine.high %v880_v40, %v884_v54 }
 0x2a4   :  { %4446 = vmatprep.subr.bf16.mxu1 %v9347_v5  ;;  %v1012_v48 = vld [vmem:[#allocation7 + $0x7b8] sm:$0xff]  ;;  %v9314_v5 = vcombine.low %v888_v37, %v892_v38 }
 0x2a5   :  { %v9435_v1 = vcombine.high %v1008_v58, %v1012_v48  ;;  %v9434_v49 = vcombine.low %v1008_v58, %v1012_v48  ;;  %v864_v50 = vld [vmem:[#allocation7 + $0x318] sm:$0xff] }
 0x2a6   :  { %4404 = vmatpush1.bf16.msra.mxu0 %v9218_v7  ;;  %v876_v7 = vld [vmem:[#allocation7 + $0x378] sm:$0xff] }
 0x2a7   :  { %4447 = vmatpush1.bf16.msra.mxu1 %v9346_v9  ;;  %4405 = vmatprep.subr.bf16.mxu0 %v9211_v11  ;;  %v1000_v9 = vld [vmem:[#allocation7 + $0x758] sm:$0xff]  ;;  %v9299_v44 = vcombine.high %v872_v3, %v876_v7 }
 0x2a8   :  { %4448 = vmatprep.subr.bf16.mxu1 %v9339_v43  ;;  %v1004_v11 = vld [vmem:[#allocation7 + $0x778] sm:$0xff]  ;;  %v9306_v43 = vcombine.low %v880_v40, %v884_v54 }
 0x2a9   :  { %v9427_v47 = vcombine.high %v1000_v9, %v1004_v11  ;;  %v9426_v24 = vcombine.low %v1000_v9, %v1004_v11  ;;  %v856_v32 = vld [vmem:[#allocation7 + $0x2d8] sm:$0xff] }
 0x2aa   :  { %4406 = vmatpush1.bf16.msra.mxu0 %v9210_v19  ;;  %v868_v19 = vld [vmem:[#allocation7 + $0x338] sm:$0xff] }
 0x2ab   :  { %4449 = vmatpush1.bf16.msra.mxu1 %v9338_v20  ;;  %4407 = vmatprep.subr.bf16.mxu0 %v9203_v21  ;;  %v992_v20 = vld [vmem:[#allocation7 + $0x718] sm:$0xff]  ;;  %v9291_v27 = vcombine.high %v864_v50, %v868_v19 }
 0x2ac   :  { %4450 = vmatprep.subr.bf16.mxu1 %v9331_v23  ;;  %v996_v21 = vld [vmem:[#allocation7 + $0x738] sm:$0xff]  ;;  %v9298_v23 = vcombine.low %v872_v3, %v876_v7 }
 0x2ad   :  { %v9419_v29 = vcombine.high %v992_v20, %v996_v21  ;;  %v9418_v37 = vcombine.low %v992_v20, %v996_v21  ;;  %v848_v0 = vld [vmem:[#allocation7 + $0x298] sm:$0xff] }
 0x2ae   :  { %4408 = vmatpush1.bf16.msra.mxu0 %v9202_v33  ;;  %v860_v33 = vld [vmem:[#allocation7 + $0x2f8] sm:$0xff] }
 0x2af   :  { %4451 = vmatpush1.bf16.msra.mxu1 %v9330_v34  ;;  %4409 = vmatprep.subr.bf16.mxu0 %v9195_v36  ;;  %v984_v34 = vld [vmem:[#allocation7 + $0x6d8] sm:$0xff]  ;;  %v9283_v38 = vcombine.high %v856_v32, %v860_v33 }
 0x2b0   :  { %4452 = vmatprep.subr.bf16.mxu1 %v9323_v55  ;;  %v988_v36 = vld [vmem:[#allocation7 + $0x6f8] sm:$0xff]  ;;  %v9290_v55 = vcombine.low %v864_v50, %v868_v19 }
 0x2b1   :  { %v9411_v39 = vcombine.high %v984_v34, %v988_v36  ;;  %v9410_v40 = vcombine.low %v984_v34, %v988_v36  ;;  %v840_v48 = vld [vmem:[#allocation7 + $0x258] sm:$0xff] }
 0x2b2   :  { %4410 = vmatpush1.bf16.msra.mxu0 %v9194_v57  ;;  %v852_v57 = vld [vmem:[#allocation7 + $0x2b8] sm:$0xff] }
 0x2b3   :  { %4453 = vmatpush1.bf16.msra.mxu1 %v9322_v51  ;;  %4411 = vmatprep.subr.bf16.mxu0 %v9315_v52  ;;  %v976_v51 = vld [vmem:[#allocation7 + $0x698] sm:$0xff]  ;;  %v9275_v54 = vcombine.high %v848_v0, %v852_v57 }
 0x2b4   :  { %4454 = vmatprep.subr.bf16.mxu1 %v9443_v53  ;;  %v980_v52 = vld [vmem:[#allocation7 + $0x6b8] sm:$0xff]  ;;  %v9282_v53 = vcombine.low %v856_v32, %v860_v33 }
 0x2b5   :  { %v9403_v58 = vcombine.high %v976_v51, %v980_v52  ;;  %v9402_v3 = vcombine.low %v976_v51, %v980_v52  ;;  %v832_v11 = vld [vmem:[#allocation7 + $0x218] sm:$0xff]  ;;  %v10903_v51 = vpop.f32.mrf.mxu1 }
 0x2b6   :  { %4412 = vmatpush2.bf16.msra.mxu0 %v9314_v5  ;;  %v844_v5 = vld [vmem:[#allocation7 + $0x278] sm:$0xff] }
 0x2b7   :  { %4455 = vmatpush2.bf16.msra.mxu1 %v9442_v41  ;;  %4413 = vmatprep.subr.bf16.mxu0 %v9307_v62  ;;  %v968_v41 = vld [vmem:[#allocation7 + $0x658] sm:$0xff]  ;;  %v9267_v7 = vcombine.high %v840_v48, %v844_v5 }
 0x2b8   :  { %4456 = vmatprep.subr.bf16.mxu1 %v9435_v1  ;;  %v972_v62 = vld [vmem:[#allocation7 + $0x678] sm:$0xff]  ;;  %v9274_v1 = vcombine.low %v848_v0, %v852_v57  ;;  %v10901_v0 = vpop.f32.mrf.mxu0 }
 0x2b9   :  { %v9395_v9 = vcombine.high %v968_v41, %v972_v62  ;;  %v9394_v50 = vcombine.low %v968_v41, %v972_v62  ;;  %v1080_v21 = vld [vmem:[#allocation7 + $0x9d8] sm:$0xff] }
 0x2ba   :  { %4414 = vmatpush2.bf16.msra.mxu0 %v9306_v43  ;;  %v836_v43 = vld [vmem:[#allocation7 + $0x238] sm:$0xff] }
 0x2bb   :  { %4457 = vmatpush2.bf16.msra.mxu1 %v9434_v49  ;;  %4415 = vmatprep.subr.bf16.mxu0 %v9299_v44  ;;  %v960_v49 = vld [vmem:[#allocation7 + $0x618] sm:$0xff]  ;;  %v9259_v19 = vcombine.high %v832_v11, %v836_v43 }
 0x2bc   :  { %4458 = vmatprep.subr.bf16.mxu1 %v9427_v47  ;;  %v964_v44 = vld [vmem:[#allocation7 + $0x638] sm:$0xff]  ;;  %v9266_v47 = vcombine.low %v840_v48, %v844_v5 }
 0x2bd   :  { %v9387_v20 = vcombine.high %v960_v49, %v964_v44  ;;  %v9386_v32 = vcombine.low %v960_v49, %v964_v44  ;;  %v1072_v36 = vld [vmem:[#allocation7 + $0x998] sm:$0xff] }
 0x2be   :  { %4416 = vmatpush2.bf16.msra.mxu0 %v9298_v23  ;;  %v1084_v23 = vld [vmem:[#allocation7 + $0x9f8] sm:$0xff] }
 0x2bf   :  { %4459 = vmatpush2.bf16.msra.mxu1 %v9426_v24  ;;  %4417 = vmatprep.subr.bf16.mxu0 %v9291_v27  ;;  %v1208_v24 = vld [vmem:[#allocation7 + $0xdd8] sm:$0xff]  ;;  %v9507_v33 = vcombine.high %v1080_v21, %v1084_v23 }
 0x2c0   :  { %4460 = vmatprep.subr.bf16.mxu1 %v9419_v29  ;;  %v1212_v27 = vld [vmem:[#allocation7 + $0xdf8] sm:$0xff]  ;;  %v9258_v29 = vcombine.low %v832_v11, %v836_v43 }
 0x2c1   :  { %v9635_v34 = vcombine.high %v1208_v24, %v1212_v27  ;;  %v9634_v57 = vcombine.low %v1208_v24, %v1212_v27  ;;  %v1192_v48 = vld [vmem:[#allocation7 + $0xd58] sm:$0xff] }
 0x2c2   :  { %4418 = vmatpush2.bf16.msra.mxu0 %v9290_v55  ;;  %v1076_v55 = vld [vmem:[#allocation7 + $0x9b8] sm:$0xff] }
 0x2c3   :  { %4461 = vmatpush2.bf16.msra.mxu1 %v9418_v37  ;;  %4419 = vmatprep.subr.bf16.mxu0 %v9283_v38  ;;  %v9506_v37 = vcombine.low %v1080_v21, %v1084_v23  ;;  %v1200_v38 = vld [vmem:[#allocation7 + $0xd98] sm:$0xff]  ;;  %v9499_v52 = vcombine.high %v1072_v36, %v1076_v55 }
 0x2c4   :  { %4462 = vmatprep.subr.bf16.mxu1 %v9411_v39  ;;  %v1204_v39 = vld [vmem:[#allocation7 + $0xdb8] sm:$0xff] }
 0x2c5   :  { %v1196_v5 = vld [vmem:[#allocation7 + $0xd78] sm:$0xff] }
 0x2c6   :  { %4420 = vmatpush2.bf16.msra.mxu0 %v9282_v53  ;;  %v1064_v53 = vld [vmem:[#allocation7 + $0x958] sm:$0xff]  ;;  %v9619_v43 = vcombine.high %v1192_v48, %v1196_v5 }
 0x2c7   :  { %4463 = vmatpush2.bf16.msra.mxu1 %v9410_v40  ;;  %4421 = vmatprep.subr.bf16.mxu0 %v9275_v54  ;;  %v1068_v40 = vld [vmem:[#allocation7 + $0x978] sm:$0xff] }
 0x2c8   :  { %4464 = vmatprep.subr.bf16.mxu1 %v9403_v58  ;;  %v9627_v58 = vcombine.high %v1200_v38, %v1204_v39  ;;  %v1060_v49 = vld [vmem:[#allocation7 + $0x938] sm:$0xff] }
 0x2c9   :  { %v1048_v24 = vld [vmem:[#allocation7 + $0x8d8] sm:$0xff] }
 0x2ca   :  { %4422 = vmatpush2.bf16.msra.mxu0 %v9274_v1  ;;  %v9498_v1 = vcombine.low %v1072_v36, %v1076_v55  ;;  %v1052_v27 = vld [vmem:[#allocation7 + $0x8f8] sm:$0xff] }
 0x2cb   :  { %4465 = vmatpush2.bf16.msra.mxu1 %v9402_v3  ;;  %4423 = vmatprep.subr.bf16.mxu0 %v9267_v7  ;;  %v9626_v7 = vcombine.low %v1200_v38, %v1204_v39  ;;  %v9475_v55 = vcombine.high %v1048_v24, %v1052_v27  ;;  %v1040_v39 = vld [vmem:[#allocation7 + $0x898] sm:$0xff] }
 0x2cc   :  { %4466 = vmatprep.subr.bf16.mxu1 %v9395_v9  ;;  %v9491_v9 = vcombine.high %v1064_v53, %v1068_v40 }
 0x2ce   :  { %4424 = vmatpush2.bf16.msra.mxu0 %v9266_v47  ;;  %v1188_v47 = vld [vmem:[#allocation7 + $0xd38] sm:$0xff] }
 0x2cf   :  { %4467 = vmatpush2.bf16.msra.mxu1 %v9394_v50  ;;  %4425 = vmatprep.subr.bf16.mxu0 %v9259_v19  ;;  %v9490_v50 = vcombine.low %v1064_v53, %v1068_v40  ;;  %v1172_v53 = vld [vmem:[#allocation7 + $0xcb8] sm:$0xff]  ;;  %v9474_v40 = vcombine.low %v1048_v24, %v1052_v27 }
 0x2d0   :  { %4468 = vmatprep.subr.bf16.mxu1 %v9387_v20  ;;  %v9618_v20 = vcombine.low %v1192_v48, %v1196_v5  ;;  %v1032_v5 = vld [vmem:[#allocation7 + $0x858] sm:$0xff] }
 0x2d2   :  { %4426 = vmatpush2.bf16.msra.mxu0 %v9258_v29  ;;  %v1176_v29 = vld [vmem:[#allocation7 + $0xcd8] sm:$0xff] }
 0x2d3   :  { %4469 = vmatpush2.bf16.msra.mxu1 %v9386_v32  ;;  %4481 = vmatprep.subr.bf16.mxu0 %v9507_v33  ;;  %v1180_v32 = vld [vmem:[#allocation7 + $0xcf8] sm:$0xff] }
 0x2d4   :  { %4524 = vmatprep.subr.bf16.mxu1 %v9635_v34  ;;  %v9603_v38 = vcombine.high %v1176_v29, %v1180_v32 }
 0x2d5   :  { %v4171_v54 = vpop.f32.mrf.mxu0  ;;  %4428 = vmatmul.mubr.bf16.vlgmr.msra.gmra.mxu0 %v10785_v56 }
 0x2d6   :  { %v4172_v41 = vadd.f32 %v4171_v54, %v10894_v61  ;;  %v4214_v62 = vpop.f32.mrf.mxu1  ;;  %4471 = vmatmul.mubr.bf16.vlgmr.msra.gmra.mxu1 %v10789_v59  ;;  %4482 = vmatpush1.bf16.msra.mxu0 %v9506_v37  ;;  %v1056_v61 = vld [vmem:[#allocation7 + $0x918] sm:$0xff]  ;;  %v9602_v54 = vcombine.low %v1176_v29, %v1180_v32 }
 0x2d7   :  { %4513 = vmatprep.mubr.bf16.mxu0 %v10819_v26  ;;  %4525 = vmatpush1.bf16.msra.mxu1 %v9634_v57  ;;  %v10909_v3 = vpop.f32.mrf.mxu0  ;;  %v1184_v59 = vld [vmem:[#allocation7 + $0xd18] sm:$0xff]  ;;  %v9483_v21 = vcombine.high %v1056_v61, %v1060_v49  ;;  %v9482_v36 = vcombine.low %v1056_v61, %v1060_v49 }
 0x2d8   :  { %v4215_v11 = vadd.f32 %v4214_v62, %v4172_v41  ;;  %4556 = vmatprep.mubr.bf16.mxu1 %v10821_v30  ;;  %v10912_v56 = vpop.f32.mrf.mxu1  ;;  %4483 = vmatprep.subr.bf16.mxu0 %v9499_v52  ;;  %v9611_v23 = vcombine.high %v1184_v59, %v1188_v47  ;;  %v1044_v57 = vld [vmem:[#allocation7 + $0x8b8] sm:$0xff] }
 0x2d9   :  { %v4175_v44 = vpop.f32.mrf.mxu0  ;;  %4526 = vmatprep.subr.bf16.mxu1 %v9627_v58  ;;  %v1168_v52 = vld [vmem:[#allocation7 + $0xc98] sm:$0xff]  ;;  %v9467_v58 = vcombine.high %v1040_v39, %v1044_v57 }
 0x2da   :  { %v4176_v26 = vadd.f32 %v4175_v44, %v10899_v46  ;;  %4484 = vmatpush1.bf16.msra.mxu0 %v9498_v1  ;;  %v4218_v19 = vpop.f32.mrf.mxu1  ;;  %v4569_v33 = vmax.f32 %v4215_v11, 0.0  ;;  %v9610_v46 = vcombine.low %v1184_v59, %v1188_v47  ;;  %v9595_v48 = vcombine.high %v1168_v52, %v1172_v53  ;;  %v1036_v41 = vld [vmem:[#allocation7 + $0x878] sm:$0xff] }
 0x2db   :  { %4527 = vmatpush1.bf16.msra.mxu1 %v9626_v7  ;;  %4485 = vmatprep.subr.bf16.mxu0 %v9491_v9  ;;  %v1160_v62 = vld [vmem:[#allocation7 + $0xc58] sm:$0xff]  ;;  %v9466_v7 = vcombine.low %v1040_v39, %v1044_v57  ;;  %v9594_v9 = vcombine.low %v1168_v52, %v1172_v53  ;;  %v9459_v11 = vcombine.high %v1032_v5, %v1036_v41 }
 0x2dc   :  { %v4219_v30 = vadd.f32 %v4218_v19, %v4176_v26  ;;  %4528 = vmatprep.subr.bf16.mxu1 %v9619_v43  ;;  %v1164_v1 = vld [vmem:[#allocation7 + $0xc78] sm:$0xff]  ;;  %v9458_v47 = vcombine.low %v1032_v5, %v1036_v41 }
 0x2dd   :  { %v9587_v43 = vcombine.high %v1160_v62, %v1164_v1  ;;  %v1024_v61 = vld [vmem:[#allocation7 + $0x818] sm:$0xff]  ;;  %v9586_v26 = vcombine.low %v1160_v62, %v1164_v1 }
 0x2de   :  { %v4577_v34 = vmax.f32 %v4219_v30, 0.0  ;;  %4486 = vmatpush1.bf16.msra.mxu0 %v9490_v50  ;;  %v1028_v49 = vld [vmem:[#allocation7 + $0x838] sm:$0xff] }
 0x2df   :  { %4529 = vmatpush1.bf16.msra.mxu1 %v9618_v20  ;;  %4487 = vmatprep.subr.bf16.mxu0 %v9483_v21  ;;  %v1152_v44 = vld [vmem:[#allocation7 + $0xc18] sm:$0xff]  ;;  %v9451_v50 = vcombine.high %v1024_v61, %v1028_v49  ;;  %v9450_v24 = vcombine.low %v1024_v61, %v1028_v49 }
 0x2e0   :  { %v10915_v37 = vpack.c.bf16 %v4577_v34, %v4569_v33  ;;  %4530 = vmatprep.subr.bf16.mxu1 %v9611_v23  ;;  %v1156_v59 = vld [vmem:[#allocation7 + $0xc38] sm:$0xff] }
 0x2e1   :  { %v9579_v19 = vcombine.high %v1152_v44, %v1156_v59  ;;  %v1144_v20 = vld [vmem:[#allocation7 + $0xbd8] sm:$0xff]  ;;  %v9578_v27 = vcombine.low %v1152_v44, %v1156_v59 }
 0x2e2   :  { %4488 = vmatpush1.bf16.msra.mxu0 %v9482_v36  ;;  %v1148_v21 = vld [vmem:[#allocation7 + $0xbf8] sm:$0xff] }
 0x2e3   :  { %4531 = vmatpush1.bf16.msra.mxu1 %v9610_v46  ;;  %4489 = vmatprep.subr.bf16.mxu0 %v9475_v55  ;;  %v1272_v30 = vld [vmem:[#allocation7 + $0xfd8] sm:$0xff]  ;;  %v9571_v29 = vcombine.high %v1144_v20, %v1148_v21  ;;  %v9570_v55 = vcombine.low %v1144_v20, %v1148_v21 }
 0x2e4   :  { %4532 = vmatprep.subr.bf16.mxu1 %v9603_v38  ;;  %v1276_v23 = vld [vmem:[#allocation7 + $0xff8] sm:$0xff] }
 0x2e5   :  { %v9699_v32 = vcombine.high %v1272_v30, %v1276_v23  ;;  %v1136_v33 = vld [vmem:[#allocation7 + $0xb98] sm:$0xff]  ;;  %v9698_v38 = vcombine.low %v1272_v30, %v1276_v23 }
 0x2e6   :  { %4490 = vmatpush1.bf16.msra.mxu0 %v9474_v40  ;;  %v1140_v34 = vld [vmem:[#allocation7 + $0xbb8] sm:$0xff] }
 0x2e7   :  { %4533 = vmatpush1.bf16.msra.mxu1 %v9602_v54  ;;  %4491 = vmatprep.subr.bf16.mxu0 %v9467_v58  ;;  %v1264_v36 = vld [vmem:[#allocation7 + $0xf98] sm:$0xff]  ;;  %v9563_v39 = vcombine.high %v1136_v33, %v1140_v34  ;;  %v9562_v58 = vcombine.low %v1136_v33, %v1140_v34 }
 0x2e8   :  { %4534 = vmatprep.subr.bf16.mxu1 %v9595_v48  ;;  %v1268_v46 = vld [vmem:[#allocation7 + $0xfb8] sm:$0xff] }
 0x2e9   :  { %v9691_v57 = vcombine.high %v1264_v36, %v1268_v46  ;;  %v1128_v52 = vld [vmem:[#allocation7 + $0xb58] sm:$0xff]  ;;  %v9690_v48 = vcombine.low %v1264_v36, %v1268_v46 }
 0x2ea   :  { %4492 = vmatpush1.bf16.msra.mxu0 %v9466_v7  ;;  %v1132_v53 = vld [vmem:[#allocation7 + $0xb78] sm:$0xff] }
 0x2eb   :  { %4535 = vmatpush1.bf16.msra.mxu1 %v9594_v9  ;;  %4493 = vmatprep.subr.bf16.mxu0 %v9459_v11  ;;  %v1256_v40 = vld [vmem:[#allocation7 + $0xf58] sm:$0xff]  ;;  %v9555_v5 = vcombine.high %v1128_v52, %v1132_v53  ;;  %v9554_v11 = vcombine.low %v1128_v52, %v1132_v53 }
 0x2ec   :  { %4536 = vmatprep.subr.bf16.mxu1 %v9587_v43  ;;  %v1260_v54 = vld [vmem:[#allocation7 + $0xf78] sm:$0xff] }
 0x2ed   :  { %v9683_v41 = vcombine.high %v1256_v40, %v1260_v54  ;;  %v1120_v62 = vld [vmem:[#allocation7 + $0xb18] sm:$0xff]  ;;  %v9682_v43 = vcombine.low %v1256_v40, %v1260_v54 }
 0x2ee   :  { %4494 = vmatpush1.bf16.msra.mxu0 %v9458_v47  ;;  %v1124_v1 = vld [vmem:[#allocation7 + $0xb38] sm:$0xff] }
 0x2ef   :  { %4537 = vmatpush1.bf16.msra.mxu1 %v9586_v26  ;;  %4495 = vmatprep.subr.bf16.mxu0 %v9451_v50  ;;  %v1248_v7 = vld [vmem:[#allocation7 + $0xf18] sm:$0xff]  ;;  %v9547_v61 = vcombine.high %v1120_v62, %v1124_v1  ;;  %v9546_v50 = vcombine.low %v1120_v62, %v1124_v1 }
 0x2f0   :  { %4538 = vmatprep.subr.bf16.mxu1 %v9579_v19  ;;  %v1252_v9 = vld [vmem:[#allocation7 + $0xf38] sm:$0xff] }
 0x2f1   :  { %v9675_v49 = vcombine.high %v1248_v7, %v1252_v9  ;;  %v1112_v44 = vld [vmem:[#allocation7 + $0xad8] sm:$0xff]  ;;  %v9674_v19 = vcombine.low %v1248_v7, %v1252_v9 }
 0x2f2   :  { %4496 = vmatpush1.bf16.msra.mxu0 %v9450_v24  ;;  %v1116_v59 = vld [vmem:[#allocation7 + $0xaf8] sm:$0xff]  ;;  %v10917_v24 = vld [vmem:[#allocation8] sm:$0xff] }
 0x2f3   :  { %4539 = vmatpush1.bf16.msra.mxu1 %v9578_v27  ;;  %4497 = vmatprep.subr.bf16.mxu0 %v9571_v29  ;;  %v1240_v47 = vld [vmem:[#allocation7 + $0xed8] sm:$0xff]  ;;  %v9539_v20 = vcombine.high %v1112_v44, %v1116_v59  ;;  %v1286_v27 = vrot.slane %v10917_v24, %v10762_v14  ;;  %v1294_v33 = vrot.slane %v10917_v24, %v10768_v16 }
 0x2f4   :  { %4540 = vmatprep.subr.bf16.mxu1 %v9699_v32  ;;  %v1244_v26 = vld [vmem:[#allocation7 + $0xef8] sm:$0xff]  ;;  %v9538_v34 = vcombine.low %v1112_v44, %v1116_v59 }
 0x2f5   :  { %v9667_v21 = vcombine.high %v1240_v47, %v1244_v26  ;;  %v1104_v30 = vld [vmem:[#allocation7 + $0xa98] sm:$0xff]  ;;  %v3920_v36 = vadd.f32 %v10867_v10, %v1286_v27  ;;  %v9666_v46 = vcombine.low %v1240_v47, %v1244_v26  ;;  %v3916_v53 = vadd.f32 %v10858_v17, %v1286_v27 }
 0x2f6   :  { %4498 = vmatpush2.bf16.msra.mxu0 %v9570_v55  ;;  %v1108_v23 = vld [vmem:[#allocation7 + $0xab8] sm:$0xff] }
 0x2f7   :  { %4541 = vmatpush2.bf16.msra.mxu1 %v9698_v38  ;;  %4499 = vmatprep.subr.bf16.mxu0 %v9563_v39  ;;  %v1232_v29 = vld [vmem:[#allocation7 + $0xe98] sm:$0xff]  ;;  %v9531_v55 = vcombine.high %v1104_v30, %v1108_v23  ;;  %v4092_v38 = vadd.f32 %v10901_v0, %v1294_v33  ;;  %v3963_v10 = vadd.f32 %v10869_v35, %v3920_v36 }
 0x2f8   :  { %4542 = vmatprep.subr.bf16.mxu1 %v9691_v57  ;;  %v1236_v32 = vld [vmem:[#allocation7 + $0xeb8] sm:$0xff]  ;;  %v3959_v17 = vadd.f32 %v10863_v45, %v3916_v53  ;;  %v4647_v45 = vld [vmem:[#allocation10 + $0x1c0] sm:$0xff] }
 0x2f9   :  { %v9659_v39 = vcombine.high %v1232_v29, %v1236_v32  ;;  %v1096_v57 = vld [vmem:[#allocation7 + $0xa58] sm:$0xff]  ;;  %v4135_v0 = vadd.f32 %v10903_v51, %v4092_v38  ;;  %v4635_v53 = vld [vmem:[#allocation10 + $0x160] sm:$0xff] }
 0x2fa   :  { %4500 = vmatpush2.bf16.msra.mxu0 %v9562_v58  ;;  %v1100_v52 = vld [vmem:[#allocation7 + $0xa78] sm:$0xff]  ;;  %v4088_v58 = vadd.f32 %v10892_v22, %v1294_v33  ;;  %v4002_v44 = vadd.f32 %v10875_v63, %v3959_v17  ;;  %v4639_v33 = vld [vmem:[#allocation10 + $0x180] sm:$0xff] }
 0x2fb   :  { %4543 = vmatpush2.bf16.msra.mxu1 %v9690_v48  ;;  %4501 = vmatprep.subr.bf16.mxu0 %v9555_v5  ;;  %v1224_v40 = vld [vmem:[#allocation7 + $0xe58] sm:$0xff]  ;;  %v9530_v48 = vcombine.low %v1104_v30, %v1108_v23  ;;  %v4177_v5 = vpop.f32.mrf.mxu0  ;;  %v9523_v62 = vcombine.high %v1096_v57, %v1100_v52 }
 0x2fc   :  { %4544 = vmatprep.subr.bf16.mxu1 %v9683_v41  ;;  %v1228_v54 = vld [vmem:[#allocation7 + $0xe78] sm:$0xff]  ;;  %v9658_v41 = vcombine.low %v1232_v29, %v1236_v32  ;;  %v4178_v35 = vadd.f32 %v4177_v5, %v4135_v0  ;;  %v4045_v63 = vadd.f32 %v10878_v60, %v4002_v44  ;;  %v4623_v0 = vld [vmem:[#allocation10 + $0x100] sm:$0xff] }
 0x2fd   :  { %v9651_v1 = vcombine.high %v1224_v40, %v1228_v54  ;;  %v1088_v7 = vld [vmem:[#allocation7 + $0xa18] sm:$0xff]  ;;  %v9650_v51 = vcombine.low %v1224_v40, %v1228_v54  ;;  %v4759_v54 = vld [vmem:[#allocation10 + $0x540] sm:$0xff] }
 0x2fe   :  { %4502 = vmatpush2.bf16.msra.mxu0 %v9554_v11  ;;  %v1092_v9 = vld [vmem:[#allocation7 + $0xa38] sm:$0xff]  ;;  %v4006_v11 = vadd.f32 %v10885_v6, %v3963_v10  ;;  %v4568_v38 = vmax.f32 %v4045_v63, 0.0  ;;  %v4727_v63 = vld [vmem:[#allocation10 + $0x440] sm:$0xff] }
 0x2ff   :  { %4545 = vmatpush2.bf16.msra.mxu1 %v9682_v43  ;;  %4503 = vmatprep.subr.bf16.mxu0 %v9547_v61  ;;  %v1216_v22 = vld [vmem:[#allocation7 + $0xe18] sm:$0xff]  ;;  %v4131_v61 = vadd.f32 %v10897_v25, %v4088_v58  ;;  %v9515_v59 = vcombine.high %v1088_v7, %v1092_v9  ;;  %v4779_v25 = vld [vmem:[#allocation10 + $0x5e0] sm:$0xff]  ;;  %v9514_v30 = vcombine.low %v1088_v7, %v1092_v9 }
 0x300   :  { %4546 = vmatprep.subr.bf16.mxu1 %v9675_v49  ;;  %v1220_v43 = vld [vmem:[#allocation7 + $0xe38] sm:$0xff]  ;;  %v9522_v49 = vcombine.low %v1096_v57, %v1100_v52  ;;  %v4049_v6 = vadd.f32 %v10887_v8, %v4006_v11  ;;  %v4631_v52 = vld [vmem:[#allocation10 + $0x140] sm:$0xff] }
 0x301   :  { %v4174_v47 = vadd.f32 %v10909_v3, %v4131_v61  ;;  %v9643_v26 = vcombine.high %v1216_v22, %v1220_v43  ;;  %v9642_v23 = vcombine.low %v1216_v22, %v1220_v43  ;;  %v4763_v58 = vld [vmem:[#allocation10 + $0x560] sm:$0xff]  ;;  %v9740_v9 = vcombine.low %v4631_v52, %v4635_v53 }
 0x302   :  { %4504 = vmatpush2.bf16.msra.mxu0 %v9546_v50  ;;  %v4651_v50 = vld [vmem:[#allocation10 + $0x1e0] sm:$0xff]  ;;  %v4576_v32 = vmax.f32 %v4049_v6, 0.0 }
 0x303   :  { %4547 = vmatpush2.bf16.msra.mxu1 %v9674_v19  ;;  %4505 = vmatprep.subr.bf16.mxu0 %v9539_v20  ;;  %v4220_v19 = vpop.f32.mrf.mxu1  ;;  %v4775_v20 = vld [vmem:[#allocation10 + $0x5c0] sm:$0xff]  ;;  %v9757_v27 = vcombine.high %v4647_v45, %v4651_v50  ;;  %v4217_v3 = vadd.f32 %v10912_v56, %v4174_v47  ;;  %v9756_v36 = vcombine.low %v4647_v45, %v4651_v50 }
 0x304   :  { %4548 = vmatprep.subr.bf16.mxu1 %v9667_v21  ;;  %v4221_v21 = vadd.f32 %v4220_v19, %v4178_v35  ;;  %v9885_v29 = vcombine.high %v4775_v20, %v4779_v25  ;;  %v9884_v60 = vcombine.low %v4775_v20, %v4779_v25  ;;  %v10937_v56 = vpack.c.bf16 %v4576_v32, %v4568_v38  ;;  %v4755_v7 = vld [vmem:[#allocation10 + $0x520] sm:$0xff] }
 0x305   :  { %v4615_v22 = vld [vmem:[#allocation10 + $0xc0] sm:$0xff] }
 0x306   :  { %4506 = vmatpush2.bf16.msra.mxu0 %v9538_v34  ;;  %v4643_v34 = vld [vmem:[#allocation10 + $0x1a0] sm:$0xff]  ;;  %v4578_v8 = vmax.f32 %v4221_v21, 0.0 }
 0x307   :  { %4549 = vmatpush2.bf16.msra.mxu1 %v9666_v46  ;;  %4507 = vmatprep.subr.bf16.mxu0 %v9531_v55  ;;  %v4767_v46 = vld [vmem:[#allocation10 + $0x580] sm:$0xff]  ;;  %v9749_v57 = vcombine.high %v4639_v33, %v4643_v34  ;;  %v9748_v10 = vcombine.low %v4639_v33, %v4643_v34 }
 0x308   :  { %4550 = vmatprep.subr.bf16.mxu1 %v9659_v39  ;;  %v4771_v55 = vld [vmem:[#allocation10 + $0x5a0] sm:$0xff]  ;;  %v4570_v39 = vmax.f32 %v4217_v3, 0.0 }
 0x309   :  { %v9877_v40 = vcombine.high %v4767_v46, %v4771_v55  ;;  %v9876_v5 = vcombine.low %v4767_v46, %v4771_v55  ;;  %v4619_v43 = vld [vmem:[#allocation10 + $0xe0] sm:$0xff] }
 0x30a   :  { %4508 = vmatpush2.bf16.msra.mxu0 %v9530_v48  ;;  %v10940_v48 = vpack.c.bf16 %v4578_v8, %v4570_v39  ;;  %v4743_v61 = vld [vmem:[#allocation10 + $0x4c0] sm:$0xff]  ;;  %v9724_v6 = vcombine.low %v4615_v22, %v4619_v43 }
 0x30b   :  { %4551 = vmatpush2.bf16.msra.mxu1 %v9658_v41  ;;  %4509 = vmatprep.subr.bf16.mxu0 %v9523_v62  ;;  %v9741_v41 = vcombine.high %v4631_v52, %v4635_v53  ;;  %v9869_v62 = vcombine.high %v4759_v54, %v4763_v58  ;;  %v4747_v35 = vld [vmem:[#allocation10 + $0x4e0] sm:$0xff] }
 0x30c   :  { %4552 = vmatprep.subr.bf16.mxu1 %v9651_v1  ;;  %v4751_v1 = vld [vmem:[#allocation10 + $0x500] sm:$0xff]  ;;  %v9852_v19 = vcombine.low %v4743_v61, %v4747_v35 }
 0x30d   :  { %v9861_v11 = vcombine.high %v4751_v1, %v4755_v7  ;;  %v9860_v44 = vcombine.low %v4751_v1, %v4755_v7  ;;  %v4607_v47 = vld [vmem:[#allocation10 + $0x80] sm:$0xff] }
 0x30e   :  { %4510 = vmatpush2.bf16.msra.mxu0 %v9522_v49  ;;  %v4735_v45 = vld [vmem:[#allocation10 + $0x480] sm:$0xff] }
 0x30f   :  { %4553 = vmatpush2.bf16.msra.mxu1 %v9650_v51  ;;  %4511 = vmatprep.subr.bf16.mxu0 %v9515_v59  ;;  %v9725_v51 = vcombine.high %v4615_v22, %v4619_v43  ;;  %v9853_v59 = vcombine.high %v4743_v61, %v4747_v35  ;;  %v4739_v50 = vld [vmem:[#allocation10 + $0x4a0] sm:$0xff] }
 0x310   :  { %4554 = vmatprep.subr.bf16.mxu1 %v9643_v26  ;;  %v4611_v26 = vld [vmem:[#allocation10 + $0xa0] sm:$0xff]  ;;  %v9845_v25 = vcombine.high %v4735_v45, %v4739_v50  ;;  %v9844_v3 = vcombine.low %v4735_v45, %v4739_v50 }
 0x311   :  { %v9717_v20 = vcombine.high %v4607_v47, %v4611_v26  ;;  %v4599_v21 = vld [vmem:[#allocation10 + $0x40] sm:$0xff] }
 0x312   :  { %4512 = vmatpush2.bf16.msra.mxu0 %v9514_v30  ;;  %v4603_v30 = vld [vmem:[#allocation10 + $0x60] sm:$0xff] }
 0x313   :  { %4555 = vmatpush2.bf16.msra.mxu1 %v9642_v23  ;;  %7705 = vmatprep.subr.bf16.mxu0 %v9757_v27  ;;  %v4731_v23 = vld [vmem:[#allocation10 + $0x460] sm:$0xff]  ;;  %v9716_v27 = vcombine.low %v4607_v47, %v4611_v26  ;;  %v9708_v46 = vcombine.low %v4599_v21, %v4603_v30 }
 0x314   :  { %7748 = vmatprep.subr.bf16.mxu1 %v9885_v29  ;;  %v9709_v29 = vcombine.high %v4599_v21, %v4603_v30  ;;  %v9837_v32 = vcombine.high %v4727_v63, %v4731_v23  ;;  %v4591_v33 = vld [vmem:[#allocation10] sm:$0xff]  ;;  %v9836_v55 = vcombine.low %v4727_v63, %v4731_v23 }
 0x315   :  { %4514 = vmatmul.mubr.bf16.vlgmr.msra.gmra.mxu0 %v10839_v2  ;;  %v4627_v2 = vld [vmem:[#allocation10 + $0x120] sm:$0xff] }
 0x316   :  { %4557 = vmatmul.mubr.bf16.vlgmr.msra.gmra.mxu1 %v10841_v4  ;;  %7706 = vmatpush1.bf16.msra.mxu0 %v9756_v36  ;;  %v9868_v4 = vcombine.low %v4759_v54, %v4763_v58  ;;  %v9733_v17 = vcombine.high %v4623_v0, %v4627_v2  ;;  %v9732_v49 = vcombine.low %v4623_v0, %v4627_v2  ;;  %v4595_v34 = vld [vmem:[#allocation10 + $0x20] sm:$0xff] }
 0x317   :  { %7737 = vmatprep.mubr.bf16.mxu0 %v10937_v56  ;;  %7749 = vmatpush1.bf16.msra.mxu1 %v9884_v60  ;;  %v4719_v8 = vld [vmem:[#allocation10 + $0x400] sm:$0xff]  ;;  %v9701_v38 = vcombine.high %v4591_v33, %v4595_v34 }
 0x318   :  { %7780 = vmatprep.mubr.bf16.mxu1 %v10940_v48  ;;  %7707 = vmatprep.subr.bf16.mxu0 %v9749_v57  ;;  %v4723_v36 = vld [vmem:[#allocation10 + $0x420] sm:$0xff] }
 0x319   :  { %7750 = vmatprep.subr.bf16.mxu1 %v9877_v40  ;;  %v9829_v60 = vcombine.high %v4719_v8, %v4723_v36  ;;  %v4711_v39 = vld [vmem:[#allocation10 + $0x3c0] sm:$0xff]  ;;  %v9700_v40 = vcombine.low %v4591_v33, %v4595_v34  ;;  %v9828_v54 = vcombine.low %v4719_v8, %v4723_v36 }
 0x31a   :  { %7708 = vmatpush1.bf16.msra.mxu0 %v9748_v10  ;;  %v4715_v57 = vld [vmem:[#allocation10 + $0x3e0] sm:$0xff] }
 0x31b   :  { %7751 = vmatpush1.bf16.msra.mxu1 %v9876_v5  ;;  %7709 = vmatprep.subr.bf16.mxu0 %v9741_v41  ;;  %v4839_v52 = vld [vmem:[#allocation10 + $0x7c0] sm:$0xff]  ;;  %v9821_v58 = vcombine.high %v4711_v39, %v4715_v57  ;;  %v9820_v2 = vcombine.low %v4711_v39, %v4715_v57 }
 0x31c   :  { %7752 = vmatprep.subr.bf16.mxu1 %v9869_v62  ;;  %v4843_v53 = vld [vmem:[#allocation10 + $0x7e0] sm:$0xff] }
 0x31d   :  { %v9949_v10 = vcombine.high %v4839_v52, %v4843_v53  ;;  %v4703_v5 = vld [vmem:[#allocation10 + $0x380] sm:$0xff]  ;;  %v9948_v1 = vcombine.low %v4839_v52, %v4843_v53  ;;  %v10945_v52 = vpop.f32.mrf.mxu0 }
 0x31e   :  { %7710 = vmatpush1.bf16.msra.mxu0 %v9740_v9  ;;  %v4707_v41 = vld [vmem:[#allocation10 + $0x3a0] sm:$0xff] }
 0x31f   :  { %7753 = vmatpush1.bf16.msra.mxu1 %v9868_v4  ;;  %7711 = vmatprep.subr.bf16.mxu0 %v9733_v17  ;;  %v4831_v62 = vld [vmem:[#allocation10 + $0x780] sm:$0xff]  ;;  %v9813_v7 = vcombine.high %v4703_v5, %v4707_v41  ;;  %v9812_v43 = vcombine.low %v4703_v5, %v4707_v41 }
 0x320   :  { %7754 = vmatprep.subr.bf16.mxu1 %v9861_v11  ;;  %v4835_v0 = vld [vmem:[#allocation10 + $0x7a0] sm:$0xff] }
 0x321   :  { %v9941_v9 = vcombine.high %v4831_v62, %v4835_v0  ;;  %v4695_v4 = vld [vmem:[#allocation10 + $0x340] sm:$0xff]  ;;  %v9940_v61 = vcombine.low %v4831_v62, %v4835_v0 }
 0x322   :  { %7712 = vmatpush1.bf16.msra.mxu0 %v9732_v49  ;;  %v4699_v17 = vld [vmem:[#allocation10 + $0x360] sm:$0xff] }
 0x323   :  { %7755 = vmatpush1.bf16.msra.mxu1 %v9860_v44  ;;  %7713 = vmatprep.subr.bf16.mxu0 %v9725_v51  ;;  %v4823_v11 = vld [vmem:[#allocation10 + $0x740] sm:$0xff]  ;;  %v9805_v35 = vcombine.high %v4695_v4, %v4699_v17  ;;  %v9804_v26 = vcombine.low %v4695_v4, %v4699_v17 }
 0x324   :  { %7756 = vmatprep.subr.bf16.mxu1 %v9853_v59  ;;  %v4827_v22 = vld [vmem:[#allocation10 + $0x760] sm:$0xff] }
 0x325   :  { %v9933_v49 = vcombine.high %v4823_v11, %v4827_v22  ;;  %v4687_v44 = vld [vmem:[#allocation10 + $0x300] sm:$0xff]  ;;  %v9932_v45 = vcombine.low %v4823_v11, %v4827_v22 }
 0x326   :  { %7714 = vmatpush1.bf16.msra.mxu0 %v9724_v6  ;;  %v4691_v51 = vld [vmem:[#allocation10 + $0x320] sm:$0xff] }
 0x327   :  { %7757 = vmatpush1.bf16.msra.mxu1 %v9852_v19  ;;  %7715 = vmatprep.subr.bf16.mxu0 %v9717_v20  ;;  %v4815_v59 = vld [vmem:[#allocation10 + $0x700] sm:$0xff]  ;;  %v9797_v50 = vcombine.high %v4687_v44, %v4691_v51  ;;  %v9796_v30 = vcombine.low %v4687_v44, %v4691_v51 }
 0x328   :  { %7758 = vmatprep.subr.bf16.mxu1 %v9845_v25  ;;  %v4819_v47 = vld [vmem:[#allocation10 + $0x720] sm:$0xff] }
 0x329   :  { %v9925_v6 = vcombine.high %v4815_v59, %v4819_v47  ;;  %v4679_v19 = vld [vmem:[#allocation10 + $0x2c0] sm:$0xff]  ;;  %v9924_v63 = vcombine.low %v4815_v59, %v4819_v47 }
 0x32a   :  { %7716 = vmatpush1.bf16.msra.mxu0 %v9716_v27  ;;  %v4683_v20 = vld [vmem:[#allocation10 + $0x2e0] sm:$0xff] }
 0x32b   :  { %7759 = vmatpush1.bf16.msra.mxu1 %v9844_v3  ;;  %7717 = vmatprep.subr.bf16.mxu0 %v9709_v29  ;;  %v4807_v25 = vld [vmem:[#allocation10 + $0x6c0] sm:$0xff]  ;;  %v9789_v23 = vcombine.high %v4679_v19, %v4683_v20  ;;  %v9788_v34 = vcombine.low %v4679_v19, %v4683_v20 }
 0x32c   :  { %7760 = vmatprep.subr.bf16.mxu1 %v9837_v32  ;;  %v4811_v21 = vld [vmem:[#allocation10 + $0x6e0] sm:$0xff] }
 0x32d   :  { %v9917_v27 = vcombine.high %v4807_v25, %v4811_v21  ;;  %v4671_v3 = vld [vmem:[#allocation10 + $0x280] sm:$0xff]  ;;  %v9916_v8 = vcombine.low %v4807_v25, %v4811_v21 }
 0x32e   :  { %7718 = vmatpush1.bf16.msra.mxu0 %v9708_v46  ;;  %v4675_v29 = vld [vmem:[#allocation10 + $0x2a0] sm:$0xff] }
 0x32f   :  { %7761 = vmatpush1.bf16.msra.mxu1 %v9836_v55  ;;  %7719 = vmatprep.subr.bf16.mxu0 %v9701_v38  ;;  %v4799_v32 = vld [vmem:[#allocation10 + $0x680] sm:$0xff]  ;;  %v9781_v36 = vcombine.high %v4671_v3, %v4675_v29  ;;  %v9780_v57 = vcombine.low %v4671_v3, %v4675_v29 }
 0x330   :  { %7762 = vmatprep.subr.bf16.mxu1 %v9829_v60  ;;  %v4803_v33 = vld [vmem:[#allocation10 + $0x6a0] sm:$0xff] }
 0x331   :  { %v9909_v46 = vcombine.high %v4799_v32, %v4803_v33  ;;  %v4663_v55 = vld [vmem:[#allocation10 + $0x240] sm:$0xff]  ;;  %v9908_v53 = vcombine.low %v4799_v32, %v4803_v33 }
 0x332   :  { %7720 = vmatpush1.bf16.msra.mxu0 %v9700_v40  ;;  %v4667_v38 = vld [vmem:[#allocation10 + $0x260] sm:$0xff] }
 0x333   :  { %7763 = vmatpush1.bf16.msra.mxu1 %v9828_v54  ;;  %7721 = vmatprep.subr.bf16.mxu0 %v9821_v58  ;;  %v4791_v60 = vld [vmem:[#allocation10 + $0x640] sm:$0xff]  ;;  %v9773_v40 = vcombine.high %v4663_v55, %v4667_v38  ;;  %v10947_v54 = vpop.f32.mrf.mxu1  ;;  %v9772_v0 = vcombine.low %v4663_v55, %v4667_v38 }
 0x334   :  { %7764 = vmatprep.subr.bf16.mxu1 %v9949_v10  ;;  %v4795_v39 = vld [vmem:[#allocation10 + $0x660] sm:$0xff] }
 0x335   :  { %v9901_v58 = vcombine.high %v4791_v60, %v4795_v39  ;;  %v4655_v10 = vld [vmem:[#allocation10 + $0x200] sm:$0xff] }
 0x336   :  { %7722 = vmatpush2.bf16.msra.mxu0 %v9820_v2  ;;  %v4659_v5 = vld [vmem:[#allocation10 + $0x220] sm:$0xff]  ;;  %v4259_v2 = vpop.f32.mrf.mxu0 }
 0x337   :  { %7765 = vmatpush2.bf16.msra.mxu1 %v9948_v1  ;;  %7723 = vmatprep.subr.bf16.mxu0 %v9813_v7  ;;  %v4783_v41 = vld [vmem:[#allocation10 + $0x600] sm:$0xff]  ;;  %v9900_v1 = vcombine.low %v4791_v60, %v4795_v39  ;;  %v9765_v7 = vcombine.high %v4655_v10, %v4659_v5 }
 0x338   :  { %7766 = vmatprep.subr.bf16.mxu1 %v9941_v9  ;;  %v4787_v62 = vld [vmem:[#allocation10 + $0x620] sm:$0xff]  ;;  %v4302_v9 = vpop.f32.mrf.mxu1 }
 0x339   :  { %v9893_v4 = vcombine.high %v4783_v41, %v4787_v62  ;;  %v4903_v17 = vld [vmem:[#allocation10 + $0x9c0] sm:$0xff]  ;;  %v9892_v44 = vcombine.low %v4783_v41, %v4787_v62 }
 0x33a   :  { %7724 = vmatpush2.bf16.msra.mxu0 %v9812_v43  ;;  %v4907_v11 = vld [vmem:[#allocation10 + $0x9e0] sm:$0xff]  ;;  %v10953_v59 = vpop.f32.mrf.mxu1 }
 0x33b   :  { %7767 = vmatpush2.bf16.msra.mxu1 %v9940_v61  ;;  %7725 = vmatprep.subr.bf16.mxu0 %v9805_v35  ;;  %v5031_v22 = vld [vmem:[#allocation10 + $0xdc0] sm:$0xff]  ;;  %v1302_v61 = vrot.slane %v10917_v24, %v10802_v28  ;;  %v9764_v35 = vcombine.low %v4655_v10, %v4659_v5  ;;  %v10013_v51 = vcombine.high %v4903_v17, %v4907_v11 }
 0x33c   :  { %7768 = vmatprep.subr.bf16.mxu1 %v9933_v49  ;;  %v5035_v43 = vld [vmem:[#allocation10 + $0xde0] sm:$0xff]  ;;  %v10951_v49 = vpop.f32.mrf.mxu0  ;;  %v10012_v20 = vcombine.low %v4903_v17, %v4907_v11 }
 0x33d   :  { %v4895_v47 = vld [vmem:[#allocation10 + $0x980] sm:$0xff]  ;;  %v4260_v19 = vadd.f32 %v4259_v2, %v1302_v61 }
 0x33e   :  { %7726 = vmatpush2.bf16.msra.mxu0 %v9804_v26  ;;  %v4899_v26 = vld [vmem:[#allocation10 + $0x9a0] sm:$0xff]  ;;  %v4263_v25 = vpop.f32.mrf.mxu0 }
 0x33f   :  { %7769 = vmatpush2.bf16.msra.mxu1 %v9932_v45  ;;  %7727 = vmatprep.subr.bf16.mxu0 %v9797_v50  ;;  %v10141_v45 = vcombine.high %v5031_v22, %v5035_v43  ;;  %v5023_v50 = vld [vmem:[#allocation10 + $0xd80] sm:$0xff]  ;;  %v10005_v21 = vcombine.high %v4895_v47, %v4899_v26 }
 0x340   :  { %7770 = vmatprep.subr.bf16.mxu1 %v9925_v6  ;;  %v5027_v6 = vld [vmem:[#allocation10 + $0xda0] sm:$0xff] }
 0x341   :  { %v10133_v3 = vcombine.high %v5023_v50, %v5027_v6  ;;  %v5015_v32 = vld [vmem:[#allocation10 + $0xd40] sm:$0xff]  ;;  %v10132_v60 = vcombine.low %v5023_v50, %v5027_v6 }
 0x342   :  { %7728 = vmatpush2.bf16.msra.mxu0 %v9796_v30  ;;  %v10140_v30 = vcombine.low %v5031_v22, %v5035_v43  ;;  %v5019_v33 = vld [vmem:[#allocation10 + $0xd60] sm:$0xff] }
 0x343   :  { %7771 = vmatpush2.bf16.msra.mxu1 %v9924_v63  ;;  %7729 = vmatprep.subr.bf16.mxu0 %v9789_v23  ;;  %v4306_v63 = vpop.f32.mrf.mxu1  ;;  %v4887_v23 = vld [vmem:[#allocation10 + $0x940] sm:$0xff] }
 0x344   :  { %7772 = vmatprep.subr.bf16.mxu1 %v9917_v27  ;;  %v4891_v27 = vld [vmem:[#allocation10 + $0x960] sm:$0xff] }
 0x345   :  { %v9997_v38 = vcombine.high %v4887_v23, %v4891_v27  ;;  %v5007_v5 = vld [vmem:[#allocation10 + $0xd00] sm:$0xff]  ;;  %v9996_v2 = vcombine.low %v4887_v23, %v4891_v27 }
 0x346   :  { %7730 = vmatpush2.bf16.msra.mxu0 %v9788_v34  ;;  %v4303_v34 = vadd.f32 %v4302_v9, %v4260_v19  ;;  %v5011_v41 = vld [vmem:[#allocation10 + $0xd20] sm:$0xff]  ;;  %v10124_v9 = vcombine.low %v5015_v32, %v5019_v33 }
 0x347   :  { %7773 = vmatpush2.bf16.msra.mxu1 %v9916_v8  ;;  %7731 = vmatprep.subr.bf16.mxu0 %v9781_v36  ;;  %v4264_v8 = vadd.f32 %v4263_v25, %v1302_v61  ;;  %v4871_v11 = vld [vmem:[#allocation10 + $0x8c0] sm:$0xff]  ;;  %v10117_v43 = vcombine.high %v5007_v5, %v5011_v41 }
 0x348   :  { %7774 = vmatprep.subr.bf16.mxu1 %v9909_v46  ;;  %v10004_v46 = vcombine.low %v4895_v47, %v4899_v26  ;;  %v4875_v22 = vld [vmem:[#allocation10 + $0x8e0] sm:$0xff] }
 0x349   :  { %v4307_v62 = vadd.f32 %v4306_v63, %v4264_v8  ;;  %v9981_v26 = vcombine.high %v4871_v11, %v4875_v22  ;;  %v4863_v19 = vld [vmem:[#allocation10 + $0x880] sm:$0xff]  ;;  %v9980_v23 = vcombine.low %v4871_v11, %v4875_v22 }
 0x34a   :  { %7732 = vmatpush2.bf16.msra.mxu0 %v9780_v57  ;;  %v4859_v8 = vld [vmem:[#allocation10 + $0x860] sm:$0xff] }
 0x34b   :  { %7775 = vmatpush2.bf16.msra.mxu1 %v9908_v53  ;;  %7733 = vmatprep.subr.bf16.mxu0 %v9773_v40  ;;  %v4879_v53 = vld [vmem:[#allocation10 + $0x900] sm:$0xff] }
 0x34c   :  { %7776 = vmatprep.subr.bf16.mxu1 %v9901_v58  ;;  %v4883_v40 = vld [vmem:[#allocation10 + $0x920] sm:$0xff]  ;;  %v10125_v58 = vcombine.high %v5015_v32, %v5019_v33  ;;  %v10967_v32 = vld [vmem:[#allocation10 + $0x5c8] sm:$0xff] }
 0x34d   :  { %v9988_v47 = vcombine.low %v4879_v53, %v4883_v40  ;;  %v10969_v33 = vld [vmem:[#allocation10 + $0x5e8] sm:$0xff]  ;;  %v5095_v11 = vld [vmem:[#allocation10 + $0xfc0] sm:$0xff] }
 0x34e   :  { %7734 = vmatpush2.bf16.msra.mxu0 %v9772_v0  ;;  %v5099_v22 = vld [vmem:[#allocation10 + $0xfe0] sm:$0xff] }
 0x34f   :  { %7777 = vmatpush2.bf16.msra.mxu1 %v9900_v1  ;;  %7735 = vmatprep.subr.bf16.mxu0 %v9765_v7  ;;  %v9989_v7 = vcombine.high %v4879_v53, %v4883_v40  ;;  %v4847_v40 = vld [vmem:[#allocation10 + $0x800] sm:$0xff] }
 0x350   :  { %7778 = vmatprep.subr.bf16.mxu1 %v9893_v4 }
 0x352   :  { %7736 = vmatpush2.bf16.msra.mxu0 %v9764_v35  ;;  %v4999_v35 = vld [vmem:[#allocation10 + $0xcc0] sm:$0xff] }
 0x353   :  { %7779 = vmatpush2.bf16.msra.mxu1 %v9892_v44  ;;  %7791 = vmatprep.subr.bf16.mxu0 %v10013_v51  ;;  %v5003_v44 = vld [vmem:[#allocation10 + $0xce0] sm:$0xff] }
 0x354   :  { %7834 = vmatprep.subr.bf16.mxu1 %v10141_v45  ;;  %v10116_v45 = vcombine.low %v5007_v5, %v5011_v41  ;;  %v10109_v25 = vcombine.high %v4999_v35, %v5003_v44  ;;  %v4975_v41 = vld [vmem:[#allocation10 + $0xc00] sm:$0xff] }
 0x355   :  { %v10955_v29 = vpop.f32.mrf.mxu0  ;;  %7738 = vmatmul.mubr.bf16.vlgmr.msra.gmra.mxu0 %v10881_v13 }
 0x356   :  { %v10958_v36 = vpop.f32.mrf.mxu1  ;;  %7781 = vmatmul.mubr.bf16.vlgmr.msra.gmra.mxu1 %v10915_v37  ;;  %7792 = vmatpush1.bf16.msra.mxu0 %v10012_v20  ;;  %v4867_v20 = vld [vmem:[#allocation10 + $0x8a0] sm:$0xff] }
 0x357   :  { %v4345_v55 = vpop.f32.mrf.mxu0  ;;  %7793 = vmatprep.subr.bf16.mxu0 %v10005_v21  ;;  %7835 = vmatpush1.bf16.msra.mxu1 %v10140_v30  ;;  %v4991_v21 = vld [vmem:[#allocation10 + $0xc80] sm:$0xff]  ;;  %v9973_v27 = vcombine.high %v4863_v19, %v4867_v20 }
 0x358   :  { %v4346_v39 = vadd.f32 %v4345_v55, %v4303_v34  ;;  %v4388_v57 = vpop.f32.mrf.mxu1  ;;  %7836 = vmatprep.subr.bf16.mxu1 %v10133_v3  ;;  %v4995_v30 = vld [vmem:[#allocation10 + $0xca0] sm:$0xff]  ;;  %v10108_v3 = vcombine.low %v4999_v35, %v5003_v44  ;;  %v9886_v55 = vcombine.low %v10967_v32, %v10969_v33 }
 0x359   :  { %v10961_v10 = vpop.f32.mrf.mxu0  ;;  %v4855_v34 = vld [vmem:[#allocation10 + $0x840] sm:$0xff]  ;;  %v10100_v53 = vcombine.low %v4991_v21, %v4995_v30 }
 0x35a   :  { %v10963_v0 = vpop.f32.mrf.mxu1  ;;  %7794 = vmatpush1.bf16.msra.mxu0 %v10004_v46  ;;  %v4389_v4 = vadd.f32 %v4388_v57, %v4346_v39  ;;  %v10101_v46 = vcombine.high %v4991_v21, %v4995_v30  ;;  %v9972_v39 = vcombine.low %v4863_v19, %v4867_v20  ;;  %v9965_v57 = vcombine.high %v4855_v34, %v4859_v8  ;;  %v4959_v44 = vld [vmem:[#allocation10 + $0xb80] sm:$0xff] }
 0x35b   :  { %v4349_v1 = vpop.f32.mrf.mxu0  ;;  %7795 = vmatprep.subr.bf16.mxu0 %v9997_v38  ;;  %7837 = vmatpush1.bf16.msra.mxu1 %v10132_v60  ;;  %v4983_v38 = vld [vmem:[#allocation10 + $0xc40] sm:$0xff]  ;;  %v10204_v19 = vcombine.low %v5095_v11, %v5099_v22 }
 0x35c   :  { %v4350_v17 = vadd.f32 %v4349_v1, %v4307_v62  ;;  %7838 = vmatprep.subr.bf16.mxu1 %v10125_v58  ;;  %v4392_v61 = vpop.f32.mrf.mxu1  ;;  %v4572_v50 = vmax.f32 %v4389_v4, 0.0  ;;  %v4987_v60 = vld [vmem:[#allocation10 + $0xc60] sm:$0xff] }
 0x35d   :  { %v4851_v58 = vld [vmem:[#allocation10 + $0x820] sm:$0xff]  ;;  %v10093_v5 = vcombine.high %v4983_v38, %v4987_v60 }
 0x35e   :  { %v4393_v51 = vadd.f32 %v4392_v61, %v4350_v17  ;;  %7796 = vmatpush1.bf16.msra.mxu0 %v9996_v2  ;;  %v4979_v62 = vld [vmem:[#allocation10 + $0xc20] sm:$0xff]  ;;  %v9964_v2 = vcombine.low %v4855_v34, %v4859_v8  ;;  %v9957_v1 = vcombine.high %v4847_v40, %v4851_v58 }
 0x35f   :  { %7797 = vmatprep.subr.bf16.mxu0 %v9989_v7  ;;  %7839 = vmatpush1.bf16.msra.mxu1 %v10124_v9  ;;  %v10092_v7 = vcombine.low %v4983_v38, %v4987_v60  ;;  %v4967_v9 = vld [vmem:[#allocation10 + $0xbc0] sm:$0xff]  ;;  %v10085_v17 = vcombine.high %v4975_v41, %v4979_v62  ;;  %v10084_v35 = vcombine.low %v4975_v41, %v4979_v62 }
 0x360   :  { %v4580_v6 = vmax.f32 %v4393_v51, 0.0  ;;  %7840 = vmatprep.subr.bf16.mxu1 %v10117_v43  ;;  %v4971_v4 = vld [vmem:[#allocation10 + $0xbe0] sm:$0xff]  ;;  %v9956_v43 = vcombine.low %v4847_v40, %v4851_v58 }
 0x361   :  { %v10077_v61 = vcombine.high %v4967_v9, %v4971_v4  ;;  %v4963_v51 = vld [vmem:[#allocation10 + $0xba0] sm:$0xff] }
 0x362   :  { %v10965_v63 = vpack.c.bf16 %v4580_v6, %v4572_v50  ;;  %7798 = vmatpush1.bf16.msra.mxu0 %v9988_v47  ;;  %v10205_v47 = vcombine.high %v5095_v11, %v5099_v22  ;;  %v10076_v50 = vcombine.low %v4967_v9, %v4971_v4  ;;  %v10069_v6 = vcombine.high %v4959_v44, %v4963_v51  ;;  %v4951_v20 = vld [vmem:[#allocation10 + $0xb40] sm:$0xff] }
 0x363   :  { %7799 = vmatprep.subr.bf16.mxu0 %v9981_v26  ;;  %7841 = vmatpush1.bf16.msra.mxu1 %v10116_v45  ;;  %v5087_v26 = vld [vmem:[#allocation10 + $0xf80] sm:$0xff] }
 0x364   :  { %7823 = vmatprep.mubr.bf16.mxu0 %v10965_v63  ;;  %7842 = vmatprep.subr.bf16.mxu1 %v10109_v25  ;;  %v5091_v45 = vld [vmem:[#allocation10 + $0xfa0] sm:$0xff] }
 0x365   :  { %v4955_v25 = vld [vmem:[#allocation10 + $0xb60] sm:$0xff]  ;;  %v10197_v21 = vcombine.high %v5087_v26, %v5091_v45  ;;  %v10196_v34 = vcombine.low %v5087_v26, %v5091_v45 }
 0x366   :  { %7800 = vmatpush1.bf16.msra.mxu0 %v9980_v23  ;;  %v5079_v30 = vld [vmem:[#allocation10 + $0xf40] sm:$0xff] }
 0x367   :  { %7801 = vmatprep.subr.bf16.mxu0 %v9973_v27  ;;  %7843 = vmatpush1.bf16.msra.mxu1 %v10108_v3  ;;  %v5083_v23 = vld [vmem:[#allocation10 + $0xf60] sm:$0xff]  ;;  %v10068_v27 = vcombine.low %v4959_v44, %v4963_v51  ;;  %v10061_v3 = vcombine.high %v4951_v20, %v4955_v25 }
 0x368   :  { %7844 = vmatprep.subr.bf16.mxu1 %v10101_v46  ;;  %v4943_v8 = vld [vmem:[#allocation10 + $0xb00] sm:$0xff]  ;;  %v10189_v38 = vcombine.high %v5079_v30, %v5083_v23  ;;  %v10188_v40 = vcombine.low %v5079_v30, %v5083_v23 }
 0x369   :  { %v4947_v46 = vld [vmem:[#allocation10 + $0xb20] sm:$0xff] }
 0x36a   :  { %7802 = vmatpush1.bf16.msra.mxu0 %v9972_v39  ;;  %v5071_v60 = vld [vmem:[#allocation10 + $0xf00] sm:$0xff] }
 0x36b   :  { %7803 = vmatprep.subr.bf16.mxu0 %v9965_v57  ;;  %7845 = vmatpush1.bf16.msra.mxu1 %v10100_v53  ;;  %v5075_v39 = vld [vmem:[#allocation10 + $0xf20] sm:$0xff]  ;;  %v10060_v57 = vcombine.low %v4951_v20, %v4955_v25  ;;  %v10053_v53 = vcombine.high %v4943_v8, %v4947_v46 }
 0x36c   :  { %7846 = vmatprep.subr.bf16.mxu1 %v10093_v5  ;;  %v4935_v58 = vld [vmem:[#allocation10 + $0xac0] sm:$0xff]  ;;  %v10181_v41 = vcombine.high %v5071_v60, %v5075_v39  ;;  %v10180_v4 = vcombine.low %v5071_v60, %v5075_v39  ;;  %v4652_v39 = vld [vmem:[#allocation10 + $0x1e8] sm:$0xff] }
 0x36d   :  { %v4939_v5 = vld [vmem:[#allocation10 + $0xae0] sm:$0xff] }
 0x36e   :  { %7804 = vmatpush1.bf16.msra.mxu0 %v9964_v2  ;;  %v5063_v62 = vld [vmem:[#allocation10 + $0xec0] sm:$0xff]  ;;  %v10045_v9 = vcombine.high %v4935_v58, %v4939_v5  ;;  %v10044_v44 = vcombine.low %v4935_v58, %v4939_v5 }
 0x36f   :  { %7805 = vmatprep.subr.bf16.mxu0 %v9957_v1  ;;  %7847 = vmatpush1.bf16.msra.mxu1 %v10092_v7  ;;  %v5067_v2 = vld [vmem:[#allocation10 + $0xee0] sm:$0xff]  ;;  %v10052_v1 = vcombine.low %v4943_v8, %v4947_v46  ;;  %v1298_v7 = vrot.slane %v10917_v24, %v10826_v42 }
 0x370   :  { %7848 = vmatprep.subr.bf16.mxu1 %v10085_v17  ;;  %v4927_v17 = vld [vmem:[#allocation10 + $0xa80] sm:$0xff]  ;;  %v10173_v22 = vcombine.high %v5063_v62, %v5067_v2  ;;  %v10172_v45 = vcombine.low %v5063_v62, %v5067_v2  ;;  %v4644_v62 = vld [vmem:[#allocation10 + $0x1a8] sm:$0xff] }
 0x371   :  { %v4931_v11 = vld [vmem:[#allocation10 + $0xaa0] sm:$0xff]  ;;  %v4258_v51 = vadd.f32 %v10945_v52, %v1298_v7 }
 0x372   :  { %7806 = vmatpush1.bf16.msra.mxu0 %v9956_v43  ;;  %v4262_v43 = vadd.f32 %v10951_v49, %v1298_v7  ;;  %v4919_v26 = vld [vmem:[#allocation10 + $0xa40] sm:$0xff]  ;;  %v10036_v49 = vcombine.low %v4927_v17, %v4931_v11 }
 0x373   :  { %7807 = vmatprep.subr.bf16.mxu0 %v10077_v61  ;;  %7849 = vmatpush1.bf16.msra.mxu1 %v10084_v35  ;;  %v5055_v61 = vld [vmem:[#allocation10 + $0xe80] sm:$0xff] }
 0x374   :  { %7850 = vmatprep.subr.bf16.mxu1 %v10205_v47  ;;  %v5059_v35 = vld [vmem:[#allocation10 + $0xea0] sm:$0xff]  ;;  %v10037_v47 = vcombine.high %v4927_v17, %v4931_v11 }
 0x375   :  { %v4923_v24 = vld [vmem:[#allocation10 + $0xa60] sm:$0xff]  ;;  %v10164_v52 = vcombine.low %v5055_v61, %v5059_v35 }
 0x376   :  { %7808 = vmatpush2.bf16.msra.mxu0 %v10076_v50  ;;  %v10165_v50 = vcombine.high %v5055_v61, %v5059_v35  ;;  %v5051_v20 = vld [vmem:[#allocation10 + $0xe60] sm:$0xff]  ;;  %v10029_v25 = vcombine.high %v4919_v26, %v4923_v24  ;;  %v10028_v46 = vcombine.low %v4919_v26, %v4923_v24  ;;  %v4608_v24 = vld [vmem:[#allocation10 + $0x88] sm:$0xff] }
 0x377   :  { %7809 = vmatprep.subr.bf16.mxu0 %v10069_v6  ;;  %7851 = vmatpush2.bf16.msra.mxu1 %v10204_v19  ;;  %v4305_v6 = vadd.f32 %v10953_v59, %v4262_v43  ;;  %v5047_v19 = vld [vmem:[#allocation10 + $0xe40] sm:$0xff]  ;;  %v4628_v43 = vld [vmem:[#allocation10 + $0x128] sm:$0xff] }
 0x378   :  { %7852 = vmatprep.subr.bf16.mxu1 %v10197_v21  ;;  %v4301_v21 = vadd.f32 %v10947_v54, %v4258_v51  ;;  %v4911_v23 = vld [vmem:[#allocation10 + $0xa00] sm:$0xff]  ;;  %v10156_v54 = vcombine.low %v5047_v19, %v5051_v20  ;;  %v4620_v51 = vld [vmem:[#allocation10 + $0xe8] sm:$0xff] }
 0x379   :  { %v4348_v30 = vadd.f32 %v10961_v10, %v4305_v6  ;;  %v5039_v8 = vld [vmem:[#allocation10 + $0xe00] sm:$0xff]  ;;  %v4648_v10 = vld [vmem:[#allocation10 + $0x1c8] sm:$0xff] }
 0x37a   :  { %7810 = vmatpush2.bf16.msra.mxu0 %v10068_v27  ;;  %v4915_v27 = vld [vmem:[#allocation10 + $0xa20] sm:$0xff] }
 0x37b   :  { %7811 = vmatprep.subr.bf16.mxu0 %v10061_v3  ;;  %7853 = vmatpush2.bf16.msra.mxu1 %v10196_v34  ;;  %v10157_v3 = vcombine.high %v5047_v19, %v5051_v20  ;;  %v4344_v34 = vadd.f32 %v10955_v29, %v4301_v21  ;;  %v5043_v59 = vld [vmem:[#allocation10 + $0xe20] sm:$0xff]  ;;  %v10021_v60 = vcombine.high %v4911_v23, %v4915_v27  ;;  %v4600_v19 = vld [vmem:[#allocation10 + $0x48] sm:$0xff] }
 0x37c   :  { %7854 = vmatprep.subr.bf16.mxu1 %v10189_v38  ;;  %v4391_v38 = vadd.f32 %v10963_v0, %v4348_v30  ;;  %v9759_v29 = vcombine.high %v4648_v10, %v4652_v39  ;;  %v10148_v5 = vcombine.low %v5039_v8, %v5043_v59  ;;  %v9887_v0 = vcombine.high %v10967_v32, %v10969_v33  ;;  %v4604_v20 = vld [vmem:[#allocation10 + $0x68] sm:$0xff] }
 0x37d   :  { %v4592_v21 = vld [vmem:[#allocation10 + $0x8] sm:$0xff] }
 0x37e   :  { %7812 = vmatpush2.bf16.msra.mxu0 %v10060_v57  ;;  %v10149_v57 = vcombine.high %v5039_v8, %v5043_v59  ;;  %v4579_v58 = vmax.f32 %v4391_v38, 0.0  ;;  %v4596_v30 = vld [vmem:[#allocation10 + $0x28] sm:$0xff] }
 0x37f   :  { %7813 = vmatprep.subr.bf16.mxu0 %v10053_v53  ;;  %7855 = vmatpush2.bf16.msra.mxu1 %v10188_v40  ;;  %v4387_v53 = vadd.f32 %v10958_v36, %v4344_v34  ;;  %v10020_v40 = vcombine.low %v4911_v23, %v4915_v27  ;;  %v9703_v23 = vcombine.high %v4592_v21, %v4596_v30  ;;  %v4712_v27 = vld [vmem:[#allocation10 + $0x3c8] sm:$0xff] }
 0x380   :  { %7856 = vmatprep.subr.bf16.mxu1 %v10181_v41  ;;  %v4640_v41 = vld [vmem:[#allocation10 + $0x188] sm:$0xff]  ;;  %v9702_v34 = vcombine.low %v4592_v21, %v4596_v30 }
 0x381   :  { %v4571_v2 = vmax.f32 %v4387_v53, 0.0  ;;  %v9751_v36 = vcombine.high %v4640_v41, %v4644_v62  ;;  %v9750_v17 = vcombine.low %v4640_v41, %v4644_v62  ;;  %v4704_v59 = vld [vmem:[#allocation10 + $0x388] sm:$0xff] }
 0x382   :  { %7814 = vmatpush2.bf16.msra.mxu0 %v10052_v1  ;;  %v9758_v1 = vcombine.low %v4648_v10, %v4652_v39  ;;  %v4700_v10 = vld [vmem:[#allocation10 + $0x368] sm:$0xff] }
 0x383   :  { %7815 = vmatprep.subr.bf16.mxu0 %v10045_v9  ;;  %7857 = vmatpush2.bf16.msra.mxu1 %v10180_v4  ;;  %v10986_v7 = vpack.c.bf16 %v4579_v58, %v4571_v2  ;;  %v4632_v9 = vld [vmem:[#allocation10 + $0x148] sm:$0xff] }
 0x384   :  { %7858 = vmatprep.subr.bf16.mxu1 %v10173_v22  ;;  %v4636_v4 = vld [vmem:[#allocation10 + $0x168] sm:$0xff] }
 0x385   :  { %v9743_v11 = vcombine.high %v4632_v9, %v4636_v4  ;;  %v4624_v22 = vld [vmem:[#allocation10 + $0x108] sm:$0xff]  ;;  %v9742_v61 = vcombine.low %v4632_v9, %v4636_v4 }
 0x386   :  { %7816 = vmatpush2.bf16.msra.mxu0 %v10044_v44  ;;  %v9735_v35 = vcombine.high %v4624_v22, %v4628_v43  ;;  %v4616_v44 = vld [vmem:[#allocation10 + $0xc8] sm:$0xff] }
 0x387   :  { %7817 = vmatprep.subr.bf16.mxu0 %v10037_v47  ;;  %7859 = vmatpush2.bf16.msra.mxu1 %v10172_v45  ;;  %v9734_v47 = vcombine.low %v4624_v22, %v4628_v43  ;;  %v9727_v26 = vcombine.high %v4616_v44, %v4620_v51  ;;  %v4612_v45 = vld [vmem:[#allocation10 + $0xa8] sm:$0xff] }
 0x388   :  { %7860 = vmatprep.subr.bf16.mxu1 %v10165_v50  ;;  %v9726_v50 = vcombine.low %v4616_v44, %v4620_v51  ;;  %v9719_v6 = vcombine.high %v4608_v24, %v4612_v45  ;;  %v4688_v53 = vld [vmem:[#allocation10 + $0x308] sm:$0xff] }
 0x389   :  { %v4684_v41 = vld [vmem:[#allocation10 + $0x2e8] sm:$0xff] }
 0x38a   :  { %7818 = vmatpush2.bf16.msra.mxu0 %v10036_v49  ;;  %v9718_v49 = vcombine.low %v4608_v24, %v4612_v45  ;;  %v4672_v2 = vld [vmem:[#allocation10 + $0x288] sm:$0xff] }
 0x38b   :  { %7819 = vmatprep.subr.bf16.mxu0 %v10029_v25  ;;  %7861 = vmatpush2.bf16.msra.mxu1 %v10164_v52  ;;  %v9711_v25 = vcombine.high %v4600_v19, %v4604_v20  ;;  %v9710_v52 = vcombine.low %v4600_v19, %v4604_v20  ;;  %v4664_v4 = vld [vmem:[#allocation10 + $0x248] sm:$0xff] }
 0x38c   :  { %7862 = vmatprep.subr.bf16.mxu1 %v10157_v3  ;;  %v4716_v3 = vld [vmem:[#allocation10 + $0x3e8] sm:$0xff] }
 0x38d   :  { %v9823_v8 = vcombine.high %v4712_v27, %v4716_v3  ;;  %v9822_v38 = vcombine.low %v4712_v27, %v4716_v3  ;;  %v4660_v44 = vld [vmem:[#allocation10 + $0x228] sm:$0xff] }
 0x38e   :  { %7820 = vmatpush2.bf16.msra.mxu0 %v10028_v46  ;;  %v4708_v46 = vld [vmem:[#allocation10 + $0x3a8] sm:$0xff] }
 0x38f   :  { %7821 = vmatprep.subr.bf16.mxu0 %v10021_v60  ;;  %7863 = vmatpush2.bf16.msra.mxu1 %v10156_v54  ;;  %v9815_v60 = vcombine.high %v4704_v59, %v4708_v46  ;;  %v4696_v54 = vld [vmem:[#allocation10 + $0x348] sm:$0xff]  ;;  %v9814_v39 = vcombine.low %v4704_v59, %v4708_v46 }
 0x390   :  { %7864 = vmatprep.subr.bf16.mxu1 %v10149_v57  ;;  %v9807_v57 = vcombine.high %v4696_v54, %v4700_v10  ;;  %v9806_v58 = vcombine.low %v4696_v54, %v4700_v10  ;;  %v4904_v45 = vld [vmem:[#allocation10 + $0x9c8] sm:$0xff] }
 0x391   :  { %v4892_v54 = vld [vmem:[#allocation10 + $0x968] sm:$0xff] }
 0x392   :  { %7822 = vmatpush2.bf16.msra.mxu0 %v10020_v40  ;;  %v4692_v40 = vld [vmem:[#allocation10 + $0x328] sm:$0xff] }
 0x393   :  { %7877 = vmatprep.subr.bf16.mxu0 %v9759_v29  ;;  %7865 = vmatpush2.bf16.msra.mxu1 %v10148_v5  ;;  %v9799_v29 = vcombine.high %v4688_v53, %v4692_v40  ;;  %v4680_v5 = vld [vmem:[#allocation10 + $0x2c8] sm:$0xff]  ;;  %v9798_v62 = vcombine.low %v4688_v53, %v4692_v40 }
 0x394   :  { %7920 = vmatprep.subr.bf16.mxu1 %v9887_v0  ;;  %v9791_v0 = vcombine.high %v4680_v5, %v4684_v41 }
 0x395   :  { %7824 = vmatmul.mubr.bf16.vlgmr.msra.gmra.mxu0 %v10986_v7  ;;  %v4429_v22 = vpop.f32.mrf.mxu0 }
 0x396   :  { %7878 = vmatpush1.bf16.msra.mxu0 %v9758_v1  ;;  %7909 = vmatprep.mubr.bf16.mxu0 %v10937_v56  ;;  %v4676_v1 = vld [vmem:[#allocation10 + $0x2a8] sm:$0xff] }
 0x397   :  { %7879 = vmatprep.subr.bf16.mxu0 %v9751_v36  ;;  %v9790_v36 = vcombine.low %v4680_v5, %v4684_v41  ;;  %v9783_v9 = vcombine.high %v4672_v2, %v4676_v1 }
 0x39a   :  { %7880 = vmatpush1.bf16.msra.mxu0 %v9750_v17  ;;  %v4668_v17 = vld [vmem:[#allocation10 + $0x268] sm:$0xff] }
 0x39b   :  { %7881 = vmatprep.subr.bf16.mxu0 %v9743_v11  ;;  %v9782_v11 = vcombine.low %v4672_v2, %v4676_v1  ;;  %v9775_v43 = vcombine.high %v4664_v4, %v4668_v17  ;;  %v9774_v51 = vcombine.low %v4664_v4, %v4668_v17  ;;  %v4880_v2 = vld [vmem:[#allocation10 + $0x908] sm:$0xff] }
 0x39c   :  { %v4884_v1 = vld [vmem:[#allocation10 + $0x928] sm:$0xff] }
 0x39e   :  { %7882 = vmatpush1.bf16.msra.mxu0 %v9742_v61  ;;  %v4472_v61 = vpop.f32.mrf.mxu1 }
 0x39f   :  { %7883 = vmatprep.subr.bf16.mxu0 %v9735_v35  ;;  %v4656_v35 = vld [vmem:[#allocation10 + $0x208] sm:$0xff] }
 0x3a0   :  { %v4474_v24 = vpop.f32.mrf.mxu1  ;;  %v9766_v20 = vcombine.low %v4656_v35, %v4660_v44 }
 0x3a2   :  { %7884 = vmatpush1.bf16.msra.mxu0 %v9734_v47  ;;  %v4431_v47 = vpop.f32.mrf.mxu0  ;;  %v4476_v30 = vpop.f32.mrf.mxu1 }
 0x3a3   :  { %7885 = vmatprep.subr.bf16.mxu0 %v9727_v26  ;;  %v9767_v26 = vcombine.high %v4656_v35, %v4660_v44  ;;  %v9991_v35 = vcombine.high %v4880_v2, %v4884_v1 }
 0x3a6   :  { %7886 = vmatpush1.bf16.msra.mxu0 %v9726_v50  ;;  %v4908_v50 = vld [vmem:[#allocation10 + $0x9e8] sm:$0xff] }
 0x3a7   :  { %7887 = vmatprep.subr.bf16.mxu0 %v9719_v6  ;;  %v10447_v6 = vld [vmem:[#allocation8] sm:$0xff]  ;;  %v10015_v21 = vcombine.high %v4904_v45, %v4908_v50  ;;  %v10014_v3 = vcombine.low %v4904_v45, %v4908_v50 }
 0x3a8   :  { %v1310_v19 = vrot.slane %v10447_v6, %v10805_v31 }
 0x3aa   :  { %7888 = vmatpush1.bf16.msra.mxu0 %v9718_v49  ;;  %v1306_v49 = vrot.slane %v10447_v6, %v10829_v12  ;;  %v4432_v27 = vadd.f32 %v4431_v47, %v1310_v19  ;;  %v4872_v47 = vld [vmem:[#allocation10 + $0x8c8] sm:$0xff]  ;;  %v9990_v6 = vcombine.low %v4880_v2, %v4884_v1 }
 0x3ab   :  { %7889 = vmatprep.subr.bf16.mxu0 %v9711_v25  ;;  %v4433_v25 = vpop.f32.mrf.mxu0  ;;  %v4748_v2 = vld [vmem:[#allocation10 + $0x4e8] sm:$0xff] }
 0x3ac   :  { %v4434_v46 = vadd.f32 %v4433_v25, %v1306_v49  ;;  %v4968_v1 = vld [vmem:[#allocation10 + $0xbc8] sm:$0xff] }
 0x3ae   :  { %7890 = vmatpush1.bf16.msra.mxu0 %v9710_v52  ;;  %v4896_v52 = vld [vmem:[#allocation10 + $0x988] sm:$0xff]  ;;  %v4477_v41 = vadd.f32 %v4476_v30, %v4434_v46 }
 0x3af   :  { %7891 = vmatprep.subr.bf16.mxu0 %v9703_v23  ;;  %v4900_v23 = vld [vmem:[#allocation10 + $0x9a8] sm:$0xff] }
 0x3b0   :  { %v10007_v59 = vcombine.high %v4896_v52, %v4900_v23  ;;  %v10006_v40 = vcombine.low %v4896_v52, %v4900_v23  ;;  %v4772_v30 = vld [vmem:[#allocation10 + $0x5a8] sm:$0xff] }
 0x3b1   :  { %v4864_v23 = vld [vmem:[#allocation10 + $0x888] sm:$0xff] }
 0x3b2   :  { %7892 = vmatpush1.bf16.msra.mxu0 %v9702_v34  ;;  %v4430_v34 = vadd.f32 %v4429_v22, %v1306_v49 }
 0x3b3   :  { %7893 = vmatprep.subr.bf16.mxu0 %v9823_v8  ;;  %v4435_v8 = vpop.f32.mrf.mxu0 }
 0x3b6   :  { %7894 = vmatpush2.bf16.msra.mxu0 %v9822_v38  ;;  %v4478_v38 = vpop.f32.mrf.mxu1 }
 0x3b7   :  { %7895 = vmatprep.subr.bf16.mxu0 %v9815_v60  ;;  %v4888_v60 = vld [vmem:[#allocation10 + $0x948] sm:$0xff] }
 0x3b8   :  { %v9999_v5 = vcombine.high %v4888_v60, %v4892_v54  ;;  %v9998_v22 = vcombine.low %v4888_v60, %v4892_v54  ;;  %v4764_v60 = vld [vmem:[#allocation10 + $0x568] sm:$0xff] }
 0x3b9   :  { %v4856_v54 = vld [vmem:[#allocation10 + $0x848] sm:$0xff] }
 0x3ba   :  { %7896 = vmatpush2.bf16.msra.mxu0 %v9814_v39  ;;  %v4475_v39 = vadd.f32 %v4474_v24, %v4432_v27  ;;  %v4868_v27 = vld [vmem:[#allocation10 + $0x8a8] sm:$0xff] }
 0x3bb   :  { %7897 = vmatprep.subr.bf16.mxu0 %v9807_v57  ;;  %v4436_v57 = vadd.f32 %v4435_v8, %v1310_v19  ;;  %v9975_v46 = vcombine.high %v4864_v23, %v4868_v27 }
 0x3bd   :  { %v4479_v4 = vadd.f32 %v4478_v38, %v4436_v57  ;;  %v4760_v38 = vld [vmem:[#allocation10 + $0x548] sm:$0xff]  ;;  %v9974_v57 = vcombine.low %v4864_v23, %v4868_v27 }
 0x3be   :  { %7898 = vmatpush2.bf16.msra.mxu0 %v9806_v58  ;;  %v4473_v58 = vadd.f32 %v4472_v61, %v4430_v34  ;;  %v4948_v23 = vld [vmem:[#allocation10 + $0xb28] sm:$0xff] }
 0x3bf   :  { %7899 = vmatprep.subr.bf16.mxu0 %v9799_v29 }
 0x3c2   :  { %7900 = vmatpush2.bf16.msra.mxu0 %v9798_v62 }
 0x3c3   :  { %7901 = vmatprep.subr.bf16.mxu0 %v9791_v0 }
 0x3c6   :  { %7902 = vmatpush2.bf16.msra.mxu0 %v9790_v36 }
 0x3c7   :  { %7903 = vmatprep.subr.bf16.mxu0 %v9783_v9 }
 0x3ca   :  { %7904 = vmatpush2.bf16.msra.mxu0 %v9782_v11 }
 0x3cb   :  { %7905 = vmatprep.subr.bf16.mxu0 %v9775_v43 }
 0x3ce   :  { %7906 = vmatpush2.bf16.msra.mxu0 %v9774_v51 }
 0x3cf   :  { %7907 = vmatprep.subr.bf16.mxu0 %v9767_v26  ;;  %v4876_v26 = vld [vmem:[#allocation10 + $0x8e8] sm:$0xff] }
 0x3d0   :  { %v9982_v8 = vcombine.low %v4872_v47, %v4876_v26 }
 0x3d2   :  { %7908 = vmatpush2.bf16.msra.mxu0 %v9766_v20  ;;  %v9983_v20 = vcombine.high %v4872_v47, %v4876_v26 }
 0x3d3   :  { %7963 = vmatprep.subr.bf16.mxu0 %v10015_v21  ;;  %v4768_v21 = vld [vmem:[#allocation10 + $0x588] sm:$0xff] }
 0x3d5   :  { %v4515_v10 = vpop.f32.mrf.mxu0  ;;  %7910 = vmatmul.mubr.bf16.vlgmr.msra.gmra.mxu0 %v10881_v13 }
 0x3d6   :  { %v4558_v53 = vpop.f32.mrf.mxu1  ;;  %7964 = vmatpush1.bf16.msra.mxu0 %v10014_v3  ;;  %7995 = vmatprep.mubr.bf16.mxu0 %v10965_v63  ;;  %v4516_v36 = vadd.f32 %v4515_v10, %v4473_v58  ;;  %v4860_v10 = vld [vmem:[#allocation10 + $0x868] sm:$0xff] }
 0x3d7   :  { %v4517_v29 = vpop.f32.mrf.mxu0  ;;  %7965 = vmatprep.subr.bf16.mxu0 %v10007_v59  ;;  %v9879_v59 = vcombine.high %v4768_v21, %v4772_v30  ;;  %v4752_v58 = vld [vmem:[#allocation10 + $0x508] sm:$0xff] }
 0x3d8   :  { %v4518_v62 = vadd.f32 %v4517_v29, %v4475_v39  ;;  %v4560_v0 = vpop.f32.mrf.mxu1  ;;  %v4559_v24 = vadd.f32 %v4558_v53, %v4516_v36  ;;  %v9878_v39 = vcombine.low %v4768_v21, %v4772_v30  ;;  %v9871_v53 = vcombine.high %v4760_v38, %v4764_v60  ;;  %v4756_v29 = vld [vmem:[#allocation10 + $0x528] sm:$0xff] }
 0x3d9   :  { %v4519_v9 = vpop.f32.mrf.mxu0  ;;  %v9863_v32 = vcombine.high %v4752_v58, %v4756_v29  ;;  %v4972_v36 = vld [vmem:[#allocation10 + $0xbe8] sm:$0xff] }
 0x3da   :  { %v4520_v17 = vadd.f32 %v4519_v9, %v4477_v41  ;;  %v4562_v11 = vpop.f32.mrf.mxu1  ;;  %7966 = vmatpush1.bf16.msra.mxu0 %v10006_v40  ;;  %v4561_v44 = vadd.f32 %v4560_v0, %v4518_v62  ;;  %v4573_v52 = vmax.f32 %v4559_v24, 0.0  ;;  %v9967_v40 = vcombine.high %v4856_v54, %v4860_v10  ;;  %v4852_v41 = vld [vmem:[#allocation10 + $0x828] sm:$0xff] }
 0x3db   :  { %v4521_v43 = vpop.f32.mrf.mxu0  ;;  %7967 = vmatprep.subr.bf16.mxu0 %v9999_v5  ;;  %v4848_v5 = vld [vmem:[#allocation10 + $0x808] sm:$0xff]  ;;  %v9870_v62 = vcombine.low %v4760_v38, %v4764_v60  ;;  %v9966_v0 = vcombine.low %v4856_v54, %v4860_v10  ;;  %v9862_v9 = vcombine.low %v4752_v58, %v4756_v29 }
 0x3dc   :  { %v4563_v61 = vadd.f32 %v4562_v11, %v4520_v17  ;;  %v4522_v51 = vadd.f32 %v4521_v43, %v4479_v4  ;;  %v4564_v45 = vpop.f32.mrf.mxu1  ;;  %v4574_v49 = vmax.f32 %v4561_v44, 0.0  ;;  %v9959_v33 = vcombine.high %v4848_v5, %v4852_v41  ;;  %v4740_v43 = vld [vmem:[#allocation10 + $0x4a8] sm:$0xff] }
 0x3dd   :  { %v9958_v4 = vcombine.low %v4848_v5, %v4852_v41  ;;  %v10079_v11 = vcombine.high %v4968_v1, %v4972_v36  ;;  %v4964_v44 = vld [vmem:[#allocation10 + $0xba8] sm:$0xff] }
 0x3de   :  { %v4565_v50 = vadd.f32 %v4564_v45, %v4522_v51  ;;  %7968 = vmatpush1.bf16.msra.mxu0 %v9998_v22  ;;  %v4581_v19 = vmax.f32 %v4563_v61, 0.0  ;;  %v4736_v22 = vld [vmem:[#allocation10 + $0x488] sm:$0xff]  ;;  %v10078_v51 = vcombine.low %v4968_v1, %v4972_v36 }
 0x3df   :  { %7969 = vmatprep.subr.bf16.mxu0 %v9991_v35  ;;  %v4960_v35 = vld [vmem:[#allocation10 + $0xb88] sm:$0xff]  ;;  %v9847_v47 = vcombine.high %v4736_v22, %v4740_v43 }
 0x3e0   :  { %v4582_v25 = vmax.f32 %v4565_v50, 0.0  ;;  %v10996_v34 = vpack.c.bf16 %v4581_v19, %v4573_v52  ;;  %v10071_v26 = vcombine.high %v4960_v35, %v4964_v44  ;;  %v4728_v24 = vld [vmem:[#allocation10 + $0x448] sm:$0xff]  ;;  %v9846_v19 = vcombine.low %v4736_v22, %v4740_v43 }
 0x3e1   :  { %v4732_v45 = vld [vmem:[#allocation10 + $0x468] sm:$0xff] }
 0x3e2   :  { %v10994_v3 = vpack.c.bf16 %v4582_v25, %v4574_v49  ;;  %7970 = vmatpush1.bf16.msra.mxu0 %v9990_v6  ;;  %v4952_v50 = vld [vmem:[#allocation10 + $0xb48] sm:$0xff]  ;;  %v9839_v49 = vcombine.high %v4728_v24, %v4732_v45  ;;  %v9838_v27 = vcombine.low %v4728_v24, %v4732_v45 }
 0x3e3   :  { %7971 = vmatprep.subr.bf16.mxu0 %v9983_v20  ;;  %v4956_v6 = vld [vmem:[#allocation10 + $0xb68] sm:$0xff]  ;;  %v10070_v20 = vcombine.low %v4960_v35, %v4964_v44 }
 0x3e4   :  { %7866 = vmatprep.mubr.bf16.mxu1 %v10994_v3  ;;  %v10063_v25 = vcombine.high %v4952_v50, %v4956_v6  ;;  %v4720_v21 = vld [vmem:[#allocation10 + $0x408] sm:$0xff] }
 0x3e5   :  { %7867 = vmatmul.mubr.bf16.vlgmr.msra.gmra.mxu1 %v10996_v34  ;;  %v4724_v30 = vld [vmem:[#allocation10 + $0x428] sm:$0xff] }
 0x3e6   :  { %7921 = vmatpush1.bf16.msra.mxu1 %v9886_v55  ;;  %7952 = vmatprep.mubr.bf16.mxu1 %v10940_v48  ;;  %v4744_v55 = vld [vmem:[#allocation10 + $0x4c8] sm:$0xff] }
 0x3e7   :  { %7972 = vmatpush1.bf16.msra.mxu0 %v9982_v8  ;;  %7922 = vmatprep.subr.bf16.mxu1 %v9879_v59  ;;  %v9855_v17 = vcombine.high %v4744_v55, %v4748_v2  ;;  %v9854_v61 = vcombine.low %v4744_v55, %v4748_v2  ;;  %v4944_v52 = vld [vmem:[#allocation10 + $0xb08] sm:$0xff]  ;;  %v10062_v8 = vcombine.low %v4952_v50, %v4956_v6  ;;  %v4649_v50 = vld [vmem:[#allocation10 + $0x1d0] sm:$0xff] }
 0x3e8   :  { %7973 = vmatprep.subr.bf16.mxu0 %v9975_v46  ;;  %v9831_v59 = vcombine.high %v4720_v21, %v4724_v30  ;;  %v10055_v46 = vcombine.high %v4944_v52, %v4948_v23  ;;  %v4840_v38 = vld [vmem:[#allocation10 + $0x7c8] sm:$0xff]  ;;  %v4653_v6 = vld [vmem:[#allocation10 + $0x1f0] sm:$0xff] }
 0x3e9   :  { %v4844_v60 = vld [vmem:[#allocation10 + $0x7e8] sm:$0xff] }
 0x3ea   :  { %7923 = vmatpush1.bf16.msra.mxu1 %v9878_v39  ;;  %v4936_v54 = vld [vmem:[#allocation10 + $0xac8] sm:$0xff]  ;;  %v9830_v39 = vcombine.low %v4720_v21, %v4724_v30 }
 0x3eb   :  { %7974 = vmatpush1.bf16.msra.mxu0 %v9974_v57  ;;  %7924 = vmatprep.subr.bf16.mxu1 %v9871_v53  ;;  %v4940_v10 = vld [vmem:[#allocation10 + $0xae8] sm:$0xff]  ;;  %v10054_v57 = vcombine.low %v4944_v52, %v4948_v23  ;;  %v9951_v53 = vcombine.high %v4840_v38, %v4844_v60  ;;  %v4641_v52 = vld [vmem:[#allocation10 + $0x190] sm:$0xff] }
 0x3ec   :  { %7975 = vmatprep.subr.bf16.mxu0 %v9967_v40  ;;  %v10047_v40 = vcombine.high %v4936_v54, %v4940_v10  ;;  %v4832_v58 = vld [vmem:[#allocation10 + $0x788] sm:$0xff]  ;;  %v4645_v23 = vld [vmem:[#allocation10 + $0x1b0] sm:$0xff] }
 0x3ed   :  { %v4836_v29 = vld [vmem:[#allocation10 + $0x7a8] sm:$0xff] }
 0x3ee   :  { %7925 = vmatpush1.bf16.msra.mxu1 %v9870_v62  ;;  %v4928_v5 = vld [vmem:[#allocation10 + $0xa88] sm:$0xff]  ;;  %v9950_v62 = vcombine.low %v4840_v38, %v4844_v60 }
 0x3ef   :  { %7976 = vmatpush1.bf16.msra.mxu0 %v9966_v0  ;;  %7926 = vmatprep.subr.bf16.mxu1 %v9863_v32  ;;  %v4932_v41 = vld [vmem:[#allocation10 + $0xaa8] sm:$0xff]  ;;  %v10046_v0 = vcombine.low %v4936_v54, %v4940_v10  ;;  %v9943_v32 = vcombine.high %v4832_v58, %v4836_v29  ;;  %v4633_v54 = vld [vmem:[#allocation10 + $0x150] sm:$0xff] }
 0x3f0   :  { %7977 = vmatprep.subr.bf16.mxu0 %v9959_v33  ;;  %v10039_v33 = vcombine.high %v4928_v5, %v4932_v41  ;;  %v4824_v55 = vld [vmem:[#allocation10 + $0x748] sm:$0xff]  ;;  %v4637_v10 = vld [vmem:[#allocation10 + $0x170] sm:$0xff] }
 0x3f1   :  { %v4828_v2 = vld [vmem:[#allocation10 + $0x768] sm:$0xff] }
 0x3f2   :  { %7927 = vmatpush1.bf16.msra.mxu1 %v9862_v9  ;;  %v4920_v1 = vld [vmem:[#allocation10 + $0xa48] sm:$0xff]  ;;  %v9942_v9 = vcombine.low %v4832_v58, %v4836_v29 }
 0x3f3   :  { %7978 = vmatpush1.bf16.msra.mxu0 %v9958_v4  ;;  %7928 = vmatprep.subr.bf16.mxu1 %v9855_v17  ;;  %v4924_v36 = vld [vmem:[#allocation10 + $0xa68] sm:$0xff]  ;;  %v10038_v4 = vcombine.low %v4928_v5, %v4932_v41  ;;  %v9935_v17 = vcombine.high %v4824_v55, %v4828_v2  ;;  %v4625_v5 = vld [vmem:[#allocation10 + $0x110] sm:$0xff] }
 0x3f4   :  { %7979 = vmatprep.subr.bf16.mxu0 %v10079_v11  ;;  %v10031_v11 = vcombine.high %v4920_v1, %v4924_v36  ;;  %v4816_v22 = vld [vmem:[#allocation10 + $0x708] sm:$0xff]  ;;  %v4629_v41 = vld [vmem:[#allocation10 + $0x130] sm:$0xff] }
 0x3f5   :  { %v4820_v43 = vld [vmem:[#allocation10 + $0x728] sm:$0xff] }
 0x3f6   :  { %7929 = vmatpush1.bf16.msra.mxu1 %v9854_v61  ;;  %v4912_v35 = vld [vmem:[#allocation10 + $0xa08] sm:$0xff]  ;;  %v9934_v61 = vcombine.low %v4824_v55, %v4828_v2 }
 0x3f7   :  { %7980 = vmatpush2.bf16.msra.mxu0 %v10078_v51  ;;  %7930 = vmatprep.subr.bf16.mxu1 %v9847_v47  ;;  %v4916_v44 = vld [vmem:[#allocation10 + $0xa28] sm:$0xff]  ;;  %v10030_v51 = vcombine.low %v4920_v1, %v4924_v36  ;;  %v9927_v47 = vcombine.high %v4816_v22, %v4820_v43  ;;  %v4617_v1 = vld [vmem:[#allocation10 + $0xd0] sm:$0xff] }
 0x3f8   :  { %7981 = vmatprep.subr.bf16.mxu0 %v10071_v26  ;;  %v10023_v26 = vcombine.high %v4912_v35, %v4916_v44  ;;  %v4808_v24 = vld [vmem:[#allocation10 + $0x6c8] sm:$0xff]  ;;  %v4621_v36 = vld [vmem:[#allocation10 + $0xf0] sm:$0xff] }
 0x3f9   :  { %v4812_v45 = vld [vmem:[#allocation10 + $0x6e8] sm:$0xff] }
 0x3fa   :  { %7931 = vmatpush1.bf16.msra.mxu1 %v9846_v19  ;;  %v9926_v19 = vcombine.low %v4816_v22, %v4820_v43  ;;  %v4800_v21 = vld [vmem:[#allocation10 + $0x688] sm:$0xff] }
 0x3fb   :  { %7982 = vmatpush2.bf16.msra.mxu0 %v10070_v20  ;;  %7932 = vmatprep.subr.bf16.mxu1 %v9839_v49  ;;  %v10022_v20 = vcombine.low %v4912_v35, %v4916_v44  ;;  %v9919_v49 = vcombine.high %v4808_v24, %v4812_v45  ;;  %v4804_v30 = vld [vmem:[#allocation10 + $0x6a8] sm:$0xff]  ;;  %v4609_v35 = vld [vmem:[#allocation10 + $0x90] sm:$0xff] }
 0x3fc   :  { %7983 = vmatprep.subr.bf16.mxu0 %v10063_v25  ;;  %v9761_v25 = vcombine.high %v4649_v50, %v4653_v6  ;;  %v4792_v38 = vld [vmem:[#allocation10 + $0x648] sm:$0xff]  ;;  %v4613_v44 = vld [vmem:[#allocation10 + $0xb0] sm:$0xff] }
 0x3fd   :  { %v4796_v60 = vld [vmem:[#allocation10 + $0x668] sm:$0xff] }
 0x3fe   :  { %7933 = vmatpush1.bf16.msra.mxu1 %v9838_v27  ;;  %v9918_v27 = vcombine.low %v4808_v24, %v4812_v45  ;;  %v4784_v58 = vld [vmem:[#allocation10 + $0x608] sm:$0xff] }
 0x3ff   :  { %7984 = vmatpush2.bf16.msra.mxu0 %v10062_v8  ;;  %7934 = vmatprep.subr.bf16.mxu1 %v9831_v59  ;;  %v9760_v8 = vcombine.low %v4649_v50, %v4653_v6  ;;  %v9911_v59 = vcombine.high %v4800_v21, %v4804_v30  ;;  %v4788_v29 = vld [vmem:[#allocation10 + $0x628] sm:$0xff]  ;;  %v4601_v50 = vld [vmem:[#allocation10 + $0x50] sm:$0xff] }
 0x400   :  { %7985 = vmatprep.subr.bf16.mxu0 %v10055_v46  ;;  %v9753_v46 = vcombine.high %v4641_v52, %v4645_v23  ;;  %v5032_v55 = vld [vmem:[#allocation10 + $0xdc8] sm:$0xff]  ;;  %v4605_v6 = vld [vmem:[#allocation10 + $0x70] sm:$0xff] }
 0x401   :  { %v5036_v2 = vld [vmem:[#allocation10 + $0xde8] sm:$0xff] }
 0x402   :  { %7935 = vmatpush1.bf16.msra.mxu1 %v9830_v39  ;;  %v9910_v39 = vcombine.low %v4800_v21, %v4804_v30  ;;  %v5024_v22 = vld [vmem:[#allocation10 + $0xd88] sm:$0xff] }
 0x403   :  { %7986 = vmatpush2.bf16.msra.mxu0 %v10054_v57  ;;  %7936 = vmatprep.subr.bf16.mxu1 %v9951_v53  ;;  %v9752_v57 = vcombine.low %v4641_v52, %v4645_v23  ;;  %v9903_v53 = vcombine.high %v4792_v38, %v4796_v60  ;;  %v5028_v43 = vld [vmem:[#allocation10 + $0xda8] sm:$0xff]  ;;  %v4593_v52 = vld [vmem:[#allocation10 + $0x10] sm:$0xff] }
 0x404   :  { %7987 = vmatprep.subr.bf16.mxu0 %v10047_v40  ;;  %v9745_v40 = vcombine.high %v4633_v54, %v4637_v10  ;;  %v5016_v24 = vld [vmem:[#allocation10 + $0xd48] sm:$0xff]  ;;  %v4597_v23 = vld [vmem:[#allocation10 + $0x30] sm:$0xff] }
 0x405   :  { %v5020_v45 = vld [vmem:[#allocation10 + $0xd68] sm:$0xff] }
 0x406   :  { %7937 = vmatpush2.bf16.msra.mxu1 %v9950_v62  ;;  %v9902_v62 = vcombine.low %v4792_v38, %v4796_v60  ;;  %v5008_v21 = vld [vmem:[#allocation10 + $0xd08] sm:$0xff] }
 0x407   :  { %7988 = vmatpush2.bf16.msra.mxu0 %v10046_v0  ;;  %7938 = vmatprep.subr.bf16.mxu1 %v9943_v32  ;;  %v9744_v0 = vcombine.low %v4633_v54, %v4637_v10  ;;  %v9895_v32 = vcombine.high %v4784_v58, %v4788_v29  ;;  %v5012_v30 = vld [vmem:[#allocation10 + $0xd28] sm:$0xff]  ;;  %v4713_v54 = vld [vmem:[#allocation10 + $0x3d0] sm:$0xff] }
 0x408   :  { %7989 = vmatprep.subr.bf16.mxu0 %v10039_v33  ;;  %v9737_v33 = vcombine.high %v4625_v5, %v4629_v41  ;;  %v5000_v38 = vld [vmem:[#allocation10 + $0xcc8] sm:$0xff]  ;;  %v4717_v10 = vld [vmem:[#allocation10 + $0x3f0] sm:$0xff] }
 0x409   :  { %v5004_v60 = vld [vmem:[#allocation10 + $0xce8] sm:$0xff] }
 0x40a   :  { %7939 = vmatpush2.bf16.msra.mxu1 %v9942_v9  ;;  %v9894_v9 = vcombine.low %v4784_v58, %v4788_v29  ;;  %v4992_v58 = vld [vmem:[#allocation10 + $0xc88] sm:$0xff] }
 0x40b   :  { %7990 = vmatpush2.bf16.msra.mxu0 %v10038_v4  ;;  %7940 = vmatprep.subr.bf16.mxu1 %v9935_v17  ;;  %v9736_v4 = vcombine.low %v4625_v5, %v4629_v41  ;;  %v10143_v17 = vcombine.high %v5032_v55, %v5036_v2  ;;  %v4996_v29 = vld [vmem:[#allocation10 + $0xca8] sm:$0xff]  ;;  %v4705_v5 = vld [vmem:[#allocation10 + $0x390] sm:$0xff] }
 0x40c   :  { %7991 = vmatprep.subr.bf16.mxu0 %v10031_v11  ;;  %v9729_v11 = vcombine.high %v4617_v1, %v4621_v36  ;;  %v4709_v41 = vld [vmem:[#allocation10 + $0x3b0] sm:$0xff] }
 0x40e   :  { %7941 = vmatpush2.bf16.msra.mxu1 %v9934_v61  ;;  %v10142_v61 = vcombine.low %v5032_v55, %v5036_v2  ;;  %v4984_v55 = vld [vmem:[#allocation10 + $0xc48] sm:$0xff] }
 0x40f   :  { %7992 = vmatpush2.bf16.msra.mxu0 %v10030_v51  ;;  %7942 = vmatprep.subr.bf16.mxu1 %v9927_v47  ;;  %v9728_v51 = vcombine.low %v4617_v1, %v4621_v36  ;;  %v10135_v47 = vcombine.high %v5024_v22, %v5028_v43  ;;  %v4988_v2 = vld [vmem:[#allocation10 + $0xc68] sm:$0xff]  ;;  %v4697_v1 = vld [vmem:[#allocation10 + $0x350] sm:$0xff] }
 0x410   :  { %7993 = vmatprep.subr.bf16.mxu0 %v10023_v26  ;;  %v9721_v26 = vcombine.high %v4609_v35, %v4613_v44  ;;  %v4701_v36 = vld [vmem:[#allocation10 + $0x370] sm:$0xff] }
 0x412   :  { %7943 = vmatpush2.bf16.msra.mxu1 %v9926_v19  ;;  %v10134_v19 = vcombine.low %v5024_v22, %v5028_v43  ;;  %v4976_v22 = vld [vmem:[#allocation10 + $0xc08] sm:$0xff] }
 0x413   :  { %7994 = vmatpush2.bf16.msra.mxu0 %v10022_v20  ;;  %7944 = vmatprep.subr.bf16.mxu1 %v9919_v49  ;;  %v9720_v20 = vcombine.low %v4609_v35, %v4613_v44  ;;  %v10127_v49 = vcombine.high %v5016_v24, %v5020_v45  ;;  %v4980_v43 = vld [vmem:[#allocation10 + $0xc28] sm:$0xff]  ;;  %v4689_v35 = vld [vmem:[#allocation10 + $0x310] sm:$0xff] }
 0x414   :  { %8049 = vmatprep.subr.bf16.mxu0 %v9761_v25  ;;  %v9713_v25 = vcombine.high %v4601_v50, %v4605_v6  ;;  %v4693_v44 = vld [vmem:[#allocation10 + $0x330] sm:$0xff] }
 0x416   :  { %7945 = vmatpush2.bf16.msra.mxu1 %v9918_v27  ;;  %7996 = vmatmul.mubr.bf16.vlgmr.msra.gmra.mxu0 %v10986_v7  ;;  %v10126_v27 = vcombine.low %v5016_v24, %v5020_v45  ;;  %v5096_v24 = vld [vmem:[#allocation10 + $0xfc8] sm:$0xff] }
 0x417   :  { %8050 = vmatpush1.bf16.msra.mxu0 %v9760_v8  ;;  %8081 = vmatprep.mubr.bf16.mxu0 %v10937_v56  ;;  %v9712_v8 = vcombine.low %v4601_v50, %v4605_v6  ;;  %v5100_v45 = vld [vmem:[#allocation10 + $0xfe8] sm:$0xff]  ;;  %v4681_v50 = vld [vmem:[#allocation10 + $0x2d0] sm:$0xff] }
 0x418   :  { %7946 = vmatprep.subr.bf16.mxu1 %v9911_v59  ;;  %8051 = vmatprep.subr.bf16.mxu0 %v9753_v46  ;;  %v10119_v59 = vcombine.high %v5008_v21, %v5012_v30  ;;  %v9705_v46 = vcombine.high %v4593_v52, %v4597_v23  ;;  %v4685_v6 = vld [vmem:[#allocation10 + $0x2f0] sm:$0xff] }
 0x41a   :  { %7947 = vmatpush2.bf16.msra.mxu1 %v9910_v39  ;;  %v10118_v39 = vcombine.low %v5008_v21, %v5012_v30  ;;  %v5088_v21 = vld [vmem:[#allocation10 + $0xf88] sm:$0xff] }
 0x41b   :  { %8052 = vmatpush1.bf16.msra.mxu0 %v9752_v57  ;;  %7948 = vmatprep.subr.bf16.mxu1 %v9903_v53  ;;  %v9704_v57 = vcombine.low %v4593_v52, %v4597_v23  ;;  %v10111_v53 = vcombine.high %v5000_v38, %v5004_v60  ;;  %v5092_v30 = vld [vmem:[#allocation10 + $0xfa8] sm:$0xff]  ;;  %v4673_v52 = vld [vmem:[#allocation10 + $0x290] sm:$0xff] }
 0x41c   :  { %8053 = vmatprep.subr.bf16.mxu0 %v9745_v40  ;;  %v9825_v40 = vcombine.high %v4713_v54, %v4717_v10  ;;  %v4677_v23 = vld [vmem:[#allocation10 + $0x2b0] sm:$0xff] }
 0x41e   :  { %7949 = vmatpush2.bf16.msra.mxu1 %v9902_v62  ;;  %v10110_v62 = vcombine.low %v5000_v38, %v5004_v60  ;;  %v5080_v38 = vld [vmem:[#allocation10 + $0xf48] sm:$0xff] }
 0x41f   :  { %8054 = vmatpush1.bf16.msra.mxu0 %v9744_v0  ;;  %7950 = vmatprep.subr.bf16.mxu1 %v9895_v32  ;;  %v9824_v0 = vcombine.low %v4713_v54, %v4717_v10  ;;  %v10103_v32 = vcombine.high %v4992_v58, %v4996_v29  ;;  %v5084_v60 = vld [vmem:[#allocation10 + $0xf68] sm:$0xff]  ;;  %v4665_v54 = vld [vmem:[#allocation10 + $0x250] sm:$0xff] }
 0x420   :  { %8055 = vmatprep.subr.bf16.mxu0 %v9737_v33  ;;  %v9817_v33 = vcombine.high %v4705_v5, %v4709_v41  ;;  %v4669_v10 = vld [vmem:[#allocation10 + $0x270] sm:$0xff] }
 0x422   :  { %7951 = vmatpush2.bf16.msra.mxu1 %v9894_v9  ;;  %v10102_v9 = vcombine.low %v4992_v58, %v4996_v29  ;;  %v5072_v58 = vld [vmem:[#allocation10 + $0xf08] sm:$0xff] }
 0x423   :  { %8056 = vmatpush1.bf16.msra.mxu0 %v9736_v4  ;;  %8006 = vmatprep.subr.bf16.mxu1 %v10143_v17  ;;  %v9816_v4 = vcombine.low %v4705_v5, %v4709_v41  ;;  %v10095_v17 = vcombine.high %v4984_v55, %v4988_v2  ;;  %v5076_v29 = vld [vmem:[#allocation10 + $0xf28] sm:$0xff]  ;;  %v4657_v5 = vld [vmem:[#allocation10 + $0x210] sm:$0xff] }
 0x424   :  { %8057 = vmatprep.subr.bf16.mxu0 %v9729_v11  ;;  %v9809_v11 = vcombine.high %v4697_v1, %v4701_v36  ;;  %v4661_v41 = vld [vmem:[#allocation10 + $0x230] sm:$0xff] }
 0x425   :  { %7953 = vmatmul.mubr.bf16.vlgmr.msra.gmra.mxu1 %v10915_v37 }
 0x426   :  { %8007 = vmatpush1.bf16.msra.mxu1 %v10142_v61  ;;  %8038 = vmatprep.mubr.bf16.mxu1 %v10994_v3  ;;  %v10094_v61 = vcombine.low %v4984_v55, %v4988_v2  ;;  %v5064_v55 = vld [vmem:[#allocation10 + $0xec8] sm:$0xff] }
 0x427   :  { %8058 = vmatpush1.bf16.msra.mxu0 %v9728_v51  ;;  %8008 = vmatprep.subr.bf16.mxu1 %v10135_v47  ;;  %v9808_v51 = vcombine.low %v4697_v1, %v4701_v36  ;;  %v10087_v47 = vcombine.high %v4976_v22, %v4980_v43  ;;  %v5068_v2 = vld [vmem:[#allocation10 + $0xee8] sm:$0xff]  ;;  %v4905_v1 = vld [vmem:[#allocation10 + $0x9d0] sm:$0xff] }
 0x428   :  { %8059 = vmatprep.subr.bf16.mxu0 %v9721_v26  ;;  %v9801_v26 = vcombine.high %v4689_v35, %v4693_v44  ;;  %v4909_v36 = vld [vmem:[#allocation10 + $0x9f0] sm:$0xff] }
 0x42a   :  { %8009 = vmatpush1.bf16.msra.mxu1 %v10134_v19  ;;  %v10086_v19 = vcombine.low %v4976_v22, %v4980_v43  ;;  %v5056_v22 = vld [vmem:[#allocation10 + $0xe88] sm:$0xff] }
 0x42b   :  { %8060 = vmatpush1.bf16.msra.mxu0 %v9720_v20  ;;  %8010 = vmatprep.subr.bf16.mxu1 %v10127_v49  ;;  %v9800_v20 = vcombine.low %v4689_v35, %v4693_v44  ;;  %v10207_v49 = vcombine.high %v5096_v24, %v5100_v45  ;;  %v5060_v43 = vld [vmem:[#allocation10 + $0xea8] sm:$0xff]  ;;  %v4897_v35 = vld [vmem:[#allocation10 + $0x990] sm:$0xff] }
 0x42c   :  { %8061 = vmatprep.subr.bf16.mxu0 %v9713_v25  ;;  %v9793_v25 = vcombine.high %v4681_v50, %v4685_v6  ;;  %v4901_v44 = vld [vmem:[#allocation10 + $0x9b0] sm:$0xff] }
 0x42e   :  { %8011 = vmatpush1.bf16.msra.mxu1 %v10126_v27  ;;  %v10206_v27 = vcombine.low %v5096_v24, %v5100_v45  ;;  %v5048_v24 = vld [vmem:[#allocation10 + $0xe48] sm:$0xff] }
 0x42f   :  { %8062 = vmatpush1.bf16.msra.mxu0 %v9712_v8  ;;  %8012 = vmatprep.subr.bf16.mxu1 %v10119_v59  ;;  %v9792_v8 = vcombine.low %v4681_v50, %v4685_v6  ;;  %v10199_v59 = vcombine.high %v5088_v21, %v5092_v30  ;;  %v5052_v45 = vld [vmem:[#allocation10 + $0xe68] sm:$0xff]  ;;  %v4889_v50 = vld [vmem:[#allocation10 + $0x950] sm:$0xff] }
 0x430   :  { %8063 = vmatprep.subr.bf16.mxu0 %v9705_v46  ;;  %v9785_v46 = vcombine.high %v4673_v52, %v4677_v23  ;;  %v4893_v6 = vld [vmem:[#allocation10 + $0x970] sm:$0xff] }
 0x432   :  { %8013 = vmatpush1.bf16.msra.mxu1 %v10118_v39  ;;  %v10198_v39 = vcombine.low %v5088_v21, %v5092_v30  ;;  %v5040_v21 = vld [vmem:[#allocation10 + $0xe08] sm:$0xff] }
 0x433   :  { %8064 = vmatpush1.bf16.msra.mxu0 %v9704_v57  ;;  %8014 = vmatprep.subr.bf16.mxu1 %v10111_v53  ;;  %v9784_v57 = vcombine.low %v4673_v52, %v4677_v23  ;;  %v10191_v53 = vcombine.high %v5080_v38, %v5084_v60  ;;  %v5044_v30 = vld [vmem:[#allocation10 + $0xe28] sm:$0xff]  ;;  %v4881_v52 = vld [vmem:[#allocation10 + $0x910] sm:$0xff] }
 0x434   :  { %8065 = vmatprep.subr.bf16.mxu0 %v9825_v40  ;;  %v9777_v40 = vcombine.high %v4665_v54, %v4669_v10  ;;  %v4885_v23 = vld [vmem:[#allocation10 + $0x930] sm:$0xff] }
 0x436   :  { %8015 = vmatpush1.bf16.msra.mxu1 %v10110_v62  ;;  %v10190_v62 = vcombine.low %v5080_v38, %v5084_v60  ;;  %v4777_v38 = vld [vmem:[#allocation10 + $0x5d0] sm:$0xff] }
 0x437   :  { %8066 = vmatpush2.bf16.msra.mxu0 %v9824_v0  ;;  %8016 = vmatprep.subr.bf16.mxu1 %v10103_v32  ;;  %v9776_v0 = vcombine.low %v4665_v54, %v4669_v10  ;;  %v10183_v32 = vcombine.high %v5072_v58, %v5076_v29  ;;  %v4781_v60 = vld [vmem:[#allocation10 + $0x5f0] sm:$0xff] }
 0x438   :  { %8067 = vmatprep.subr.bf16.mxu0 %v9817_v33  ;;  %v9769_v33 = vcombine.high %v4657_v5, %v4661_v41  ;;  %v4873_v54 = vld [vmem:[#allocation10 + $0x8d0] sm:$0xff] }
 0x439   :  { %v4877_v10 = vld [vmem:[#allocation10 + $0x8f0] sm:$0xff] }
 0x43a   :  { %8017 = vmatpush1.bf16.msra.mxu1 %v10102_v9  ;;  %v10182_v9 = vcombine.low %v5072_v58, %v5076_v29  ;;  %v4769_v58 = vld [vmem:[#allocation10 + $0x590] sm:$0xff] }
 0x43b   :  { %8068 = vmatpush2.bf16.msra.mxu0 %v9816_v4  ;;  %8018 = vmatprep.subr.bf16.mxu1 %v10095_v17  ;;  %v9768_v4 = vcombine.low %v4657_v5, %v4661_v41  ;;  %v10175_v17 = vcombine.high %v5064_v55, %v5068_v2  ;;  %v4773_v29 = vld [vmem:[#allocation10 + $0x5b0] sm:$0xff] }
 0x43c   :  { %8069 = vmatprep.subr.bf16.mxu0 %v9809_v11  ;;  %v10017_v11 = vcombine.high %v4905_v1, %v4909_v36  ;;  %v4865_v5 = vld [vmem:[#allocation10 + $0x890] sm:$0xff] }
 0x43d   :  { %v4869_v41 = vld [vmem:[#allocation10 + $0x8b0] sm:$0xff] }
 0x43e   :  { %8019 = vmatpush1.bf16.msra.mxu1 %v10094_v61  ;;  %v10174_v61 = vcombine.low %v5064_v55, %v5068_v2  ;;  %v4761_v55 = vld [vmem:[#allocation10 + $0x550] sm:$0xff] }
 0x43f   :  { %8070 = vmatpush2.bf16.msra.mxu0 %v9808_v51  ;;  %8020 = vmatprep.subr.bf16.mxu1 %v10087_v47  ;;  %v10016_v51 = vcombine.low %v4905_v1, %v4909_v36  ;;  %v10167_v47 = vcombine.high %v5056_v22, %v5060_v43  ;;  %v4765_v2 = vld [vmem:[#allocation10 + $0x570] sm:$0xff] }
 0x440   :  { %8071 = vmatprep.subr.bf16.mxu0 %v9801_v26  ;;  %v10009_v26 = vcombine.high %v4897_v35, %v4901_v44  ;;  %v4857_v1 = vld [vmem:[#allocation10 + $0x850] sm:$0xff] }
 0x441   :  { %v4861_v36 = vld [vmem:[#allocation10 + $0x870] sm:$0xff] }
 0x442   :  { %8021 = vmatpush1.bf16.msra.mxu1 %v10086_v19  ;;  %v10166_v19 = vcombine.low %v5056_v22, %v5060_v43  ;;  %v4753_v22 = vld [vmem:[#allocation10 + $0x510] sm:$0xff] }
 0x443   :  { %8072 = vmatpush2.bf16.msra.mxu0 %v9800_v20  ;;  %8022 = vmatprep.subr.bf16.mxu1 %v10207_v49  ;;  %v10008_v20 = vcombine.low %v4897_v35, %v4901_v44  ;;  %v10159_v49 = vcombine.high %v5048_v24, %v5052_v45  ;;  %v4757_v43 = vld [vmem:[#allocation10 + $0x530] sm:$0xff] }
 0x444   :  { %8073 = vmatprep.subr.bf16.mxu0 %v9793_v25  ;;  %v10001_v25 = vcombine.high %v4889_v50, %v4893_v6  ;;  %v4849_v35 = vld [vmem:[#allocation10 + $0x810] sm:$0xff] }
 0x445   :  { %v4853_v44 = vld [vmem:[#allocation10 + $0x830] sm:$0xff] }
 0x446   :  { %8023 = vmatpush2.bf16.msra.mxu1 %v10206_v27  ;;  %v10158_v27 = vcombine.low %v5048_v24, %v5052_v45  ;;  %v4745_v24 = vld [vmem:[#allocation10 + $0x4d0] sm:$0xff] }
 0x447   :  { %8074 = vmatpush2.bf16.msra.mxu0 %v9792_v8  ;;  %8024 = vmatprep.subr.bf16.mxu1 %v10199_v59  ;;  %v10000_v8 = vcombine.low %v4889_v50, %v4893_v6  ;;  %v10151_v59 = vcombine.high %v5040_v21, %v5044_v30  ;;  %v4749_v45 = vld [vmem:[#allocation10 + $0x4f0] sm:$0xff] }
 0x448   :  { %8075 = vmatprep.subr.bf16.mxu0 %v9785_v46  ;;  %v9993_v46 = vcombine.high %v4881_v52, %v4885_v23  ;;  %v4969_v50 = vld [vmem:[#allocation10 + $0xbd0] sm:$0xff] }
 0x449   :  { %v4973_v6 = vld [vmem:[#allocation10 + $0xbf0] sm:$0xff] }
 0x44a   :  { %8025 = vmatpush2.bf16.msra.mxu1 %v10198_v39  ;;  %v10150_v39 = vcombine.low %v5040_v21, %v5044_v30  ;;  %v4737_v21 = vld [vmem:[#allocation10 + $0x490] sm:$0xff] }
 0x44b   :  { %8076 = vmatpush2.bf16.msra.mxu0 %v9784_v57  ;;  %8026 = vmatprep.subr.bf16.mxu1 %v10191_v53  ;;  %v9992_v57 = vcombine.low %v4881_v52, %v4885_v23  ;;  %v9889_v53 = vcombine.high %v4777_v38, %v4781_v60  ;;  %v4741_v30 = vld [vmem:[#allocation10 + $0x4b0] sm:$0xff] }
 0x44c   :  { %8077 = vmatprep.subr.bf16.mxu0 %v9777_v40  ;;  %v9985_v40 = vcombine.high %v4873_v54, %v4877_v10  ;;  %v4961_v52 = vld [vmem:[#allocation10 + $0xb90] sm:$0xff] }
 0x44d   :  { %v4965_v23 = vld [vmem:[#allocation10 + $0xbb0] sm:$0xff] }
 0x44e   :  { %8027 = vmatpush2.bf16.msra.mxu1 %v10190_v62  ;;  %v9888_v62 = vcombine.low %v4777_v38, %v4781_v60  ;;  %v4729_v38 = vld [vmem:[#allocation10 + $0x450] sm:$0xff] }
 0x44f   :  { %8078 = vmatpush2.bf16.msra.mxu0 %v9776_v0  ;;  %8028 = vmatprep.subr.bf16.mxu1 %v10183_v32  ;;  %v9984_v0 = vcombine.low %v4873_v54, %v4877_v10  ;;  %v9881_v32 = vcombine.high %v4769_v58, %v4773_v29  ;;  %v4733_v60 = vld [vmem:[#allocation10 + $0x470] sm:$0xff] }
 0x450   :  { %8079 = vmatprep.subr.bf16.mxu0 %v9769_v33  ;;  %v9977_v33 = vcombine.high %v4865_v5, %v4869_v41  ;;  %v4953_v54 = vld [vmem:[#allocation10 + $0xb50] sm:$0xff] }
 0x451   :  { %v4957_v10 = vld [vmem:[#allocation10 + $0xb70] sm:$0xff] }
 0x452   :  { %8029 = vmatpush2.bf16.msra.mxu1 %v10182_v9  ;;  %v9880_v9 = vcombine.low %v4769_v58, %v4773_v29  ;;  %v4721_v58 = vld [vmem:[#allocation10 + $0x410] sm:$0xff] }
 0x453   :  { %8080 = vmatpush2.bf16.msra.mxu0 %v9768_v4  ;;  %8030 = vmatprep.subr.bf16.mxu1 %v10175_v17  ;;  %v9976_v4 = vcombine.low %v4865_v5, %v4869_v41  ;;  %v9873_v17 = vcombine.high %v4761_v55, %v4765_v2  ;;  %v4725_v29 = vld [vmem:[#allocation10 + $0x430] sm:$0xff] }
 0x454   :  { %8135 = vmatprep.subr.bf16.mxu0 %v10017_v11  ;;  %v9969_v11 = vcombine.high %v4857_v1, %v4861_v36  ;;  %v4945_v5 = vld [vmem:[#allocation10 + $0xb10] sm:$0xff] }
 0x455   :  { %v4949_v41 = vld [vmem:[#allocation10 + $0xb30] sm:$0xff] }
 0x456   :  { %8031 = vmatpush2.bf16.msra.mxu1 %v10174_v61  ;;  %8082 = vmatmul.mubr.bf16.vlgmr.msra.gmra.mxu0 %v10881_v13  ;;  %v9872_v61 = vcombine.low %v4761_v55, %v4765_v2  ;;  %v4841_v55 = vld [vmem:[#allocation10 + $0x7d0] sm:$0xff] }
 0x457   :  { %8136 = vmatpush1.bf16.msra.mxu0 %v10016_v51  ;;  %8167 = vmatprep.mubr.bf16.mxu0 %v10965_v63  ;;  %v9968_v51 = vcombine.low %v4857_v1, %v4861_v36  ;;  %v4845_v2 = vld [vmem:[#allocation10 + $0x7f0] sm:$0xff] }
 0x458   :  { %8032 = vmatprep.subr.bf16.mxu1 %v10167_v47  ;;  %8137 = vmatprep.subr.bf16.mxu0 %v10009_v26  ;;  %v9865_v47 = vcombine.high %v4753_v22, %v4757_v43  ;;  %v9961_v26 = vcombine.high %v4849_v35, %v4853_v44  ;;  %v4937_v1 = vld [vmem:[#allocation10 + $0xad0] sm:$0xff] }
 0x459   :  { %v4941_v36 = vld [vmem:[#allocation10 + $0xaf0] sm:$0xff] }
 0x45a   :  { %8033 = vmatpush2.bf16.msra.mxu1 %v10166_v19  ;;  %v9864_v19 = vcombine.low %v4753_v22, %v4757_v43  ;;  %v4833_v22 = vld [vmem:[#allocation10 + $0x790] sm:$0xff] }
 0x45b   :  { %8138 = vmatpush1.bf16.msra.mxu0 %v10008_v20  ;;  %8034 = vmatprep.subr.bf16.mxu1 %v10159_v49  ;;  %v9960_v20 = vcombine.low %v4849_v35, %v4853_v44  ;;  %v9857_v49 = vcombine.high %v4745_v24, %v4749_v45  ;;  %v4837_v43 = vld [vmem:[#allocation10 + $0x7b0] sm:$0xff] }
 0x45c   :  { %8139 = vmatprep.subr.bf16.mxu0 %v10001_v25  ;;  %v10081_v25 = vcombine.high %v4969_v50, %v4973_v6  ;;  %v4929_v35 = vld [vmem:[#allocation10 + $0xa90] sm:$0xff] }
 0x45d   :  { %v4933_v44 = vld [vmem:[#allocation10 + $0xab0] sm:$0xff] }
 0x45e   :  { %8035 = vmatpush2.bf16.msra.mxu1 %v10158_v27  ;;  %v9856_v27 = vcombine.low %v4745_v24, %v4749_v45  ;;  %v4825_v24 = vld [vmem:[#allocation10 + $0x750] sm:$0xff] }
 0x45f   :  { %8140 = vmatpush1.bf16.msra.mxu0 %v10000_v8  ;;  %8036 = vmatprep.subr.bf16.mxu1 %v10151_v59  ;;  %v10080_v8 = vcombine.low %v4969_v50, %v4973_v6  ;;  %v9849_v59 = vcombine.high %v4737_v21, %v4741_v30  ;;  %v4829_v45 = vld [vmem:[#allocation10 + $0x770] sm:$0xff] }
 0x460   :  { %8141 = vmatprep.subr.bf16.mxu0 %v9993_v46  ;;  %v10073_v46 = vcombine.high %v4961_v52, %v4965_v23  ;;  %v4921_v50 = vld [vmem:[#allocation10 + $0xa50] sm:$0xff] }
 0x461   :  { %v4925_v6 = vld [vmem:[#allocation10 + $0xa70] sm:$0xff] }
 0x462   :  { %8037 = vmatpush2.bf16.msra.mxu1 %v10150_v39  ;;  %v9848_v39 = vcombine.low %v4737_v21, %v4741_v30  ;;  %v4817_v21 = vld [vmem:[#allocation10 + $0x710] sm:$0xff] }
 0x463   :  { %8142 = vmatpush1.bf16.msra.mxu0 %v9992_v57  ;;  %8092 = vmatprep.subr.bf16.mxu1 %v9889_v53  ;;  %v10072_v57 = vcombine.low %v4961_v52, %v4965_v23  ;;  %v9841_v53 = vcombine.high %v4729_v38, %v4733_v60  ;;  %v4821_v30 = vld [vmem:[#allocation10 + $0x730] sm:$0xff] }
 0x464   :  { %8143 = vmatprep.subr.bf16.mxu0 %v9985_v40  ;;  %v10065_v40 = vcombine.high %v4953_v54, %v4957_v10  ;;  %v4913_v52 = vld [vmem:[#allocation10 + $0xa10] sm:$0xff] }
 0x465   :  { %8039 = vmatmul.mubr.bf16.vlgmr.msra.gmra.mxu1 %v10996_v34  ;;  %v4917_v23 = vld [vmem:[#allocation10 + $0xa30] sm:$0xff] }
 0x466   :  { %8093 = vmatpush1.bf16.msra.mxu1 %v9888_v62  ;;  %8124 = vmatprep.mubr.bf16.mxu1 %v10940_v48  ;;  %v9840_v62 = vcombine.low %v4729_v38, %v4733_v60  ;;  %v4809_v38 = vld [vmem:[#allocation10 + $0x6d0] sm:$0xff] }
 0x467   :  { %8144 = vmatpush1.bf16.msra.mxu0 %v9984_v0  ;;  %8094 = vmatprep.subr.bf16.mxu1 %v9881_v32  ;;  %v10064_v0 = vcombine.low %v4953_v54, %v4957_v10  ;;  %v9833_v32 = vcombine.high %v4721_v58, %v4725_v29  ;;  %v4813_v60 = vld [vmem:[#allocation10 + $0x6f0] sm:$0xff]  ;;  %v4650_v54 = vld [vmem:[#allocation10 + $0x1d8] sm:$0xff] }
 0x468   :  { %8145 = vmatprep.subr.bf16.mxu0 %v9977_v33  ;;  %v10057_v33 = vcombine.high %v4945_v5, %v4949_v41  ;;  %v4654_v10 = vld [vmem:[#allocation10 + $0x1f8] sm:$0xff] }
 0x46a   :  { %8095 = vmatpush1.bf16.msra.mxu1 %v9880_v9  ;;  %v9832_v9 = vcombine.low %v4721_v58, %v4725_v29  ;;  %v4801_v58 = vld [vmem:[#allocation10 + $0x690] sm:$0xff] }
 0x46b   :  { %8146 = vmatpush1.bf16.msra.mxu0 %v9976_v4  ;;  %8096 = vmatprep.subr.bf16.mxu1 %v9873_v17  ;;  %v10056_v4 = vcombine.low %v4945_v5, %v4949_v41  ;;  %v9953_v17 = vcombine.high %v4841_v55, %v4845_v2  ;;  %v4805_v29 = vld [vmem:[#allocation10 + $0x6b0] sm:$0xff]  ;;  %v4642_v5 = vld [vmem:[#allocation10 + $0x198] sm:$0xff] }
 0x46c   :  { %8147 = vmatprep.subr.bf16.mxu0 %v9969_v11  ;;  %v10049_v11 = vcombine.high %v4937_v1, %v4941_v36  ;;  %v4646_v41 = vld [vmem:[#allocation10 + $0x1b8] sm:$0xff] }
 0x46e   :  { %8097 = vmatpush1.bf16.msra.mxu1 %v9872_v61  ;;  %v9952_v61 = vcombine.low %v4841_v55, %v4845_v2  ;;  %v4793_v55 = vld [vmem:[#allocation10 + $0x650] sm:$0xff] }
 0x46f   :  { %8148 = vmatpush1.bf16.msra.mxu0 %v9968_v51  ;;  %8098 = vmatprep.subr.bf16.mxu1 %v9865_v47  ;;  %v10048_v51 = vcombine.low %v4937_v1, %v4941_v36  ;;  %v9945_v47 = vcombine.high %v4833_v22, %v4837_v43  ;;  %v4797_v2 = vld [vmem:[#allocation10 + $0x670] sm:$0xff]  ;;  %v4634_v1 = vld [vmem:[#allocation10 + $0x158] sm:$0xff] }
 0x470   :  { %8149 = vmatprep.subr.bf16.mxu0 %v9961_v26  ;;  %v10041_v26 = vcombine.high %v4929_v35, %v4933_v44  ;;  %v4638_v36 = vld [vmem:[#allocation10 + $0x178] sm:$0xff] }
 0x472   :  { %8099 = vmatpush1.bf16.msra.mxu1 %v9864_v19  ;;  %v9944_v19 = vcombine.low %v4833_v22, %v4837_v43  ;;  %v4785_v22 = vld [vmem:[#allocation10 + $0x610] sm:$0xff] }
 0x473   :  { %8150 = vmatpush1.bf16.msra.mxu0 %v9960_v20  ;;  %8100 = vmatprep.subr.bf16.mxu1 %v9857_v49  ;;  %v10040_v20 = vcombine.low %v4929_v35, %v4933_v44  ;;  %v9937_v49 = vcombine.high %v4825_v24, %v4829_v45  ;;  %v4789_v43 = vld [vmem:[#allocation10 + $0x630] sm:$0xff]  ;;  %v4626_v35 = vld [vmem:[#allocation10 + $0x118] sm:$0xff] }
 0x474   :  { %8151 = vmatprep.subr.bf16.mxu0 %v10081_v25  ;;  %v10033_v25 = vcombine.high %v4921_v50, %v4925_v6  ;;  %v4630_v44 = vld [vmem:[#allocation10 + $0x138] sm:$0xff] }
 0x476   :  { %8101 = vmatpush1.bf16.msra.mxu1 %v9856_v27  ;;  %v9936_v27 = vcombine.low %v4825_v24, %v4829_v45  ;;  %v5033_v24 = vld [vmem:[#allocation10 + $0xdd0] sm:$0xff] }
 0x477   :  { %8152 = vmatpush2.bf16.msra.mxu0 %v10080_v8  ;;  %8102 = vmatprep.subr.bf16.mxu1 %v9849_v59  ;;  %v10032_v8 = vcombine.low %v4921_v50, %v4925_v6  ;;  %v9929_v59 = vcombine.high %v4817_v21, %v4821_v30  ;;  %v5037_v45 = vld [vmem:[#allocation10 + $0xdf0] sm:$0xff]  ;;  %v4622_v50 = vld [vmem:[#allocation10 + $0xf8] sm:$0xff]  ;;  %v9896_v6 = vcombine.low %v4785_v22, %v4789_v43 }
 0x478   :  { %8153 = vmatprep.subr.bf16.mxu0 %v10073_v46  ;;  %v10025_v46 = vcombine.high %v4913_v52, %v4917_v23 }
 0x47a   :  { %8103 = vmatpush1.bf16.msra.mxu1 %v9848_v39  ;;  %v9928_v39 = vcombine.low %v4817_v21, %v4821_v30  ;;  %v5029_v21 = vld [vmem:[#allocation10 + $0xdb0] sm:$0xff]  ;;  %v4610_v30 = vld [vmem:[#allocation10 + $0x98] sm:$0xff] }
 0x47b   :  { %8154 = vmatpush2.bf16.msra.mxu0 %v10072_v57  ;;  %8104 = vmatprep.subr.bf16.mxu1 %v9841_v53  ;;  %v10024_v57 = vcombine.low %v4913_v52, %v4917_v23  ;;  %v9921_v53 = vcombine.high %v4809_v38, %v4813_v60  ;;  %v4614_v52 = vld [vmem:[#allocation10 + $0xb8] sm:$0xff]  ;;  %v10144_v23 = vcombine.low %v5033_v24, %v5037_v45 }
 0x47c   :  { %8155 = vmatprep.subr.bf16.mxu0 %v10065_v40  ;;  %v9763_v40 = vcombine.high %v4650_v54, %v4654_v10 }
 0x47e   :  { %8105 = vmatpush1.bf16.msra.mxu1 %v9840_v62  ;;  %v9920_v62 = vcombine.low %v4809_v38, %v4813_v60  ;;  %v5021_v38 = vld [vmem:[#allocation10 + $0xd70] sm:$0xff]  ;;  %v4602_v60 = vld [vmem:[#allocation10 + $0x58] sm:$0xff] }
 0x47f   :  { %8156 = vmatpush2.bf16.msra.mxu0 %v10064_v0  ;;  %8106 = vmatprep.subr.bf16.mxu1 %v9833_v32  ;;  %v9762_v0 = vcombine.low %v4650_v54, %v4654_v10  ;;  %v9913_v32 = vcombine.high %v4801_v58, %v4805_v29  ;;  %v4606_v54 = vld [vmem:[#allocation10 + $0x78] sm:$0xff] }
 0x480   :  { %8157 = vmatprep.subr.bf16.mxu0 %v10057_v33  ;;  %v9755_v33 = vcombine.high %v4642_v5, %v4646_v41 }
 0x482   :  { %8107 = vmatpush1.bf16.msra.mxu1 %v9832_v9  ;;  %v9912_v9 = vcombine.low %v4801_v58, %v4805_v29  ;;  %v5013_v58 = vld [vmem:[#allocation10 + $0xd30] sm:$0xff]  ;;  %v4594_v29 = vld [vmem:[#allocation10 + $0x18] sm:$0xff] }
 0x483   :  { %8158 = vmatpush2.bf16.msra.mxu0 %v10056_v4  ;;  %8108 = vmatprep.subr.bf16.mxu1 %v9953_v17  ;;  %v9754_v4 = vcombine.low %v4642_v5, %v4646_v41  ;;  %v9905_v17 = vcombine.high %v4793_v55, %v4797_v2  ;;  %v4598_v5 = vld [vmem:[#allocation10 + $0x38] sm:$0xff] }
 0x484   :  { %8159 = vmatprep.subr.bf16.mxu0 %v10049_v11  ;;  %v9747_v11 = vcombine.high %v4634_v1, %v4638_v36 }
 0x486   :  { %8109 = vmatpush2.bf16.msra.mxu1 %v9952_v61  ;;  %v9904_v61 = vcombine.low %v4793_v55, %v4797_v2  ;;  %v5005_v55 = vld [vmem:[#allocation10 + $0xcf0] sm:$0xff]  ;;  %v4714_v2 = vld [vmem:[#allocation10 + $0x3d8] sm:$0xff] }
 0x487   :  { %8160 = vmatpush2.bf16.msra.mxu0 %v10048_v51  ;;  %8110 = vmatprep.subr.bf16.mxu1 %v9945_v47  ;;  %v9746_v51 = vcombine.low %v4634_v1, %v4638_v36  ;;  %v9897_v47 = vcombine.high %v4785_v22, %v4789_v43  ;;  %v4718_v1 = vld [vmem:[#allocation10 + $0x3f8] sm:$0xff]  ;;  %v4997_v22 = vld [vmem:[#allocation10 + $0xcb0] sm:$0xff] }
 0x488   :  { %8161 = vmatprep.subr.bf16.mxu0 %v10041_v26  ;;  %v9739_v26 = vcombine.high %v4626_v35, %v4630_v44  ;;  %v4706_v43 = vld [vmem:[#allocation10 + $0x398] sm:$0xff] }
 0x48a   :  { %8111 = vmatpush2.bf16.msra.mxu1 %v9944_v19  ;;  %v9738_v19 = vcombine.low %v4626_v35, %v4630_v44  ;;  %v4710_v35 = vld [vmem:[#allocation10 + $0x3b8] sm:$0xff] }
 0x48b   :  { %8162 = vmatpush2.bf16.msra.mxu0 %v10040_v20  ;;  %8112 = vmatprep.subr.bf16.mxu1 %v9937_v49  ;;  %v10145_v20 = vcombine.high %v5033_v24, %v5037_v45  ;;  %v4989_v24 = vld [vmem:[#allocation10 + $0xc70] sm:$0xff]  ;;  %v4698_v45 = vld [vmem:[#allocation10 + $0x358] sm:$0xff] }
 0x48c   :  { %8163 = vmatprep.subr.bf16.mxu0 %v10033_v25  ;;  %v5025_v25 = vld [vmem:[#allocation10 + $0xd90] sm:$0xff] }
 0x48d   :  { %v10136_v10 = vcombine.low %v5025_v25, %v5029_v21 }
 0x48e   :  { %8113 = vmatpush2.bf16.msra.mxu1 %v9936_v27 }
 0x48f   :  { %8164 = vmatpush2.bf16.msra.mxu0 %v10032_v8  ;;  %8114 = vmatprep.subr.bf16.mxu1 %v9929_v59  ;;  %v10137_v8 = vcombine.high %v5025_v25, %v5029_v21  ;;  %v9723_v59 = vcombine.high %v4610_v30, %v4614_v52  ;;  %v4981_v25 = vld [vmem:[#allocation10 + $0xc30] sm:$0xff]  ;;  %v4690_v21 = vld [vmem:[#allocation10 + $0x318] sm:$0xff] }
 0x490   :  { %8165 = vmatprep.subr.bf16.mxu0 %v10025_v46  ;;  %v5017_v46 = vld [vmem:[#allocation10 + $0xd50] sm:$0xff] }
 0x491   :  { %v10128_v41 = vcombine.low %v5017_v46, %v5021_v38 }
 0x492   :  { %8115 = vmatpush2.bf16.msra.mxu1 %v9928_v39  ;;  %v9722_v39 = vcombine.low %v4610_v30, %v4614_v52  ;;  %v4694_v30 = vld [vmem:[#allocation10 + $0x338] sm:$0xff] }
 0x493   :  { %8166 = vmatpush2.bf16.msra.mxu0 %v10024_v57  ;;  %8116 = vmatprep.subr.bf16.mxu1 %v9921_v53  ;;  %v10129_v57 = vcombine.high %v5017_v46, %v5021_v38  ;;  %v9715_v53 = vcombine.high %v4602_v60, %v4606_v54  ;;  %v5101_v46 = vld [vmem:[#allocation10 + $0xff0] sm:$0xff]  ;;  %v4682_v38 = vld [vmem:[#allocation10 + $0x2d8] sm:$0xff] }
 0x494   :  { %8221 = vmatprep.subr.bf16.mxu0 %v9763_v40  ;;  %v5009_v40 = vld [vmem:[#allocation10 + $0xd10] sm:$0xff] }
 0x495   :  { %v10120_v36 = vcombine.low %v5009_v40, %v5013_v58 }
 0x496   :  { %8117 = vmatpush2.bf16.msra.mxu1 %v9920_v62  ;;  %8168 = vmatmul.mubr.bf16.vlgmr.msra.gmra.mxu0 %v10986_v7  ;;  %v9714_v62 = vcombine.low %v4602_v60, %v4606_v54  ;;  %v4686_v60 = vld [vmem:[#allocation10 + $0x2f8] sm:$0xff] }
 0x497   :  { %8222 = vmatpush1.bf16.msra.mxu0 %v9762_v0  ;;  %8253 = vmatprep.mubr.bf16.mxu0 %v10937_v56  ;;  %v4618_v56 = vld [vmem:[#allocation10 + $0xd8] sm:$0xff]  ;;  %v10121_v0 = vcombine.high %v5009_v40, %v5013_v58  ;;  %v5093_v40 = vld [vmem:[#allocation10 + $0xfb0] sm:$0xff] }
 0x498   :  { %8118 = vmatprep.subr.bf16.mxu1 %v9913_v32  ;;  %8223 = vmatprep.subr.bf16.mxu0 %v9755_v33  ;;  %v9731_v49 = vcombine.high %v4618_v56, %v4622_v50  ;;  %v9730_v27 = vcombine.low %v4618_v56, %v4622_v50  ;;  %v9707_v32 = vcombine.high %v4594_v29, %v4598_v5  ;;  %v5001_v33 = vld [vmem:[#allocation10 + $0xcd0] sm:$0xff]  ;;  %v4702_v56 = vld [vmem:[#allocation10 + $0x378] sm:$0xff] }
 0x499   :  { %v10112_v44 = vcombine.low %v5001_v33, %v5005_v55  ;;  %v4674_v58 = vld [vmem:[#allocation10 + $0x298] sm:$0xff] }
 0x49a   :  { %8119 = vmatpush2.bf16.msra.mxu1 %v9912_v9  ;;  %v9706_v9 = vcombine.low %v4594_v29, %v4598_v5  ;;  %v4678_v29 = vld [vmem:[#allocation10 + $0x2b8] sm:$0xff] }
 0x49b   :  { %8224 = vmatpush1.bf16.msra.mxu0 %v9754_v4  ;;  %8120 = vmatprep.subr.bf16.mxu1 %v9905_v17  ;;  %v10113_v4 = vcombine.high %v5001_v33, %v5005_v55  ;;  %v9827_v17 = vcombine.high %v4714_v2, %v4718_v1  ;;  %v5085_v33 = vld [vmem:[#allocation10 + $0xf70] sm:$0xff]  ;;  %v4666_v55 = vld [vmem:[#allocation10 + $0x258] sm:$0xff] }
 0x49c   :  { %8225 = vmatprep.subr.bf16.mxu0 %v9747_v11  ;;  %v4993_v11 = vld [vmem:[#allocation10 + $0xc90] sm:$0xff] }
 0x49d   :  { %v10104_v50 = vcombine.low %v4993_v11, %v4997_v22 }
 0x49e   :  { %8121 = vmatpush2.bf16.msra.mxu1 %v9904_v61  ;;  %v9826_v61 = vcombine.low %v4714_v2, %v4718_v1  ;;  %v4670_v2 = vld [vmem:[#allocation10 + $0x278] sm:$0xff] }
 0x49f   :  { %8226 = vmatpush1.bf16.msra.mxu0 %v9746_v51  ;;  %8122 = vmatprep.subr.bf16.mxu1 %v9897_v47  ;;  %v10105_v51 = vcombine.high %v4993_v11, %v4997_v22  ;;  %v9819_v47 = vcombine.high %v4706_v43, %v4710_v35  ;;  %v5077_v11 = vld [vmem:[#allocation10 + $0xf30] sm:$0xff]  ;;  %v4658_v22 = vld [vmem:[#allocation10 + $0x218] sm:$0xff] }
 0x4a0   :  { %8227 = vmatprep.subr.bf16.mxu0 %v9739_v26  ;;  %v4985_v26 = vld [vmem:[#allocation10 + $0xc50] sm:$0xff] }
 0x4a1   :  { %v10096_v52 = vcombine.low %v4985_v26, %v4989_v24 }
 0x4a2   :  { %8123 = vmatpush2.bf16.msra.mxu1 %v9896_v6  ;;  %v9818_v6 = vcombine.low %v4706_v43, %v4710_v35  ;;  %v4662_v43 = vld [vmem:[#allocation10 + $0x238] sm:$0xff] }
 0x4a3   :  { %8228 = vmatpush1.bf16.msra.mxu0 %v9738_v19  ;;  %8178 = vmatprep.subr.bf16.mxu1 %v10145_v20  ;;  %v10097_v19 = vcombine.high %v4985_v26, %v4989_v24  ;;  %v9811_v20 = vcombine.high %v4698_v45, %v4702_v56  ;;  %v5069_v26 = vld [vmem:[#allocation10 + $0xef0] sm:$0xff]  ;;  %v4906_v24 = vld [vmem:[#allocation10 + $0x9d8] sm:$0xff] }
 0x4a4   :  { %8229 = vmatprep.subr.bf16.mxu0 %v9731_v49  ;;  %v4977_v49 = vld [vmem:[#allocation10 + $0xc10] sm:$0xff] }
 0x4a5   :  { %8125 = vmatmul.mubr.bf16.vlgmr.msra.gmra.mxu1 %v10915_v37  ;;  %v10088_v54 = vcombine.low %v4977_v49, %v4981_v25 }
 0x4a6   :  { %8179 = vmatpush1.bf16.msra.mxu1 %v10144_v23  ;;  %8210 = vmatprep.mubr.bf16.mxu1 %v10994_v3  ;;  %v9810_v23 = vcombine.low %v4698_v45, %v4702_v56  ;;  %v4910_v45 = vld [vmem:[#allocation10 + $0x9f8] sm:$0xff] }
 0x4a7   :  { %8230 = vmatpush1.bf16.msra.mxu0 %v9730_v27  ;;  %8180 = vmatprep.subr.bf16.mxu1 %v10137_v8  ;;  %v10089_v27 = vcombine.high %v4977_v49, %v4981_v25  ;;  %v9803_v8 = vcombine.high %v4690_v21, %v4694_v30  ;;  %v5061_v49 = vld [vmem:[#allocation10 + $0xeb0] sm:$0xff]  ;;  %v4898_v25 = vld [vmem:[#allocation10 + $0x998] sm:$0xff] }
 0x4a8   :  { %8231 = vmatprep.subr.bf16.mxu0 %v9723_v59  ;;  %v5097_v59 = vld [vmem:[#allocation10 + $0xfd0] sm:$0xff] }
 0x4a9   :  { %v10208_v5 = vcombine.low %v5097_v59, %v5101_v46 }
 0x4aa   :  { %8181 = vmatpush1.bf16.msra.mxu1 %v10136_v10  ;;  %v9802_v10 = vcombine.low %v4690_v21, %v4694_v30  ;;  %v4902_v21 = vld [vmem:[#allocation10 + $0x9b8] sm:$0xff] }
 0x4ab   :  { %8232 = vmatpush1.bf16.msra.mxu0 %v9722_v39  ;;  %8182 = vmatprep.subr.bf16.mxu1 %v10129_v57  ;;  %v10209_v39 = vcombine.high %v5097_v59, %v5101_v46  ;;  %v9795_v57 = vcombine.high %v4682_v38, %v4686_v60  ;;  %v5053_v59 = vld [vmem:[#allocation10 + $0xe70] sm:$0xff]  ;;  %v4890_v46 = vld [vmem:[#allocation10 + $0x958] sm:$0xff] }
 0x4ac   :  { %8233 = vmatprep.subr.bf16.mxu0 %v9715_v53  ;;  %v5089_v53 = vld [vmem:[#allocation10 + $0xf90] sm:$0xff] }
 0x4ad   :  { %v10200_v1 = vcombine.low %v5089_v53, %v5093_v40 }
 0x4ae   :  { %8183 = vmatpush1.bf16.msra.mxu1 %v10128_v41  ;;  %v9794_v41 = vcombine.low %v4682_v38, %v4686_v60  ;;  %v4894_v38 = vld [vmem:[#allocation10 + $0x978] sm:$0xff] }
 0x4af   :  { %8234 = vmatpush1.bf16.msra.mxu0 %v9714_v62  ;;  %8184 = vmatprep.subr.bf16.mxu1 %v10121_v0  ;;  %v10201_v62 = vcombine.high %v5089_v53, %v5093_v40  ;;  %v9787_v0 = vcombine.high %v4674_v58, %v4678_v29  ;;  %v5045_v53 = vld [vmem:[#allocation10 + $0xe30] sm:$0xff]  ;;  %v4882_v40 = vld [vmem:[#allocation10 + $0x918] sm:$0xff] }
 0x4b0   :  { %8235 = vmatprep.subr.bf16.mxu0 %v9707_v32  ;;  %v5081_v32 = vld [vmem:[#allocation10 + $0xf50] sm:$0xff] }
 0x4b1   :  { %v10192_v35 = vcombine.low %v5081_v32, %v5085_v33 }
 0x4b2   :  { %8185 = vmatpush1.bf16.msra.mxu1 %v10120_v36  ;;  %v9786_v36 = vcombine.low %v4674_v58, %v4678_v29  ;;  %v4886_v58 = vld [vmem:[#allocation10 + $0x938] sm:$0xff] }
 0x4b3   :  { %8236 = vmatpush1.bf16.msra.mxu0 %v9706_v9  ;;  %8186 = vmatprep.subr.bf16.mxu1 %v10113_v4  ;;  %v10193_v9 = vcombine.high %v5081_v32, %v5085_v33  ;;  %v9779_v4 = vcombine.high %v4666_v55, %v4670_v2  ;;  %v4878_v32 = vld [vmem:[#allocation10 + $0x8f8] sm:$0xff] }
 0x4b4   :  { %8237 = vmatprep.subr.bf16.mxu0 %v9827_v17  ;;  %v5073_v17 = vld [vmem:[#allocation10 + $0xf10] sm:$0xff] }
 0x4b5   :  { %v10184_v56 = vcombine.low %v5073_v17, %v5077_v11 }
 0x4b6   :  { %8187 = vmatpush1.bf16.msra.mxu1 %v10112_v44  ;;  %v9778_v44 = vcombine.low %v4666_v55, %v4670_v2  ;;  %v9994_v55 = vcombine.low %v4882_v40, %v4886_v58 }
 0x4b7   :  { %8238 = vmatpush2.bf16.msra.mxu0 %v9826_v61  ;;  %8188 = vmatprep.subr.bf16.mxu1 %v10105_v51  ;;  %v10185_v61 = vcombine.high %v5073_v17, %v5077_v11  ;;  %v9771_v51 = vcombine.high %v4658_v22, %v4662_v43  ;;  %v4870_v17 = vld [vmem:[#allocation10 + $0x8b8] sm:$0xff] }
 0x4b8   :  { %8239 = vmatprep.subr.bf16.mxu0 %v9819_v47  ;;  %v5065_v47 = vld [vmem:[#allocation10 + $0xed0] sm:$0xff] }
 0x4b9   :  { %v10176_v30 = vcombine.low %v5065_v47, %v5069_v26 }
 0x4ba   :  { %8189 = vmatpush1.bf16.msra.mxu1 %v10104_v50  ;;  %v9770_v50 = vcombine.low %v4658_v22, %v4662_v43 }
 0x4bb   :  { %8240 = vmatpush2.bf16.msra.mxu0 %v9818_v6  ;;  %8190 = vmatprep.subr.bf16.mxu1 %v10097_v19  ;;  %v10177_v6 = vcombine.high %v5065_v47, %v5069_v26  ;;  %v10019_v19 = vcombine.high %v4906_v24, %v4910_v45  ;;  %v4862_v47 = vld [vmem:[#allocation10 + $0x878] sm:$0xff] }
 0x4bc   :  { %8241 = vmatprep.subr.bf16.mxu0 %v9811_v20  ;;  %v5057_v20 = vld [vmem:[#allocation10 + $0xe90] sm:$0xff] }
 0x4bd   :  { %v10168_v60 = vcombine.low %v5057_v20, %v5061_v49 }
 0x4be   :  { %8191 = vmatpush1.bf16.msra.mxu1 %v10096_v52  ;;  %v10018_v52 = vcombine.low %v4906_v24, %v4910_v45 }
 0x4bf   :  { %8242 = vmatpush2.bf16.msra.mxu0 %v9810_v23  ;;  %8192 = vmatprep.subr.bf16.mxu1 %v10089_v27  ;;  %v10169_v23 = vcombine.high %v5057_v20, %v5061_v49  ;;  %v10011_v27 = vcombine.high %v4898_v25, %v4902_v21  ;;  %v4854_v20 = vld [vmem:[#allocation10 + $0x838] sm:$0xff] }
 0x4c0   :  { %8243 = vmatprep.subr.bf16.mxu0 %v9803_v8  ;;  %v5049_v8 = vld [vmem:[#allocation10 + $0xe50] sm:$0xff] }
 0x4c1   :  { %v10160_v29 = vcombine.low %v5049_v8, %v5053_v59 }
 0x4c2   :  { %8193 = vmatpush1.bf16.msra.mxu1 %v10088_v54  ;;  %v10010_v54 = vcombine.low %v4898_v25, %v4902_v21 }
 0x4c3   :  { %8244 = vmatpush2.bf16.msra.mxu0 %v9802_v10  ;;  %8194 = vmatprep.subr.bf16.mxu1 %v10209_v39  ;;  %v10161_v10 = vcombine.high %v5049_v8, %v5053_v59  ;;  %v10003_v39 = vcombine.high %v4890_v46, %v4894_v38  ;;  %v11020_v8 = vpop.f32.mrf.mxu0 }
 0x4c4   :  { %8245 = vmatprep.subr.bf16.mxu0 %v9795_v57  ;;  %v5041_v57 = vld [vmem:[#allocation10 + $0xe10] sm:$0xff] }
 0x4c5   :  { %v10152_v33 = vcombine.low %v5041_v57, %v5045_v53 }
 0x4c6   :  { %8195 = vmatpush2.bf16.msra.mxu1 %v10208_v5  ;;  %v10002_v5 = vcombine.low %v4890_v46, %v4894_v38 }
 0x4c7   :  { %8246 = vmatpush2.bf16.msra.mxu0 %v9794_v41  ;;  %8196 = vmatprep.subr.bf16.mxu1 %v10201_v62  ;;  %v10153_v41 = vcombine.high %v5041_v57, %v5045_v53  ;;  %v4778_v62 = vld [vmem:[#allocation10 + $0x5d8] sm:$0xff] }
 0x4c8   :  { %8247 = vmatprep.subr.bf16.mxu0 %v9787_v0  ;;  %v4782_v0 = vld [vmem:[#allocation10 + $0x5f8] sm:$0xff] }
 0x4c9   :  { %v9891_v2 = vcombine.high %v4778_v62, %v4782_v0  ;;  %v9890_v11 = vcombine.low %v4778_v62, %v4782_v0  ;;  %v4962_v57 = vld [vmem:[#allocation10 + $0xb98] sm:$0xff] }
 0x4ca   :  { %8197 = vmatpush2.bf16.msra.mxu1 %v10200_v1  ;;  %v4966_v53 = vld [vmem:[#allocation10 + $0xbb8] sm:$0xff] }
 0x4cb   :  { %8248 = vmatpush2.bf16.msra.mxu0 %v9786_v36  ;;  %8198 = vmatprep.subr.bf16.mxu1 %v10193_v9  ;;  %v4770_v36 = vld [vmem:[#allocation10 + $0x598] sm:$0xff] }
 0x4cc   :  { %8249 = vmatprep.subr.bf16.mxu0 %v9779_v4  ;;  %v4774_v9 = vld [vmem:[#allocation10 + $0x5b8] sm:$0xff] }
 0x4cd   :  { %v4866_v4 = vld [vmem:[#allocation10 + $0x898] sm:$0xff]  ;;  %v9883_v43 = vcombine.high %v4770_v36, %v4774_v9  ;;  %v9882_v26 = vcombine.low %v4770_v36, %v4774_v9 }
 0x4ce   :  { %8199 = vmatpush2.bf16.msra.mxu1 %v10192_v35  ;;  %v9979_v35 = vcombine.high %v4866_v4, %v4870_v17  ;;  %v9978_v24 = vcombine.low %v4866_v4, %v4870_v17  ;;  %v4730_v62 = vld [vmem:[#allocation10 + $0x458] sm:$0xff] }
 0x4cf   :  { %8250 = vmatpush2.bf16.msra.mxu0 %v9778_v44  ;;  %8200 = vmatprep.subr.bf16.mxu1 %v10185_v61  ;;  %v4762_v44 = vld [vmem:[#allocation10 + $0x558] sm:$0xff] }
 0x4d0   :  { %8251 = vmatprep.subr.bf16.mxu0 %v9771_v51  ;;  %v4766_v61 = vld [vmem:[#allocation10 + $0x578] sm:$0xff] }
 0x4d1   :  { %v4858_v51 = vld [vmem:[#allocation10 + $0x858] sm:$0xff]  ;;  %v9875_v45 = vcombine.high %v4762_v44, %v4766_v61  ;;  %v9874_v49 = vcombine.low %v4762_v44, %v4766_v61 }
 0x4d2   :  { %8201 = vmatpush2.bf16.msra.mxu1 %v10184_v56  ;;  %v9971_v56 = vcombine.high %v4858_v51, %v4862_v47  ;;  %v9970_v25 = vcombine.low %v4858_v51, %v4862_v47  ;;  %v4734_v0 = vld [vmem:[#allocation10 + $0x478] sm:$0xff] }
 0x4d3   :  { %8252 = vmatpush2.bf16.msra.mxu0 %v9770_v50  ;;  %8202 = vmatprep.subr.bf16.mxu1 %v10177_v6  ;;  %v4754_v50 = vld [vmem:[#allocation10 + $0x518] sm:$0xff] }
 0x4d4   :  { %8307 = vmatprep.subr.bf16.mxu0 %v10019_v19  ;;  %v4758_v6 = vld [vmem:[#allocation10 + $0x538] sm:$0xff] }
 0x4d5   :  { %v4850_v19 = vld [vmem:[#allocation10 + $0x818] sm:$0xff]  ;;  %v9867_v21 = vcombine.high %v4754_v50, %v4758_v6  ;;  %v9866_v59 = vcombine.low %v4754_v50, %v4758_v6 }
 0x4d6   :  { %8203 = vmatpush2.bf16.msra.mxu1 %v10176_v30  ;;  %8254 = vmatmul.mubr.bf16.vlgmr.msra.gmra.mxu0 %v10881_v13  ;;  %v9995_v13 = vcombine.high %v4882_v40, %v4886_v58  ;;  %v9963_v30 = vcombine.high %v4850_v19, %v4854_v20  ;;  %v9962_v46 = vcombine.low %v4850_v19, %v4854_v20  ;;  %v11024_v40 = vpop.f32.mrf.mxu0  ;;  %v4722_v4 = vld [vmem:[#allocation10 + $0x418] sm:$0xff] }
 0x4d7   :  { %8308 = vmatpush1.bf16.msra.mxu0 %v10018_v52  ;;  %8339 = vmatprep.mubr.bf16.mxu0 %v10965_v63  ;;  %v4874_v63 = vld [vmem:[#allocation10 + $0x8d8] sm:$0xff] }
 0x4d8   :  { %8204 = vmatprep.subr.bf16.mxu1 %v10169_v23  ;;  %8309 = vmatprep.subr.bf16.mxu0 %v10011_v27  ;;  %v9987_v1 = vcombine.high %v4874_v63, %v4878_v32  ;;  %v9986_v22 = vcombine.low %v4874_v63, %v4878_v32  ;;  %v4750_v52 = vld [vmem:[#allocation10 + $0x4f8] sm:$0xff] }
 0x4d9   :  { %v4970_v23 = vld [vmem:[#allocation10 + $0xbd8] sm:$0xff] }
 0x4da   :  { %8205 = vmatpush2.bf16.msra.mxu1 %v10168_v60  ;;  %v4974_v27 = vld [vmem:[#allocation10 + $0xbf8] sm:$0xff]  ;;  %v11022_v60 = vpop.f32.mrf.mxu1 }
 0x4db   :  { %8310 = vmatpush1.bf16.msra.mxu0 %v10010_v54  ;;  %8206 = vmatprep.subr.bf16.mxu1 %v10161_v10  ;;  %v10083_v54 = vcombine.high %v4970_v23, %v4974_v27  ;;  %v4738_v10 = vld [vmem:[#allocation10 + $0x498] sm:$0xff] }
 0x4dc   :  { %8311 = vmatprep.subr.bf16.mxu0 %v10003_v39  ;;  %v4742_v39 = vld [vmem:[#allocation10 + $0x4b8] sm:$0xff] }
 0x4dd   :  { %v4954_v63 = vld [vmem:[#allocation10 + $0xb58] sm:$0xff] }
 0x4de   :  { %8207 = vmatpush2.bf16.msra.mxu1 %v10160_v29  ;;  %v10082_v29 = vcombine.low %v4970_v23, %v4974_v27  ;;  %v4958_v32 = vld [vmem:[#allocation10 + $0xb78] sm:$0xff] }
 0x4df   :  { %8312 = vmatpush1.bf16.msra.mxu0 %v10002_v5  ;;  %8208 = vmatprep.subr.bf16.mxu1 %v10153_v41  ;;  %v9851_v5 = vcombine.high %v4738_v10, %v4742_v39  ;;  %v11026_v41 = vpop.f32.mrf.mxu1  ;;  %v10067_v9 = vcombine.high %v4954_v63, %v4958_v32  ;;  %v4726_v17 = vld [vmem:[#allocation10 + $0x438] sm:$0xff]  ;;  %v10066_v44 = vcombine.low %v4954_v63, %v4958_v32 }
 0x4e0   :  { %8313 = vmatprep.subr.bf16.mxu0 %v9995_v13  ;;  %v10075_v13 = vcombine.high %v4962_v57, %v4966_v53  ;;  %v9835_v61 = vcombine.high %v4722_v4, %v4726_v17  ;;  %v4942_v50 = vld [vmem:[#allocation10 + $0xaf8] sm:$0xff]  ;;  %v9834_v19 = vcombine.low %v4722_v4, %v4726_v17 }
 0x4e1   :  { %v11030_v36 = vpop.f32.mrf.mxu1  ;;  %v4930_v23 = vld [vmem:[#allocation10 + $0xa98] sm:$0xff] }
 0x4e2   :  { %8209 = vmatpush2.bf16.msra.mxu1 %v10152_v33  ;;  %v11028_v33 = vpop.f32.mrf.mxu0  ;;  %v4934_v27 = vld [vmem:[#allocation10 + $0xab8] sm:$0xff] }
 0x4e3   :  { %8314 = vmatpush1.bf16.msra.mxu0 %v9994_v55  ;;  %8264 = vmatprep.subr.bf16.mxu1 %v9891_v2  ;;  %v9850_v55 = vcombine.low %v4738_v10, %v4742_v39  ;;  %v10074_v2 = vcombine.low %v4962_v57, %v4966_v53  ;;  %v7788_v51 = vpop.f32.mrf.mxu1  ;;  %v10043_v57 = vcombine.high %v4930_v23, %v4934_v27  ;;  %v4826_v53 = vld [vmem:[#allocation10 + $0x758] sm:$0xff] }
 0x4e4   :  { %8315 = vmatprep.subr.bf16.mxu0 %v9987_v1  ;;  %v9843_v1 = vcombine.high %v4730_v62, %v4734_v0  ;;  %v10042_v63 = vcombine.low %v4930_v23, %v4934_v27  ;;  %v4914_v17 = vld [vmem:[#allocation10 + $0xa18] sm:$0xff] }
 0x4e5   :  { %8211 = vmatmul.mubr.bf16.vlgmr.msra.gmra.mxu1 %v10996_v34  ;;  %v11034_v6 = vpop.f32.mrf.mxu1 }
 0x4e6   :  { %8265 = vmatpush1.bf16.msra.mxu1 %v9890_v11  ;;  %8296 = vmatprep.mubr.bf16.mxu1 %v10940_v48  ;;  %v4746_v48 = vld [vmem:[#allocation10 + $0x4d8] sm:$0xff] }
 0x4e7   :  { %8316 = vmatpush1.bf16.msra.mxu0 %v9986_v22  ;;  %8266 = vmatprep.subr.bf16.mxu1 %v9883_v43  ;;  %v9859_v38 = vcombine.high %v4746_v48, %v4750_v52  ;;  %v9858_v58 = vcombine.low %v4746_v48, %v4750_v52  ;;  %v4946_v11 = vld [vmem:[#allocation10 + $0xb18] sm:$0xff]  ;;  %v7745_v43 = vpop.f32.mrf.mxu0  ;;  %v11036_v52 = vld [vmem:[#allocation11] sm:$0xff] }
 0x4e8   :  { %8317 = vmatprep.subr.bf16.mxu0 %v9979_v35  ;;  %v4950_v22 = vld [vmem:[#allocation10 + $0xb38] sm:$0xff]  ;;  %v9842_v35 = vcombine.low %v4730_v62, %v4734_v0 }
 0x4e9   :  { %v11032_v47 = vpop.f32.mrf.mxu0  ;;  %v10058_v20 = vcombine.low %v4946_v11, %v4950_v22  ;;  %v4838_v48 = vld [vmem:[#allocation10 + $0x7b8] sm:$0xff] }
 0x4ea   :  { %8267 = vmatpush1.bf16.msra.mxu1 %v9882_v26  ;;  %v10059_v26 = vcombine.high %v4946_v11, %v4950_v22  ;;  %v4918_v11 = vld [vmem:[#allocation10 + $0xa38] sm:$0xff] }
 0x4eb   :  { %8318 = vmatpush1.bf16.msra.mxu0 %v9978_v24  ;;  %8268 = vmatprep.subr.bf16.mxu1 %v9875_v45  ;;  %v4842_v24 = vld [vmem:[#allocation10 + $0x7d8] sm:$0xff] }
 0x4ec   :  { %8319 = vmatprep.subr.bf16.mxu0 %v9971_v56  ;;  %v4846_v45 = vld [vmem:[#allocation10 + $0x7f8] sm:$0xff] }
 0x4ed   :  { %v4938_v56 = vld [vmem:[#allocation10 + $0xad8] sm:$0xff] }
 0x4ee   :  { %8269 = vmatpush1.bf16.msra.mxu1 %v9874_v49  ;;  %v9955_v49 = vcombine.high %v4842_v24, %v4846_v45 }
 0x4ef   :  { %8320 = vmatpush1.bf16.msra.mxu0 %v9970_v25  ;;  %8270 = vmatprep.subr.bf16.mxu1 %v9867_v21  ;;  %v7827_v25 = vpop.f32.mrf.mxu0  ;;  %v10051_v21 = vcombine.high %v4938_v56, %v4942_v50 }
 0x4f0   :  { %8321 = vmatprep.subr.bf16.mxu0 %v9963_v30  ;;  %v4834_v30 = vld [vmem:[#allocation10 + $0x798] sm:$0xff] }
 0x4f1   :  { %v9947_v10 = vcombine.high %v4834_v30, %v4838_v48  ;;  %v11040_v39 = vpop.f32.mrf.mxu0 }
 0x4f2   :  { %8271 = vmatpush1.bf16.msra.mxu1 %v9866_v59  ;;  %v5112_v59 = vrot.slane %v11036_v52, %v10762_v14  ;;  %v9946_v14 = vcombine.low %v4834_v30, %v4838_v48  ;;  %v4802_v30 = vld [vmem:[#allocation10 + $0x698] sm:$0xff] }
 0x4f3   :  { %8322 = vmatpush1.bf16.msra.mxu0 %v9962_v46  ;;  %8272 = vmatprep.subr.bf16.mxu1 %v9859_v38  ;;  %v7870_v46 = vpop.f32.mrf.mxu1  ;;  %v9954_v38 = vcombine.low %v4842_v24, %v4846_v45  ;;  %v4810_v24 = vld [vmem:[#allocation10 + $0x6d8] sm:$0xff] }
 0x4f4   :  { %8323 = vmatprep.subr.bf16.mxu0 %v10083_v54  ;;  %v10050_v54 = vcombine.low %v4938_v56, %v4942_v50  ;;  %v7742_v62 = vadd.f32 %v11024_v40, %v5112_v59  ;;  %v4814_v45 = vld [vmem:[#allocation10 + $0x6f8] sm:$0xff] }
 0x4f5   :  { %v11043_v0 = vpop.f32.mrf.mxu1  ;;  %v4806_v48 = vld [vmem:[#allocation10 + $0x6b8] sm:$0xff]  ;;  %v9922_v23 = vcombine.low %v4810_v24, %v4814_v45 }
 0x4f6   :  { %8273 = vmatpush1.bf16.msra.mxu1 %v9858_v58  ;;  %v4830_v58 = vld [vmem:[#allocation10 + $0x778] sm:$0xff]  ;;  %v7785_v22 = vadd.f32 %v11026_v41, %v7742_v62  ;;  %v10026_v41 = vcombine.low %v4914_v17, %v4918_v11 }
 0x4f7   :  { %8324 = vmatpush2.bf16.msra.mxu0 %v10082_v29  ;;  %8274 = vmatprep.subr.bf16.mxu1 %v9851_v5  ;;  %v7746_v29 = vadd.f32 %v7745_v43, %v5112_v59  ;;  %v4922_v5 = vld [vmem:[#allocation10 + $0xa58] sm:$0xff]  ;;  %v9939_v32 = vcombine.high %v4826_v53, %v4830_v58  ;;  %v7874_v43 = vpop.f32.mrf.mxu1  ;;  %v9938_v40 = vcombine.low %v4826_v53, %v4830_v58  ;;  %v10383_v59 = vld [vmem:[#allocation13 + $0x38] sm:$0xff]  }
 0x4f8   :  { %8325 = vmatprep.subr.bf16.mxu0 %v10075_v13  ;;  %v4926_v13 = vld [vmem:[#allocation10 + $0xa78] sm:$0xff]  ;;  %v7828_v56 = vadd.f32 %v7827_v25, %v7785_v22  ;;  %v9915_v25 = vcombine.high %v4802_v30, %v4806_v48  ;;  %v5108_v22 = vrot.slane %v11036_v52, %v10765_v15 }
 0x4f9   :  { %v7789_v4 = vadd.f32 %v7788_v51, %v7746_v29  ;;  %v10385_v53 = vld [vmem:[#allocation13 + $0x30] sm:$0xff]   ;;  %v10386_v29 = vld [vmem:[#allocation13 + $0x68] sm:$0xff]  }
 0x4fa   :  { %8275 = vmatpush1.bf16.msra.mxu1 %v9850_v55  ;;  %v7831_v55 = vpop.f32.mrf.mxu0 }
 0x4fb   :  { %8326 = vmatpush2.bf16.msra.mxu0 %v10074_v2  ;;  %8276 = vmatprep.subr.bf16.mxu1 %v9843_v1  ;;  %v10035_v2 = vcombine.high %v4922_v5, %v4926_v13  ;;  %v4818_v1 = vld [vmem:[#allocation10 + $0x718] sm:$0xff] }
 0x4fc   :  { %8327 = vmatprep.subr.bf16.mxu0 %v10067_v9  ;;  %v4822_v9 = vld [vmem:[#allocation10 + $0x738] sm:$0xff] }
 0x4fd   :  { %v9930_v51 = vcombine.low %v4818_v1, %v4822_v9 }
 0x4fe   :  { %8277 = vmatpush1.bf16.msra.mxu1 %v9842_v35  ;;  %v7832_v35 = vadd.f32 %v7831_v55, %v7789_v4  ;;  %v5034_v55 = vld [vmem:[#allocation10 + $0xdd8] sm:$0xff]  ;;  %v10390_v4 = vld [vmem:[#allocation13 + $0x58] sm:$0xff]  }
 0x4ff   :  { %8328 = vmatpush2.bf16.msra.mxu0 %v10066_v44  ;;  %8278 = vmatprep.subr.bf16.mxu1 %v9835_v61  ;;  %v10034_v44 = vcombine.low %v4922_v5, %v4926_v13  ;;  %v9931_v61 = vcombine.high %v4818_v1, %v4822_v9  ;;  %v4786_v5 = vld [vmem:[#allocation10 + $0x618] sm:$0xff]  ;;  %v10389_v1 = vld [vmem:[#allocation13 + $0x20] sm:$0xff]  }
 0x500   :  { %8329 = vmatprep.subr.bf16.mxu0 %v10059_v26  ;;  %v10027_v26 = vcombine.high %v4914_v17, %v4918_v11  ;;  %v7875_v50 = vadd.f32 %v7874_v43, %v7832_v35  ;;  %v4790_v13 = vld [vmem:[#allocation10 + $0x638] sm:$0xff] }
 0x501   :  { %v5026_v17 = vld [vmem:[#allocation10 + $0xd98] sm:$0xff] }
 0x502   :  { %8279 = vmatpush1.bf16.msra.mxu1 %v9834_v19  ;;  %v7871_v19 = vadd.f32 %v7870_v46, %v7828_v56  ;;  %v4798_v46 = vld [vmem:[#allocation10 + $0x678] sm:$0xff] }
 0x503   :  { %8330 = vmatpush2.bf16.msra.mxu0 %v10058_v20  ;;  %8280 = vmatprep.subr.bf16.mxu1 %v9955_v49  ;;  %v9923_v20 = vcombine.high %v4810_v24, %v4814_v45  ;;  %v10382_v49 = vld [vmem:[#allocation13 + $0x78] sm:$0xff]   ;;  %v5030_v11 = vld [vmem:[#allocation10 + $0xdb8] sm:$0xff]  ;;  %v7740_v45 = vadd.f32 %v11020_v8, %v5108_v22 }
 0x504   :  { %8331 = vmatprep.subr.bf16.mxu0 %v10051_v21  ;;  %v8402_v21 = vmax.f32 %v7875_v50, 0.0  ;;  %v8394_v27 = vmax.f32 %v7871_v19, 0.0  ;;  %v10139_v35 = vcombine.high %v5026_v17, %v5030_v11  ;;  %v5022_v24 = vld [vmem:[#allocation10 + $0xd78] sm:$0xff]  ;;  %v10138_v15 = vcombine.low %v5026_v17, %v5030_v11  ;;  %v11059_v11 = vpop.f32.mrf.mxu0 }
 0x505   :  { %v10393_v56 = vld [vmem:[#allocation13 + $0x10] sm:$0xff]  }
 0x506   :  { %8281 = vmatpush2.bf16.msra.mxu1 %v9954_v38  ;;  %v10384_v38 = vld [vmem:[#allocation13 + $0x70] sm:$0xff]  }
 0x507   :  { %8332 = vmatpush2.bf16.msra.mxu0 %v10050_v54  ;;  %8282 = vmatprep.subr.bf16.mxu1 %v9947_v10  ;;  %v4794_v54 = vld [vmem:[#allocation10 + $0x658] sm:$0xff]  ;;  %v8410_v10 = vpack.c.bf16 %v8402_v21, %v8394_v27 }
 0x508   :  { %8333 = vmatprep.subr.bf16.mxu0 %v10043_v57  ;;  %v9914_v57 = vcombine.low %v4802_v30, %v4806_v48  ;;  %v9907_v58 = vcombine.high %v4794_v54, %v4798_v46  ;;  %v9906_v62 = vcombine.low %v4794_v54, %v4798_v46  ;;  %v5010_v19 = vld [vmem:[#allocation10 + $0xd18] sm:$0xff]  ;;  %v10414_v46 = vld [vmem:[#allocation13 + $0x178] sm:$0xff]  }
 0x509   :  { %v5002_v48 = vld [vmem:[#allocation10 + $0xcd8] sm:$0xff] }
 0x50a   :  { %8283 = vmatpush2.bf16.msra.mxu1 %v9946_v14  ;;  %v10387_v14 = vld [vmem:[#allocation13 + $0x28] sm:$0xff]   ;;  %v4998_v54 = vld [vmem:[#allocation10 + $0xcb8] sm:$0xff] }
 0x50b   :  { %8334 = vmatpush2.bf16.msra.mxu0 %v10042_v63  ;;  %8284 = vmatprep.subr.bf16.mxu1 %v9939_v32  ;;  %v9899_v63 = vcombine.high %v4786_v5, %v4790_v13  ;;  %v10388_v32 = vld [vmem:[#allocation13 + $0x60] sm:$0xff]  }
 0x50c   :  { %8335 = vmatprep.subr.bf16.mxu0 %v10035_v2  ;;  %v9898_v2 = vcombine.low %v4786_v5, %v4790_v13 }
 0x50e   :  { %8285 = vmatpush2.bf16.msra.mxu1 %v9938_v40  ;;  %v10391_v40 = vld [vmem:[#allocation13 + $0x18] sm:$0xff]  }
 0x50f   :  { %8336 = vmatpush2.bf16.msra.mxu0 %v10034_v44  ;;  %8286 = vmatprep.subr.bf16.mxu1 %v9931_v61  ;;  %v7744_v44 = vadd.f32 %v11028_v33, %v5108_v22  ;;  %v10392_v61 = vld [vmem:[#allocation13 + $0x50] sm:$0xff]   ;;  %v10394_v33 = vld [vmem:[#allocation13 + $0x48] sm:$0xff]   ;;  %v11061_v22 = vpop.f32.mrf.mxu1 }
 0x510   :  { %8337 = vmatprep.subr.bf16.mxu0 %v10027_v26  ;;  %v5018_v26 = vld [vmem:[#allocation10 + $0xd58] sm:$0xff] }
 0x511   :  { %v10131_v50 = vcombine.high %v5018_v26, %v5022_v24  ;;  %v10130_v8 = vcombine.low %v5018_v26, %v5022_v24  ;;  %v7913_v24 = vpop.f32.mrf.mxu0 }
 0x512   :  { %8287 = vmatpush2.bf16.msra.mxu1 %v9930_v51  ;;  %v7787_v51 = vadd.f32 %v11030_v36, %v7744_v44  ;;  %v10396_v36 = vld [vmem:[#allocation13 + $0x40] sm:$0xff]   ;;  %v5094_v44 = vld [vmem:[#allocation10 + $0xfb8] sm:$0xff] }
 0x513   :  { %8338 = vmatpush2.bf16.msra.mxu0 %v10026_v41  ;;  %8288 = vmatprep.subr.bf16.mxu1 %v9923_v20  ;;  %v5014_v41 = vld [vmem:[#allocation10 + $0xd38] sm:$0xff]  ;;  %v7783_v20 = vadd.f32 %v11022_v60, %v7740_v45  ;;  %v11063_v45 = vpop.f32.mrf.mxu1 }
 0x514   :  { %10277 = vmatprep.subr.bf16.mxu0 %v10382_v49  ;;  %v10123_v49 = vcombine.high %v5010_v19, %v5014_v41  ;;  %v10122_v60 = vcombine.low %v5010_v19, %v5014_v41  ;;  %v11065_v41 = vpop.f32.mrf.mxu0 }
 0x515   :  { %v7826_v21 = vadd.f32 %v11032_v47, %v7783_v20  ;;  %v11067_v20 = vpop.f32.mrf.mxu1 }
 0x516   :  { %8289 = vmatpush2.bf16.msra.mxu1 %v9922_v23  ;;  %8340 = vmatmul.mubr.bf16.vlgmr.msra.gmra.mxu0 %v10986_v7  ;;  %v5038_v7 = vld [vmem:[#allocation10 + $0xdf8] sm:$0xff] }
 0x517   :  { %10278 = vmatpush3.bf16.msra.mxu0 %v10383_v59  ;;  %8968 = vmatprep.mubr.bf16.mxu0 %v8410_v10  ;;  %v10147_v9 = vcombine.high %v5034_v55, %v5038_v7  ;;  %v10146_v43 = vcombine.low %v5034_v55, %v5038_v7  ;;  %v5006_v23 = vld [vmem:[#allocation10 + $0xcf8] sm:$0xff]  ;;  %v7869_v27 = vadd.f32 %v11034_v6, %v7826_v21  ;;  %v10426_v21 = vld [vmem:[#allocation13 + $0x148] sm:$0xff]  }
 0x518   :  { %8290 = vmatprep.subr.bf16.mxu1 %v9915_v25  ;;  %10279 = vmatprep.subr.bf16.mxu0 %v10384_v38  ;;  %v10115_v59 = vcombine.high %v5002_v48, %v5006_v23  ;;  %v4994_v38 = vld [vmem:[#allocation10 + $0xc98] sm:$0xff] }
 0x519   :  { %v8393_v47 = vmax.f32 %v7869_v27, 0.0  ;;  %v10107_v10 = vcombine.high %v4994_v38, %v4998_v54  ;;  %v4986_v6 = vld [vmem:[#allocation10 + $0xc58] sm:$0xff]  ;;  %v10106_v5 = vcombine.low %v4994_v38, %v4998_v54  ;;  %v10427_v27 = vld [vmem:[#allocation13 + $0x108] sm:$0xff]  }
 0x51a   :  { %8291 = vmatpush2.bf16.msra.mxu1 %v9914_v57  ;;  %v10415_v57 = vld [vmem:[#allocation13 + $0x138] sm:$0xff]  }
 0x51b   :  { %10280 = vmatpush3.bf16.msra.mxu0 %v10385_v53  ;;  %8292 = vmatprep.subr.bf16.mxu1 %v9907_v58  ;;  %v4990_v58 = vld [vmem:[#allocation10 + $0xc78] sm:$0xff] }
 0x51c   :  { %10281 = vmatprep.subr.bf16.mxu0 %v10386_v29  ;;  %v10416_v29 = vld [vmem:[#allocation13 + $0x170] sm:$0xff]   ;;  %v10099_v13 = vcombine.high %v4986_v6, %v4990_v58  ;;  %v10098_v55 = vcombine.low %v4986_v6, %v4990_v58  ;;  %v5120_v6 = vrot.slane %v11036_v52, %v10768_v16 }
 0x51d   :  { %v5046_v16 = vld [vmem:[#allocation10 + $0xe38] sm:$0xff] }
 0x51e   :  { %8293 = vmatpush2.bf16.msra.mxu1 %v9906_v62  ;;  %v10417_v62 = vld [vmem:[#allocation13 + $0x130] sm:$0xff]  }
 0x51f   :  { %10282 = vmatpush3.bf16.msra.mxu0 %v10387_v14  ;;  %8294 = vmatprep.subr.bf16.mxu1 %v9899_v63  ;;  %v4978_v14 = vld [vmem:[#allocation10 + $0xc18] sm:$0xff] }
 0x520   :  { %10283 = vmatprep.subr.bf16.mxu0 %v10388_v32  ;;  %v4982_v63 = vld [vmem:[#allocation10 + $0xc38] sm:$0xff]  ;;  %v10418_v32 = vld [vmem:[#allocation13 + $0x168] sm:$0xff]  }
 0x521   :  { %v10091_v7 = vcombine.high %v4978_v14, %v4982_v63  ;;  %v10090_v17 = vcombine.low %v4978_v14, %v4982_v63 }
 0x522   :  { %8295 = vmatpush2.bf16.msra.mxu1 %v9898_v2  ;;  %v10419_v2 = vld [vmem:[#allocation13 + $0x128] sm:$0xff]  }
 0x523   :  { %10284 = vmatpush3.bf16.msra.mxu0 %v10389_v1  ;;  %8350 = vmatprep.subr.bf16.mxu1 %v10147_v9  ;;  %v5098_v1 = vld [vmem:[#allocation10 + $0xfd8] sm:$0xff] }
 0x524   :  { %10285 = vmatprep.subr.bf16.mxu0 %v10390_v4  ;;  %v5102_v9 = vld [vmem:[#allocation10 + $0xff8] sm:$0xff]  ;;  %v10420_v4 = vld [vmem:[#allocation13 + $0x160] sm:$0xff]  }
 0x525   :  { %8297 = vmatmul.mubr.bf16.vlgmr.msra.gmra.mxu1 %v10915_v37  ;;  %v7830_v37 = vadd.f32 %v11040_v39, %v7787_v51  ;;  %v10397_v39 = vld [vmem:[#allocation13] sm:$0xff]   ;;  %v10210_v26 = vcombine.low %v5098_v1, %v5102_v9  ;;  %v5086_v51 = vld [vmem:[#allocation10 + $0xf78] sm:$0xff] }
 0x526   :  { %8351 = vmatpush1.bf16.msra.mxu1 %v10146_v43  ;;  %8382 = vmatprep.mubr.bf16.mxu1 %v10994_v3  ;;  %v10395_v3 = vld [vmem:[#allocation13 + $0x8] sm:$0xff]   ;;  %v10211_v43 = vcombine.high %v5098_v1, %v5102_v9  ;;  %v5042_v9 = vld [vmem:[#allocation10 + $0xe18] sm:$0xff] }
 0x527   :  { %10286 = vmatpush3.bf16.msra.mxu0 %v10391_v40  ;;  %8352 = vmatprep.subr.bf16.mxu1 %v10139_v35  ;;  %v7873_v30 = vadd.f32 %v11043_v0, %v7830_v37  ;;  %v10114_v0 = vcombine.low %v5002_v48, %v5006_v23  ;;  %v10421_v40 = vld [vmem:[#allocation13 + $0x120] sm:$0xff]   ;;  %v5090_v35 = vld [vmem:[#allocation10 + $0xf98] sm:$0xff]  ;;  %v7960_v48 = vpop.f32.mrf.mxu1 }
 0x528   :  { %10287 = vmatprep.subr.bf16.mxu0 %v10392_v61  ;;  %v10422_v61 = vld [vmem:[#allocation13 + $0x158] sm:$0xff]   ;;  %v10202_v19 = vcombine.low %v5090_v35, %v5094_v44 }
 0x529   :  { %v8401_v25 = vmax.f32 %v7873_v30, 0.0  ;;  %v11071_v38 = vpop.f32.mrf.mxu1 }
 0x52a   :  { %8353 = vmatpush1.bf16.msra.mxu1 %v10138_v15  ;;  %v10203_v15 = vcombine.high %v5090_v35, %v5094_v44  ;;  %v10155_v35 = vcombine.high %v5042_v9, %v5046_v16 }
 0x52b   :  { %10288 = vmatpush3.bf16.msra.mxu0 %v10393_v56  ;;  %8354 = vmatprep.subr.bf16.mxu1 %v10131_v50  ;;  %v8409_v53 = vpack.c.bf16 %v8401_v25, %v8393_v47  ;;  %v10423_v56 = vld [vmem:[#allocation13 + $0x118] sm:$0xff]   ;;  %v5082_v50 = vld [vmem:[#allocation10 + $0xf58] sm:$0xff]  ;;  %v10429_v47 = vld [vmem:[#allocation13 + $0x100] sm:$0xff]  }
 0x52c   :  { %10289 = vmatprep.subr.bf16.mxu0 %v10394_v33  ;;  %v10424_v33 = vld [vmem:[#allocation13 + $0x150] sm:$0xff]   ;;  %v10195_v37 = vcombine.high %v5082_v50, %v5086_v51  ;;  %v10194_v30 = vcombine.low %v5082_v50, %v5086_v51 }
 0x52d   :  { %v10400_v51 = vld [vmem:[#allocation13 + $0xf0] sm:$0xff]  }
 0x52e   :  { %8355 = vmatpush1.bf16.msra.mxu1 %v10130_v8  ;;  %v10425_v8 = vld [vmem:[#allocation13 + $0x110] sm:$0xff]  }
 0x52f   :  { %10290 = vmatpush3.bf16.msra.mxu0 %v10395_v3  ;;  %8356 = vmatprep.subr.bf16.mxu1 %v10123_v49  ;;  %v5074_v3 = vld [vmem:[#allocation10 + $0xf18] sm:$0xff] }
 0x530   :  { %10291 = vmatprep.subr.bf16.mxu0 %v10396_v36  ;;  %v5078_v49 = vld [vmem:[#allocation10 + $0xf38] sm:$0xff]  ;;  %v7917_v36 = vpop.f32.mrf.mxu0 }
 0x531   :  { %v10187_v23 = vcombine.high %v5074_v3, %v5078_v49  ;;  %v10186_v54 = vcombine.low %v5074_v3, %v5078_v49  ;;  %v10404_v3 = vld [vmem:[#allocation13 + $0xe0] sm:$0xff]  }
 0x532   :  { %8357 = vmatpush1.bf16.msra.mxu1 %v10122_v60  ;;  %v5066_v60 = vld [vmem:[#allocation10 + $0xed8] sm:$0xff]  ;;  %v11069_v25 = vpop.f32.mrf.mxu0  ;;  %v10405_v49 = vld [vmem:[#allocation13 + $0xa0] sm:$0xff]  }
 0x533   :  { %10292 = vmatpush3.bf16.msra.mxu0 %v10397_v39  ;;  %8358 = vmatprep.subr.bf16.mxu1 %v10115_v59  ;;  %v5070_v39 = vld [vmem:[#allocation10 + $0xef8] sm:$0xff]  ;;  %v10428_v59 = vld [vmem:[#allocation13 + $0x140] sm:$0xff]  }
 0x534   :  { %10321 = vmatprep.subr.bf16.mxu0 %v10414_v46  ;;  %v10179_v46 = vcombine.high %v5066_v60, %v5070_v39  ;;  %v10178_v58 = vcombine.low %v5066_v60, %v5070_v39  ;;  %v10409_v60 = vld [vmem:[#allocation13 + $0x90] sm:$0xff]  }
 0x536   :  { %8359 = vmatpush1.bf16.msra.mxu1 %v10114_v0  ;;  %8969 = vmatmul.mubr.bf16.vlgmr.msra.gmra.mxu0 %v8409_v53  ;;  %v5058_v0 = vld [vmem:[#allocation10 + $0xe98] sm:$0xff]  ;;  %v8042_v53 = vpop.f32.mrf.mxu1 }
 0x537   :  { %8360 = vmatprep.subr.bf16.mxu1 %v10107_v10  ;;  %10322 = vmatpush3.bf16.msra.mxu0 %v10415_v57  ;;  %v5062_v10 = vld [vmem:[#allocation10 + $0xeb8] sm:$0xff]  ;;  %v7999_v57 = vpop.f32.mrf.mxu0 }
 0x538   :  { %10323 = vmatprep.subr.bf16.mxu0 %v10416_v29  ;;  %v10171_v29 = vcombine.high %v5058_v0, %v5062_v10  ;;  %v8044_v63 = vpop.f32.mrf.mxu1 }
 0x539   :  { %v8001_v14 = vpop.f32.mrf.mxu0 }
 0x53a   :  { %8361 = vmatpush1.bf16.msra.mxu1 %v10106_v5  ;;  %v7918_v5 = vadd.f32 %v7917_v36, %v5120_v6  ;;  %v10407_v36 = vld [vmem:[#allocation13 + $0x98] sm:$0xff]  }
 0x53b   :  { %8362 = vmatprep.subr.bf16.mxu1 %v10099_v13  ;;  %10324 = vmatpush3.bf16.msra.mxu0 %v10417_v62  ;;  %v5050_v13 = vld [vmem:[#allocation10 + $0xe58] sm:$0xff] }
 0x53c   :  { %10325 = vmatprep.subr.bf16.mxu0 %v10418_v32  ;;  %v5054_v62 = vld [vmem:[#allocation10 + $0xe78] sm:$0xff]  ;;  %v7914_v32 = vadd.f32 %v7913_v24, %v5120_v6  ;;  %v10154_v24 = vcombine.low %v5042_v9, %v5046_v16  ;;  %v5128_v9 = vrot.slane %v11036_v52, %v10802_v28  ;;  %v5124_v16 = vrot.slane %v11036_v52, %v10826_v42 }
 0x53d   :  { %v10432_v6 = vld [vmem:[#allocation13 + $0x1f0] sm:$0xff]  }
 0x53e   :  { %8363 = vmatpush1.bf16.msra.mxu1 %v10098_v55  ;;  %v7961_v55 = vadd.f32 %v7960_v48, %v7918_v5  ;;  %v7957_v1 = vadd.f32 %v11063_v45, %v7914_v32  ;;  %v10399_v45 = vld [vmem:[#allocation13 + $0xb8] sm:$0xff]   ;;  %v10408_v48 = vld [vmem:[#allocation13 + $0xd0] sm:$0xff]   ;;  %v10437_v5 = vld [vmem:[#allocation13 + $0x1a0] sm:$0xff]  }
 0x53f   :  { %8364 = vmatprep.subr.bf16.mxu1 %v10091_v7  ;;  %10326 = vmatpush3.bf16.msra.mxu0 %v10419_v2  ;;  %v10170_v7 = vcombine.low %v5058_v0, %v5062_v10  ;;  %v10163_v2 = vcombine.high %v5050_v13, %v5054_v62 }
 0x540   :  { %10327 = vmatprep.subr.bf16.mxu0 %v10420_v4  ;;  %v8003_v4 = vpop.f32.mrf.mxu0  ;;  %v8000_v44 = vadd.f32 %v7999_v57, %v7957_v1 }
 0x542   :  { %8365 = vmatpush1.bf16.msra.mxu1 %v10090_v17  ;;  %v8046_v17 = vpop.f32.mrf.mxu1 }
 0x543   :  { %8366 = vmatprep.subr.bf16.mxu1 %v10211_v43  ;;  %10328 = vmatpush3.bf16.msra.mxu0 %v10421_v40  ;;  %v8004_v43 = vadd.f32 %v8003_v4, %v7961_v55  ;;  %v10162_v40 = vcombine.low %v5050_v13, %v5054_v62  ;;  %v8083_v13 = vpop.f32.mrf.mxu0  ;;  %v10438_v62 = vld [vmem:[#allocation13 + $0x1d8] sm:$0xff]  }
 0x544   :  { %10329 = vmatprep.subr.bf16.mxu0 %v10422_v61 }
 0x545   :  { %v8047_v61 = vadd.f32 %v8046_v17, %v8004_v43 }
 0x546   :  { %8367 = vmatpush2.bf16.msra.mxu1 %v10210_v26  ;;  %v8043_v26 = vadd.f32 %v8042_v53, %v8000_v44 }
 0x547   :  { %8368 = vmatprep.subr.bf16.mxu1 %v10203_v15  ;;  %10330 = vmatpush3.bf16.msra.mxu0 %v10423_v56  ;;  %v10398_v15 = vld [vmem:[#allocation13 + $0xf8] sm:$0xff]   ;;  %v8404_v56 = vmax.f32 %v8047_v61, 0.0 }
 0x548   :  { %10331 = vmatprep.subr.bf16.mxu0 %v10424_v33  ;;  %v8396_v50 = vmax.f32 %v8043_v26, 0.0 }
 0x54a   :  { %8369 = vmatpush2.bf16.msra.mxu1 %v10202_v19  ;;  %v8412_v33 = vpack.c.bf16 %v8404_v56, %v8396_v50  ;;  %v10401_v19 = vld [vmem:[#allocation13 + $0xb0] sm:$0xff]  }
 0x54b   :  { %8370 = vmatprep.subr.bf16.mxu1 %v10195_v37  ;;  %10332 = vmatpush3.bf16.msra.mxu0 %v10425_v8  ;;  %v10402_v37 = vld [vmem:[#allocation13 + $0xe8] sm:$0xff]  }
 0x54c   :  { %10333 = vmatprep.subr.bf16.mxu0 %v10426_v21  ;;  %v10403_v8 = vld [vmem:[#allocation13 + $0xa8] sm:$0xff]   ;;  %v10406_v21 = vld [vmem:[#allocation13 + $0xd8] sm:$0xff]  }
 0x54e   :  { %8371 = vmatpush2.bf16.msra.mxu1 %v10194_v30  ;;  %v5116_v30 = vrot.slane %v11036_v52, %v10773_v18 }
 0x54f   :  { %8372 = vmatprep.subr.bf16.mxu1 %v10187_v23  ;;  %10334 = vmatpush3.bf16.msra.mxu0 %v10427_v27 }
 0x550   :  { %10335 = vmatprep.subr.bf16.mxu0 %v10428_v59  ;;  %v7912_v23 = vadd.f32 %v11059_v11, %v5116_v30  ;;  %v10410_v59 = vld [vmem:[#allocation13 + $0xc8] sm:$0xff]   ;;  %v10413_v11 = vld [vmem:[#allocation13 + $0x80] sm:$0xff]  }
 0x552   :  { %8373 = vmatpush2.bf16.msra.mxu1 %v10186_v54  ;;  %v7955_v39 = vadd.f32 %v11061_v22, %v7912_v23  ;;  %v10431_v22 = vld [vmem:[#allocation13 + $0x1b8] sm:$0xff]   ;;  %v10443_v23 = vld [vmem:[#allocation13 + $0x188] sm:$0xff]  }
 0x553   :  { %8374 = vmatprep.subr.bf16.mxu1 %v10179_v46  ;;  %10336 = vmatpush3.bf16.msra.mxu0 %v10429_v47  ;;  %v10411_v46 = vld [vmem:[#allocation13 + $0x88] sm:$0xff]  }
 0x554   :  { %v7998_v18 = vadd.f32 %v11069_v25, %v7955_v39  ;;  %v10434_v25 = vld [vmem:[#allocation13 + $0x1e8] sm:$0xff]  }
 0x556   :  { %8375 = vmatpush2.bf16.msra.mxu1 %v10178_v58  ;;  %v8041_v0 = vadd.f32 %v11071_v38, %v7998_v18  ;;  %v10433_v58 = vld [vmem:[#allocation13 + $0x1b0] sm:$0xff]   ;;  %v10436_v38 = vld [vmem:[#allocation13 + $0x1e0] sm:$0xff]  }
 0x557   :  { %8376 = vmatprep.subr.bf16.mxu1 %v10171_v29  ;;  %v10435_v29 = vld [vmem:[#allocation13 + $0x1a8] sm:$0xff]   ;;  %v10445_v18 = vld [vmem:[#allocation13 + $0x180] sm:$0xff]  }
 0x558   :  { %v8395_v57 = vmax.f32 %v8041_v0, 0.0 }
 0x55a   :  { %8377 = vmatpush2.bf16.msra.mxu1 %v10170_v7 }
 0x55b   :  { %8378 = vmatprep.subr.bf16.mxu1 %v10163_v2 }
 0x55e   :  { %8379 = vmatpush2.bf16.msra.mxu1 %v10162_v40 }
 0x55f   :  { %8380 = vmatprep.subr.bf16.mxu1 %v10155_v35  ;;  %v8084_v35 = vadd.f32 %v8083_v13, %v5124_v16 }
 0x562   :  { %8381 = vmatpush2.bf16.msra.mxu1 %v10154_v24 }
 0x563   :  { %10299 = vmatprep.subr.bf16.mxu1 %v10398_v15 }
 0x565   :  { %8383 = vmatmul.mubr.bf16.vlgmr.msra.gmra.mxu1 %v10996_v34  ;;  %v7916_v34 = vadd.f32 %v11065_v41, %v5116_v30  ;;  %v10412_v41 = vld [vmem:[#allocation13 + $0xc0] sm:$0xff]   ;;  %v8126_v55 = vpop.f32.mrf.mxu1 }
 0x566   :  { %10300 = vmatpush3.bf16.msra.mxu1 %v10399_v45  ;;  %9009 = vmatprep.mubr.bf16.mxu1 %v8412_v33  ;;  %v8127_v56 = vadd.f32 %v8126_v55, %v8084_v35 }
 0x567   :  { %10301 = vmatprep.subr.bf16.mxu1 %v10400_v51  ;;  %v7959_v27 = vadd.f32 %v11067_v20, %v7916_v34  ;;  %v10430_v20 = vld [vmem:[#allocation13 + $0x1f8] sm:$0xff]   ;;  %v8128_v2 = vpop.f32.mrf.mxu1  ;;  %v10440_v51 = vld [vmem:[#allocation13 + $0x1d0] sm:$0xff]  }
 0x569   :  { %v8002_v54 = vadd.f32 %v8001_v14, %v7959_v27  ;;  %v10439_v14 = vld [vmem:[#allocation13 + $0x198] sm:$0xff]   ;;  %v8130_v4 = vpop.f32.mrf.mxu1 }
 0x56a   :  { %10302 = vmatpush3.bf16.msra.mxu1 %v10401_v19  ;;  %v10441_v19 = vld [vmem:[#allocation13 + $0x190] sm:$0xff]  }
 0x56b   :  { %10303 = vmatprep.subr.bf16.mxu1 %v10402_v37  ;;  %v8045_v47 = vadd.f32 %v8044_v63, %v8002_v54  ;;  %v8085_v63 = vpop.f32.mrf.mxu0  ;;  %v8132_v44 = vpop.f32.mrf.mxu1  ;;  %v10444_v54 = vld [vmem:[#allocation13 + $0x1c0] sm:$0xff]  }
 0x56c   :  { %v8086_v43 = vadd.f32 %v8085_v63, %v5128_v9 }
 0x56d   :  { %v8403_v10 = vmax.f32 %v8045_v47, 0.0  ;;  %v8087_v32 = vpop.f32.mrf.mxu0 }
 0x56e   :  { %10304 = vmatpush3.bf16.msra.mxu1 %v10403_v8  ;;  %v8088_v40 = vadd.f32 %v8087_v32, %v5124_v16  ;;  %v8129_v26 = vadd.f32 %v8128_v2, %v8086_v43 }
 0x56f   :  { %10305 = vmatprep.subr.bf16.mxu1 %v10404_v3  ;;  %v8411_v53 = vpack.c.bf16 %v8403_v10, %v8395_v57  ;;  %v8089_v7 = vpop.f32.mrf.mxu0 }
 0x570   :  { %v8090_v61 = vadd.f32 %v8089_v7, %v5128_v9  ;;  %v8131_v24 = vadd.f32 %v8130_v4, %v8088_v40 }
 0x571   :  { %v8169_v1 = vpop.f32.mrf.mxu0 }
 0x572   :  { %10306 = vmatpush3.bf16.msra.mxu1 %v10405_v49  ;;  %v8133_v45 = vadd.f32 %v8132_v44, %v8090_v61  ;;  %v8170_v8 = vadd.f32 %v8169_v1, %v8127_v56 }
 0x573   :  { %10307 = vmatprep.subr.bf16.mxu1 %v10406_v21  ;;  %v8171_v17 = vpop.f32.mrf.mxu0 }
 0x574   :  { %v8172_v28 = vadd.f32 %v8171_v17, %v8129_v26 }
 0x575   :  { %v8173_v15 = vpop.f32.mrf.mxu0 }
 0x576   :  { %10308 = vmatpush3.bf16.msra.mxu1 %v10407_v36  ;;  %v8174_v37 = vadd.f32 %v8173_v15, %v8131_v24  ;;  %v10442_v36 = vld [vmem:[#allocation13 + $0x1c8] sm:$0xff]  }
 0x577   :  { %10309 = vmatprep.subr.bf16.mxu1 %v10408_v48  ;;  %v8175_v42 = vpop.f32.mrf.mxu0 }
 0x578   :  { %v8176_v30 = vadd.f32 %v8175_v42, %v8133_v45 }
 0x57a   :  { %10310 = vmatpush3.bf16.msra.mxu1 %v10409_v60 }
 0x57b   :  { %10311 = vmatprep.subr.bf16.mxu1 %v10410_v59 }
 0x57e   :  { %10312 = vmatpush3.bf16.msra.mxu1 %v10411_v46 }
 0x57f   :  { %10313 = vmatprep.subr.bf16.mxu1 %v10412_v41 }
 0x582   :  { %10314 = vmatpush3.bf16.msra.mxu1 %v10413_v11 }
 0x583   :  { %10343 = vmatprep.subr.bf16.mxu1 %v10430_v20 }
 0x585   :  { %9010 = vmatmul.mubr.bf16.vlgmr.msra.gmra.mxu1 %v8411_v53 }
 0x586   :  { %10344 = vmatpush3.bf16.msra.mxu1 %v10431_v22 }
 0x587   :  { %10345 = vmatprep.subr.bf16.mxu1 %v10432_v6  ;;  %v5136_v6 = vrot.slane %v11036_v52, %v10805_v31 }
 0x58a   :  { %10346 = vmatpush3.bf16.msra.mxu1 %v10433_v58  ;;  %v5132_v58 = vrot.slane %v11036_v52, %v10829_v12 }
 0x58b   :  { %10347 = vmatprep.subr.bf16.mxu1 %v10434_v25 }
 0x58e   :  { %10348 = vmatpush3.bf16.msra.mxu1 %v10435_v29 }
 0x58f   :  { %10349 = vmatprep.subr.bf16.mxu1 %v10436_v38 }
 0x592   :  { %10350 = vmatpush3.bf16.msra.mxu1 %v10437_v5 }
 0x593   :  { %10351 = vmatprep.subr.bf16.mxu1 %v10438_v62 }
 0x596   :  { %10352 = vmatpush3.bf16.msra.mxu1 %v10439_v14  ;;  %v8255_v0 = vpop.f32.mrf.mxu0 }
 0x597   :  { %10353 = vmatprep.subr.bf16.mxu1 %v10440_v51  ;;  %v8256_v13 = vadd.f32 %v8255_v0, %v5132_v58 }
 0x598   :  { %v8257_v11 = vpop.f32.mrf.mxu0 }
 0x599   :  { %v8258_v38 = vadd.f32 %v8257_v11, %v5136_v6 }
 0x59a   :  { %10354 = vmatpush3.bf16.msra.mxu1 %v10441_v19  ;;  %v8259_v10 = vpop.f32.mrf.mxu0 }
 0x59b   :  { %10355 = vmatprep.subr.bf16.mxu1 %v10442_v36  ;;  %v8260_v5 = vadd.f32 %v8259_v10, %v5132_v58 }
 0x59c   :  { %v8261_v57 = vpop.f32.mrf.mxu0 }
 0x59d   :  { %v8262_v14 = vadd.f32 %v8261_v57, %v5136_v6 }
 0x59e   :  { %10356 = vmatpush3.bf16.msra.mxu1 %v10443_v23 }
 0x59f   :  { %10357 = vmatprep.subr.bf16.mxu1 %v10444_v54 }
 0x5a2   :  { %10358 = vmatpush3.bf16.msra.mxu1 %v10445_v18 }
 0x5a5   :  { %v8212_v50 = vpop.f32.mrf.mxu1 }
 0x5a6   :  { %v8213_v34 = vadd.f32 %v8212_v50, %v8170_v8 }
 0x5a7   :  { %v8214_v33 = vpop.f32.mrf.mxu1 }
 0x5a8   :  { %v8215_v49 = vadd.f32 %v8214_v33, %v8172_v28  ;;  %v8397_v46 = vmax.f32 %v8213_v34, 0.0 }
 0x5a9   :  { %v8216_v3 = vpop.f32.mrf.mxu1 }
 0x5aa   :  { %v8217_v21 = vadd.f32 %v8216_v3, %v8174_v37  ;;  %v8398_v39 = vmax.f32 %v8215_v49, 0.0 }
 0x5ab   :  { %v8218_v48 = vpop.f32.mrf.mxu1 }
 0x5ac   :  { %v8219_v27 = vadd.f32 %v8218_v48, %v8176_v30  ;;  %v8405_v60 = vmax.f32 %v8217_v21, 0.0  ;;  %v10212_v30 = vld [vmem:[#allocation14] ss:$0 sm:$0xff] }
 0x5ae   :  { %v8406_v59 = vmax.f32 %v8219_v27, 0.0  ;;  %v8413_v41 = vpack.c.bf16 %v8405_v60, %v8397_v46 }
 0x5b0   :  { %v8414_v47 = vpack.c.bf16 %v8406_v59, %v8398_v39 }
 0x5b2   :  { %9050 = vmatprep.mubr.bf16.mxu0 %v8414_v47 }
 0x5b3   :  { %9051 = vmatmul.mubr.bf16.vlgmr.msra.gmra.mxu0 %v8413_v41 }
 0x5d6   :  { %v8341_v53 = vpop.f32.mrf.mxu0 }
 0x5d8   :  { %v8343_v29 = vpop.f32.mrf.mxu0 }
 0x5da   :  { %v8345_v55 = vpop.f32.mrf.mxu0 }
 0x5dc   :  { %v8347_v31 = vpop.f32.mrf.mxu0 }
 0x5e5   :  { %v8298_v20 = vpop.f32.mrf.mxu1 }
 0x5e6   :  { %v8299_v7 = vadd.f32 %v8298_v20, %v8256_v13 }
 0x5e7   :  { %v8300_v22 = vpop.f32.mrf.mxu1 }
 0x5e8   :  { %v8301_v63 = vadd.f32 %v8300_v22, %v8258_v38  ;;  %v8342_v17 = vadd.f32 %v8341_v53, %v8299_v7 }
 0x5e9   :  { %v8302_v25 = vpop.f32.mrf.mxu1 }
 0x5ea   :  { %v8303_v32 = vadd.f32 %v8302_v25, %v8260_v5  ;;  %v8344_v16 = vadd.f32 %v8343_v29, %v8301_v63 }
 0x5eb   :  { %v8304_v62 = vpop.f32.mrf.mxu1 }
 0x5ec   :  { %v8305_v1 = vadd.f32 %v8304_v62, %v8262_v14  ;;  %v8346_v4 = vadd.f32 %v8345_v55, %v8303_v32 }
 0x5ee   :  { %v8348_v40 = vadd.f32 %v8347_v31, %v8305_v1 }
 0x5f6   :  { %v10293_v51 = vpop.f32.mrf.mxu0 }
 0x5f8   :  { %v10294_v33 = vpop.f32.mrf.mxu0 }
 0x5f9   :  { %v10295_v21 = vadd.f32 %v10294_v33, %v10293_v51 }
 0x5fa   :  { %v10296_v19 = vpop.f32.mrf.mxu0 }
 0x5fb   :  { %v8971_v23 = vadd.f32 %v10295_v21, %v10212_v30 }
 0x5fc   :  { %v10297_v28 = vpop.f32.mrf.mxu0 }
 0x5fd   :  { %v10298_v27 = vadd.f32 %v10297_v28, %v10296_v19 }
 0x5ff   :  { %v8974_v47 = vadd.f32 %v10298_v27, %v10212_v30 }
 0x625   :  { %v8384_v2 = vpop.f32.mrf.mxu1 }
 0x626   :  { %v8385_v35 = vadd.f32 %v8384_v2, %v8342_v17 }
 0x627   :  { %v8386_v9 = vpop.f32.mrf.mxu1 }
 0x628   :  { %v8387_v12 = vadd.f32 %v8386_v9, %v8344_v16  ;;  %v8399_v56 = vmax.f32 %v8385_v35, 0.0 }
 0x629   :  { %v8388_v43 = vpop.f32.mrf.mxu1 }
 0x62a   :  { %v8389_v52 = vadd.f32 %v8388_v43, %v8346_v4  ;;  %v8400_v24 = vmax.f32 %v8387_v12, 0.0 }
 0x62b   :  { %v8390_v44 = vpop.f32.mrf.mxu1 }
 0x62c   :  { %v8391_v61 = vadd.f32 %v8390_v44, %v8348_v40  ;;  %v8407_v26 = vmax.f32 %v8389_v52, 0.0 }
 0x62e   :  { %v8408_v15 = vmax.f32 %v8391_v61, 0.0  ;;  %v8415_v45 = vpack.c.bf16 %v8407_v26, %v8399_v56 }
 0x630   :  { %v8416_v50 = vpack.c.bf16 %v8408_v15, %v8400_v24 }
 0x632   :  { %9091 = vmatprep.mubr.bf16.mxu1 %v8416_v50 }
 0x633   :  { %9092 = vmatmul.mubr.bf16.vlgmr.msra.gmra.mxu1 %v8415_v45 }
 0x645   :  { %v10315_v37 = vpop.f32.mrf.mxu1 }
 0x647   :  { %v10316_v8 = vpop.f32.mrf.mxu1 }
 0x648   :  { %v10317_v34 = vadd.f32 %v10316_v8, %v10315_v37 }
 0x649   :  { %v10318_v49 = vpop.f32.mrf.mxu1 }
 0x64a   :  { %v9012_v54 = vadd.f32 %v10317_v34, %v8971_v23 }
 0x64b   :  { %v10319_v48 = vpop.f32.mrf.mxu1 }
 0x64c   :  { %v10320_v46 = vadd.f32 %v10319_v48, %v10318_v49 }
 0x64e   :  { %v9015_v20 = vadd.f32 %v10320_v46, %v8974_v47 }
 0x673   :  { %v10337_v42 = vpop.f32.mrf.mxu0 }
 0x675   :  { %v10338_v3 = vpop.f32.mrf.mxu0 }
 0x676   :  { %v10339_v60 = vadd.f32 %v10338_v3, %v10337_v42 }
 0x677   :  { %v10340_v36 = vpop.f32.mrf.mxu0 }
 0x678   :  { %v9053_v41 = vadd.f32 %v10339_v60, %v9012_v54 }
 0x679   :  { %v10341_v39 = vpop.f32.mrf.mxu0 }
 0x67a   :  { %v10342_v0 = vadd.f32 %v10341_v39, %v10340_v36 }
 0x67c   :  { %v9056_v53 = vadd.f32 %v10342_v0, %v9015_v20 }
 0x6f3   :  { %v10359_v59 = vpop.f32.mrf.mxu1 }
 0x6f5   :  { %v10360_v18 = vpop.f32.mrf.mxu1 }
 0x6f6   :  { %v10361_v11 = vadd.f32 %v10360_v18, %v10359_v59 }
 0x6f7   :  { %v10362_v10 = vpop.f32.mrf.mxu1 }
 0x6f8   :  { %v9094_v57 = vadd.f32 %v10361_v11, %v9053_v41 }
 0x6f9   :  { %v10363_v22 = vpop.f32.mrf.mxu1 }
 0x6fa   :  { %9100 = vst [vmem:[#allocation16] sm:$0xff] %v9094_v57  ;;  %v10364_v6 = vadd.f32 %v10363_v22, %v10362_v10 }
 0x6fc   :  { %v9097_v58 = vadd.f32 %v10364_v6, %v9056_v53 }
 0x6fe   :  { %9101 = vst [vmem:[#allocation16 + $0x8] sm:$0xff] %v9097_v58 }
 0x6ff   :  { %10619 = shalt.err (!%p10616_p2)
}
 0x700   :  { %s10654_s27 = smov 128   ;;  %s10655_s28 = smov 8  }
 0x701   :  { %9113 = dma.vmem_to_hbm [thread:$0]  %s9108_s4, 256, %s11105_s9, [#allocation4], %s10654_s27, %s10654_s27, %s10655_s28  }
 0x702   :  { %10638 = dma.done.wait [#allocation4], 256  }
 0x703   :  { %10639 = vsyncadd [#allocation4], 4294967040 }
 0x704   :  { %9117 = vsyncpa [#allocation3], 1 }
 0x705   :  { %9118 = vsyncpa [#allocation6], 1 }
 0x706   :  { %9119 = vsyncpa [#allocation9], 1 }
 0x707   :  { %9120 = vsyncpa [#allocation12], 1 }
 0x708   :  { %9121 = vsyncpa [#allocation15], 1 }
 0x709   :  { %9122 = vsyncpa [#allocation4], 1 }

</bundles_post_ra>
